<compile_context>
chip_gen: v5e
topology: v5e:2x2
jax: 0.10.0
libtpu: 0.0.40
codegen_flags: <defaults>
</compile_context>

<pallas_src>
import jax
import jax.numpy as jnp
from jax.experimental import pallas as pl
from jax.experimental.pallas import tpu as pltpu

BN_EPS = 1e-5
FC_UNITS = 512                     # C (fc_units)
HIDDEN = FC_UNITS // 2             # 256 per head
N_GENDER, N_CATEGORY, N_SPORT = 5, 7, 8
HIDDEN_ALL = 3 * HIDDEN            # 768 fused hidden width (lane aligned)
N_PAD = 128                        # lane-dense fused output width (20 used)

# Conservative cross-generation VMEM accounting (v7x has only 64 MiB physical
# VMEM per TensorCore; scoped default is 32 MiB everywhere).
VMEM_BUDGET = 24 * 1024 * 1024
VMEM_LIMIT = 32 * 1024 * 1024
WEIGHT_VMEM_BYTES = 2 * (FC_UNITS * HIDDEN_ALL * 2     # w1 bf16 (double-buffered)
                         + HIDDEN_ALL * N_PAD * 2      # w2 bf16
                         + HIDDEN_ALL * 4 + N_PAD * 4)  # biases f32


# ----------------------------------------------------------------------------
# Kernels
# ----------------------------------------------------------------------------
def fused_kernel_single(x_ref, w1_ref, b1_ref, w2_ref, b2_ref, out_ref):
    """Whole spatial extent in one tile: pool + fused MLP in a single pass."""
    # x block: (BT, C, HW). Spatial sum is a cross-lane (XLU) reduce; the
    # pooled result comes out lane-dense over C = 512 for the MXU.
    pooled = jnp.sum(x_ref[...].astype(jnp.float32), axis=-1)       # [BT, C]
    # 1/HW (mean) and eval-BN are folded into w1/b1 at wrapper time.
    h = jnp.dot(pooled.astype(jnp.bfloat16), w1_ref[...],
                preferred_element_type=jnp.float32) + b1_ref[...]
    h = jnp.maximum(h, 0.0)                                          # [BT, 768]
    out_ref[...] = jnp.dot(h.astype(jnp.bfloat16), w2_ref[...],
                           preferred_element_type=jnp.float32) + b2_ref[...]


def fused_kernel_multi(x_ref, w1_ref, b1_ref, w2_ref, b2_ref, out_ref, acc_ref):
    """Spatial axis tiled: f32 sum-accumulate, fused MLP on the last step."""
    k = pl.program_id(1)

    @pl.when(k == 0)
    def _():
        acc_ref[...] = jnp.zeros_like(acc_ref)

    acc_ref[...] += jnp.sum(x_ref[...].astype(jnp.float32), axis=-1)

    @pl.when(k == pl.num_programs(1) - 1)
    def _():
        # 1/HW is folded into w1, so the raw spatial sum feeds the matmul.
        h = jnp.dot(acc_ref[...].astype(jnp.bfloat16), w1_ref[...],
                    preferred_element_type=jnp.float32) + b1_ref[...]
        h = jnp.maximum(h, 0.0)
        out_ref[...] = jnp.dot(h.astype(jnp.bfloat16), w2_ref[...],
                               preferred_element_type=jnp.float32) + b2_ref[...]


# ----------------------------------------------------------------------------
# Parameter construction / wrapper-side fusion
# ----------------------------------------------------------------------------
def make_params(key):
    """Deterministic synthetic parameters for the three heads (PyTorch layout)."""
    def head_params(k, n_out):
        ks = jax.random.split(k, 8)
        w1 = jax.random.normal(ks[0], (FC_UNITS, HIDDEN), jnp.float32) * 0.02
        b1 = jax.random.normal(ks[1], (1, HIDDEN), jnp.float32) * 0.02
        gamma = 1.0 + 0.1 * jax.random.normal(ks[2], (1, HIDDEN), jnp.float32)
        beta = 0.1 * jax.random.normal(ks[3], (1, HIDDEN), jnp.float32)
        rmean = 0.1 * jax.random.normal(ks[4], (1, HIDDEN), jnp.float32)
        rvar = jax.random.uniform(ks[5], (1, HIDDEN), jnp.float32, 0.5, 1.5)
        w2 = jax.random.normal(ks[6], (HIDDEN, n_out), jnp.float32) * 0.05
        b2 = jax.random.normal(ks[7], (1, n_out), jnp.float32) * 0.05
        return (w1, b1, gamma, beta, rmean, rvar, w2, b2)

    k1, k2, k3 = jax.random.split(key, 3)
    return (head_params(k1, N_GENDER),
            head_params(k2, N_CATEGORY),
            head_params(k3, N_SPORT))


def fold_and_fuse(params, hw):
    """Fold eval-BN + 1/HW mean into Linear1, fuse heads, cast weights to bf16."""
    w1_cols, b1_cols = [], []
    w2_all = jnp.zeros((HIDDEN_ALL, N_PAD), jnp.float32)
    b2_all = jnp.zeros((1, N_PAD), jnp.float32)
    col = 0
    for hi, p in enumerate(params):
        w1, b1, gamma, beta, rmean, rvar, w2, b2 = p
        scale = gamma * jax.lax.rsqrt(rvar + BN_EPS)              # [1, 256]
        w1_cols.append(w1 * scale * (1.0 / hw))                   # BN + mean fold
        b1_cols.append((b1 - rmean) * scale + beta)               # [1, 256]
        n = w2.shape[1]
        w2_all = w2_all.at[hi * HIDDEN:(hi + 1) * HIDDEN, col:col + n].set(w2)
        b2_all = b2_all.at[:, col:col + n].set(b2)
        col += n
    w1_all = jnp.concatenate(w1_cols, axis=1).astype(jnp.bfloat16)  # [512, 768]
    b1_all = jnp.concatenate(b1_cols, axis=1)                       # [1, 768] f32
    w2_all = w2_all.astype(jnp.bfloat16)                            # [768, 128]
    return w1_all, b1_all, w2_all, b2_all


# ----------------------------------------------------------------------------
# Tile selection (VMEM-budget aware)
# ----------------------------------------------------------------------------
def _divisor_tile(total, cap, align):
    """Largest multiple of `align` dividing `total`, <= cap; else full axis."""
    t = min(cap, total)
    t -= t % align
    while t >= align:
        if total % t == 0:
            return t
        t -= align
    return total


def _choose_tiles(B, HW, x_elem_bytes, bt_cap, hwt_cap):
    """Pick (BT, HWT) so buffered x blocks + weights + scratch fit the budget.

    Prefers a batch grid >= 2 (so the v7x megacore 'parallel' axis has work),
    shrinks the spatial tile first, then the batch tile.
    """
    prev = None
    while True:
        bt_limit = min(bt_cap, B // 2) if B >= 16 else bt_cap
        BT = _divisor_tile(B, bt_limit, 8)
        HWT = _divisor_tile(HW, hwt_cap, 128)
        n_buf = 3 if HW // HWT > 2 else 2         # Buffered(3) on deep grids
        need = (n_buf * BT * FC_UNITS * HWT * x_elem_bytes   # x blocks
                + BT * FC_UNITS * 4                          # acc scratch
                + 2 * BT * N_PAD * 4                         # out blocks
                + WEIGHT_VMEM_BYTES)
        if need <= VMEM_BUDGET or (BT, HWT) == prev:
            # TODO(synk): for pathological (e.g. prime) B/HW no aligned divisor
            # exists; pad the array instead of accepting a full-axis block.
            return BT, HWT
        prev = (BT, HWT)
        if HWT > 128 and hwt_cap > 128:
            hwt_cap = max(128, HWT // 2)
        elif BT > 8 and bt_cap > 8:
            bt_cap = max(8, BT // 2)
        else:
            return BT, HWT


# ----------------------------------------------------------------------------
# Forward
# ----------------------------------------------------------------------------
def basemodel_forward(x_nchw, params, *, max_batch_tile=128, max_spatial_tile=1024):
    B, C, H, W = x_nchw.shape
    assert C == FC_UNITS, "fc_units is 512, so the channel dim must be 512"
    HW = H * W

    # [B, C, HW]: free reshape — no HBM transpose, no dtype cast.  The spatial
    # pool happens inside the kernel as a cross-lane reduce.
    x = x_nchw.reshape(B, C, HW)

    w1_all, b1_all, w2_all, b2_all = fold_and_fuse(params, HW)

    x_bytes = x.dtype.itemsize
    BT, HWT = _choose_tiles(B, HW, x_bytes, max_batch_tile, max_spatial_tile)
    spatial_steps = HW // HWT
    assert B % BT == 0 and HW % HWT == 0

    cost = pl.CostEstimate(
        flops=int(B * C * HW                       # pooling adds
                  + 2 * B * C * HIDDEN_ALL         # fused Linear1
                  + 2 * B * HIDDEN_ALL * N_PAD),   # fused Linear2
        transcendentals=0,
        bytes_accessed=int(x.size * x_bytes + w1_all.size * 2 + w2_all.size * 2
                           + b1_all.size * 4 + b2_all.size * 4 + B * N_PAD * 4),
    )

    if spatial_steps == 1:
        # Common 7x7 / 8x8 case: no accumulator, no k-axis bookkeeping.
        grid = (B // BT,)
        in_specs = [
            pl.BlockSpec((BT, C, HWT), lambda i: (i, 0, 0)),
            pl.BlockSpec((C, HIDDEN_ALL), lambda i: (0, 0)),
            pl.BlockSpec((1, HIDDEN_ALL), lambda i: (0, 0)),
            pl.BlockSpec((HIDDEN_ALL, N_PAD), lambda i: (0, 0)),
            pl.BlockSpec((1, N_PAD), lambda i: (0, 0)),
        ]
        out_specs = pl.BlockSpec((BT, N_PAD), lambda i: (i, 0))
        scratch_shapes = []
        kernel = fused_kernel_single
        dim_sem = ("parallel",)
    else:
        grid = (B // BT, spatial_steps)
        x_spec_kwargs = {}
        if spatial_steps > 2:
            # Per-step work is only VPU/XLU adds -> DMA-latency bound; a third
            # buffer hides DMA issue latency on deep spatial grids.
            x_spec_kwargs["pipeline_mode"] = pl.Buffered(3)
        in_specs = [
            pl.BlockSpec((BT, C, HWT), lambda i, k: (i, 0, k), **x_spec_kwargs),
            pl.BlockSpec((C, HIDDEN_ALL), lambda i, k: (0, 0)),
            pl.BlockSpec((1, HIDDEN_ALL), lambda i, k: (0, 0)),
            pl.BlockSpec((HIDDEN_ALL, N_PAD), lambda i, k: (0, 0)),
            pl.BlockSpec((1, N_PAD), lambda i, k: (0, 0)),
        ]
        out_specs = pl.BlockSpec((BT, N_PAD), lambda i, k: (i, 0))
        scratch_shapes = [pltpu.VMEM((BT, C), jnp.float32)]
        kernel = fused_kernel_multi
        dim_sem = ("parallel", "arbitrary")

    out = pl.pallas_call(
        kernel,
        out_shape=jax.ShapeDtypeStruct((B, N_PAD), jnp.float32),
        grid_spec=pltpu.PrefetchScalarGridSpec(
            num_scalar_prefetch=0,
            grid=grid,
            in_specs=in_specs,
            out_specs=out_specs,
            scratch_shapes=scratch_shapes,
        ),
        compiler_params=pltpu.CompilerParams(
            dimension_semantics=dim_sem,
            vmem_limit_bytes=VMEM_LIMIT,
        ),
        cost_estimate=cost,
    )(x, w1_all, b1_all, w2_all, b2_all)

    gender = out[:, :N_GENDER]
    category = out[:, N_GENDER:N_GENDER + N_CATEGORY]
    sport = out[:, N_GENDER + N_CATEGORY:N_GENDER + N_CATEGORY + N_SPORT]
    return gender, category, sport


# ----------------------------------------------------------------------------
# Plain-JAX reference (unfused, un-folded, f32) for validation
# ----------------------------------------------------------------------------
def reference_forward(x_nchw, params):
    pooled = jnp.mean(
        x_nchw.astype(jnp.float32).reshape(x_nchw.shape[0], x_nchw.shape[1], -1),
        axis=-1)

    def head(p):
        w1, b1, gamma, beta, rmean, rvar, w2, b2 = p
        h = pooled @ w1 + b1
        h = (h - rmean) / jnp.sqrt(rvar + BN_EPS) * gamma + beta
        h = jnp.maximum(h, 0.0)
        return h @ w2 + b2

    return tuple(head(p) for p in params)


if __name__ == "__main__":
    key = jax.random.PRNGKey(0)
    kx, kp, kx2 = jax.random.split(key, 3)
    params = make_params(kp)

    # --- single-pass case (whole spatial extent in one tile, like 7x7/8x8 maps)
    B, C, H, W = 4, FC_UNITS, 8, 8
    x = jax.random.normal(kx, (B, C, H, W), jnp.float32)
    gender, category, sport = jax.block_until_ready(basemodel_forward(x, params))

    assert gender.shape == (B, N_GENDER)
    assert category.shape == (B, N_CATEGORY)
    assert sport.shape == (B, N_SPORT)

    rg, rc, rs = reference_forward(x, params)
    # bf16 MXU inputs (with f32 accumulation) -> slightly looser tolerance.
    assert jnp.allclose(gender, rg, atol=1e-2, rtol=1e-2)
    assert jnp.allclose(category, rc, atol=1e-2, rtol=1e-2)
    assert jnp.allclose(sport, rs, atol=1e-2, rtol=1e-2)

    # --- multi-step spatial-accumulator path (force a small spatial tile)
    B2, H2, W2 = 2, 16, 16
    x2 = jax.random.normal(kx2, (B2, FC_UNITS, H2, W2), jnp.float32)
    g2, c2, s2 = jax.block_until_ready(
        basemodel_forward(x2, params, max_spatial_tile=128))
    rg2, rc2, rs2 = reference_forward(x2, params)
    assert g2.shape == (B2, N_GENDER)
    assert jnp.allclose(g2, rg2, atol=1e-2, rtol=1e-2)
    assert jnp.allclose(c2, rc2, atol=1e-2, rtol=1e-2)
    assert jnp.allclose(s2, rs2, atol=1e-2, rtol=1e-2)

    print("KERNEL_OK")
</pallas_src>

<mosaic_0001>
module attributes {stable_mosaic.version = 11 : i64} {
  func.func @fused_kernel_single(%arg0: i32, %arg1: memref<4x512x64xf32, #tpu.memory_space<vmem>>, %arg2: memref<512x768xbf16, #tpu.memory_space<vmem>>, %arg3: memref<1x768xf32, #tpu.memory_space<vmem>>, %arg4: memref<768x128xbf16, #tpu.memory_space<vmem>>, %arg5: memref<1x128xf32, #tpu.memory_space<vmem>>, %arg6: memref<4x128xf32, #tpu.memory_space<vmem>>) attributes {dimension_semantics = [#tpu.dimension_semantics<parallel>], iteration_bounds = array<i64: 1>, scalar_prefetch = 0 : i64, scratch_operands = 0 : i64, tpu.core_type = #tpu.core_type<tc>, window_params = [{transform_indices = @transform_0, window_bounds = array<i64: 4, 512, 64>}, {pipeline_mode = #tpu.pipeline_mode<synchronous>, transform_indices = @transform_1, window_bounds = array<i64: 512, 768>}, {pipeline_mode = #tpu.pipeline_mode<synchronous>, transform_indices = @transform_2, window_bounds = array<i64: 1, 768>}, {pipeline_mode = #tpu.pipeline_mode<synchronous>, transform_indices = @transform_3, window_bounds = array<i64: 768, 128>}, {pipeline_mode = #tpu.pipeline_mode<synchronous>, transform_indices = @transform_4, window_bounds = array<i64: 1, 128>}, {transform_indices = @transform_5, window_bounds = array<i64: 4, 128>}]} {
    %c0 = arith.constant 0 : index
    %c0_0 = arith.constant 0 : index
    %c0_1 = arith.constant 0 : index
    %0 = vector.load %arg1[%c0, %c0_0, %c0_1] : memref<4x512x64xf32, #tpu.memory_space<vmem>>, vector<4x512x64xf32>
    %cst = arith.constant dense<0.000000e+00> : vector<4x512xf32>
    %1 = vector.multi_reduction <add>, %0, %cst [2] : vector<4x512x64xf32> to vector<4x512xf32>
    %2 = arith.truncf %1 : vector<4x512xf32> to vector<4x512xbf16>
    %c0_2 = arith.constant 0 : index
    %c0_3 = arith.constant 0 : index
    %3 = vector.load %arg2[%c0_2, %c0_3] : memref<512x768xbf16, #tpu.memory_space<vmem>>, vector<512x768xbf16>
    %cst_4 = arith.constant dense<0.000000e+00> : vector<4x768xf32>
    %4 = tpu.matmul %2, %3, %cst_4 {dimension_numbers = #tpu.dot_dimension_numbers<[1], [0], [0], [1], [0, 0, 1, 1], [], []>} : vector<4x512xbf16>, vector<512x768xbf16>, vector<4x768xf32> -> vector<4x768xf32>
    %c0_5 = arith.constant 0 : index
    %c0_6 = arith.constant 0 : index
    %5 = vector.load %arg3[%c0_5, %c0_6] : memref<1x768xf32, #tpu.memory_space<vmem>>, vector<1x768xf32>
    %6 = vector.broadcast %5 : vector<1x768xf32> to vector<4x768xf32>
    %7 = arith.addf %4, %6 : vector<4x768xf32>
    %cst_7 = arith.constant 0.000000e+00 : f32
    %8 = vector.broadcast %cst_7 : f32 to vector<4x768xf32>
    %9 = arith.maximumf %7, %8 : vector<4x768xf32>
    %10 = arith.truncf %9 : vector<4x768xf32> to vector<4x768xbf16>
    %c0_8 = arith.constant 0 : index
    %c0_9 = arith.constant 0 : index
    %11 = vector.load %arg4[%c0_8, %c0_9] : memref<768x128xbf16, #tpu.memory_space<vmem>>, vector<768x128xbf16>
    %cst_10 = arith.constant dense<0.000000e+00> : vector<4x128xf32>
    %12 = tpu.matmul %10, %11, %cst_10 {dimension_numbers = #tpu.dot_dimension_numbers<[1], [0], [0], [1], [0, 0, 1, 1], [], []>} : vector<4x768xbf16>, vector<768x128xbf16>, vector<4x128xf32> -> vector<4x128xf32>
    %c0_11 = arith.constant 0 : index
    %c0_12 = arith.constant 0 : index
    %13 = vector.load %arg5[%c0_11, %c0_12] : memref<1x128xf32, #tpu.memory_space<vmem>>, vector<1x128xf32>
    %14 = vector.broadcast %13 : vector<1x128xf32> to vector<4x128xf32>
    %15 = arith.addf %12, %14 : vector<4x128xf32>
    %c0_13 = arith.constant 0 : index
    %c0_14 = arith.constant 0 : index
    %16 = vector.load %arg6[%c0_13, %c0_14] : memref<4x128xf32, #tpu.memory_space<vmem>>, vector<4x128xf32>
    tpu.vector_store %arg6[%c0_13, %c0_14], %15 {strides = array<i32>} : memref<4x128xf32, #tpu.memory_space<vmem>>, vector<4x128xf32>,
    return
  }
  func.func @transform_0(%arg0: i32) -> (i32, i32, i32) {
    %c0_i32 = arith.constant 0 : i32
    %c0_i32_0 = arith.constant 0 : i32
    %c0_i32_1 = arith.constant 0 : i32
    return %arg0, %c0_i32, %c0_i32_0 : i32, i32, i32
  }
  func.func @transform_1(%arg0: i32) -> (i32, i32) {
    %c0_i32 = arith.constant 0 : i32
    %c0_i32_0 = arith.constant 0 : i32
    %c0_i32_1 = arith.constant 0 : i32
    return %c0_i32, %c0_i32_0 : i32, i32
  }
  func.func @transform_2(%arg0: i32) -> (i32, i32) {
    %c0_i32 = arith.constant 0 : i32
    %c0_i32_0 = arith.constant 0 : i32
    %c0_i32_1 = arith.constant 0 : i32
    return %c0_i32, %c0_i32_0 : i32, i32
  }
  func.func @transform_3(%arg0: i32) -> (i32, i32) {
    %c0_i32 = arith.constant 0 : i32
    %c0_i32_0 = arith.constant 0 : i32
    %c0_i32_1 = arith.constant 0 : i32
    return %c0_i32, %c0_i32_0 : i32, i32
  }
  func.func @transform_4(%arg0: i32) -> (i32, i32) {
    %c0_i32 = arith.constant 0 : i32
    %c0_i32_0 = arith.constant 0 : i32
    %c0_i32_1 = arith.constant 0 : i32
    return %c0_i32, %c0_i32_0 : i32, i32
  }
  func.func @transform_5(%arg0: i32) -> (i32, i32) {
    %c0_i32 = arith.constant 0 : i32
    %c0_i32_0 = arith.constant 0 : i32
    return %arg0, %c0_i32 : i32, i32
  }
}

</mosaic_0001>

<bundles_post_ra>
// kernel: tpu_custom_call.1
= control target key start
LH: loop header
LB: loop body
LE: loop exit
PB: predicated region body
PF: predicated region fallthrough
CT: control target
= control target key end

     0   :  { %vm277_vm0 = vcmask 523264   ;;  %s8992_s0 = inlined_call_operand.vmem [shape: f32[4,512,64], index: 0, kind: input, shape index: {}]   ;;  %s8993_s1 = inlined_call_operand.vmem [shape: bf16[512,768], index: 1, kind: input, shape index: {}]   ;;  %s8994_s2 = inlined_call_operand.vmem [shape: f32[1,768], index: 2, kind: input, shape index: {}]   ;;  %s8995_s3 = inlined_call_operand.vmem [shape: bf16[768,128], index: 3, kind: input, shape index: {}]   ;;  %s8996_s4 = inlined_call_operand.vmem [shape: f32[1,128], index: 4, kind: input, shape index: {}]   ;;  %s8997_s5 = inlined_call_operand.hbm [shape: f32[4,128], index: 5, kind: output, shape index: {}]  }
   0x1   :  { %v25_v0 = vld [vmem:[%s8992_s0 + $0x20] sm:$0xff]  ;;  %v23_v1 = vld [vmem:[%s8992_s0 + $0x10] sm:$0xff]  ;;  %v26_v6 = vld [vmem:[%s8992_s0 + $0x28] sm:$0xff] }
   0x2   :  { %v21_v2 = vld [vmem:[%s8992_s0] sm:$0xff]  ;;  %v290_v3 = vsel %vm277_vm0, %v25_v0, 0.0  ;;  %v284_v4 = vsel %vm277_vm0, %v23_v1, 0.0  ;;  %v24_v7 = vld [vmem:[%s8992_s0 + $0x18] sm:$0xff]  ;;  %v22_v8 = vld [vmem:[%s8992_s0 + $0x8] sm:$0xff] }
   0x3   :  { %v278_v5 = vsel %vm277_vm0, %v21_v2, 0.0  ;;  %291 = vadd.xlane.f32.xlu2 %v290_v3  ;;  %285 = vadd.xlane.f32.xlu1 %v284_v4 }
   0x4   :  { %279 = vadd.xlane.f32.xlu0 %v278_v5 }
   0x5   :  { %10 = vsyncpa [#allocation3], 0  ;;  %v293_v9 = vsel %vm277_vm0, %v26_v6, 0.0  ;;  %v287_v10 = vsel %vm277_vm0, %v24_v7, 0.0  ;;  %v281_v11 = vsel %vm277_vm0, %v22_v8, 0.0  ;;  %v29_v12 = vld [vmem:[%s8992_s0 + $0x40] sm:$0xff] }
   0x6   :  { %v28_v13 = vld [vmem:[%s8992_s0 + $0x38] sm:$0xff]  ;;  %v27_v14 = vld [vmem:[%s8992_s0 + $0x30] sm:$0xff]  ;;  %v302_v15 = vsel %vm277_vm0, %v29_v12, 0.0  ;;  %v30_v20 = vld [vmem:[%s8992_s0 + $0x48] sm:$0xff]  ;;  %vm1769_vm1 = vcmask 130112   ;;  %vm1773_vm2 = vcmask 195712  }
   0x7   :  { %v299_v16 = vsel %vm277_vm0, %v28_v13, 0.0  ;;  %v296_v17 = vsel %vm277_vm0, %v27_v14, 0.0  ;;  %v32_v18 = vld [vmem:[%s8992_s0 + $0x58] sm:$0xff]  ;;  %v31_v19 = vld [vmem:[%s8992_s0 + $0x50] sm:$0xff]  ;;  %v305_v23 = vsel %vm277_vm0, %v30_v20, 0.0  ;;  %v34_v25 = vld [vmem:[%s8992_s0 + $0x68] sm:$0xff] }
   0x8   :  { %v311_v21 = vsel %vm277_vm0, %v32_v18, 0.0  ;;  %v308_v22 = vsel %vm277_vm0, %v31_v19, 0.0  ;;  %v35_v24 = vld [vmem:[%s8992_s0 + $0x70] sm:$0xff]  ;;  %v33_v26 = vld [vmem:[%s8992_s0 + $0x60] sm:$0xff]  ;;  %v317_v28 = vsel %vm277_vm0, %v34_v25, 0.0  ;;  %v38_v30 = vld [vmem:[%s8992_s0 + $0x88] sm:$0xff] }
   0x9   :  { %v320_v27 = vsel %vm277_vm0, %v35_v24, 0.0  ;;  %v314_v29 = vsel %vm277_vm0, %v33_v26, 0.0  ;;  %v37_v31 = vld [vmem:[%s8992_s0 + $0x80] sm:$0xff]  ;;  %v36_v32 = vld [vmem:[%s8992_s0 + $0x78] sm:$0xff]  ;;  %v329_v33 = vsel %vm277_vm0, %v38_v30, 0.0  ;;  %v39_v38 = vld [vmem:[%s8992_s0 + $0x90] sm:$0xff] }
   0xa   :  { %v326_v34 = vsel %vm277_vm0, %v37_v31, 0.0  ;;  %v323_v35 = vsel %vm277_vm0, %v36_v32, 0.0  ;;  %v41_v36 = vld [vmem:[%s8992_s0 + $0xa0] sm:$0xff]  ;;  %v40_v37 = vld [vmem:[%s8992_s0 + $0x98] sm:$0xff]  ;;  %v332_v41 = vsel %vm277_vm0, %v39_v38, 0.0  ;;  %v43_v43 = vld [vmem:[%s8992_s0 + $0xb0] sm:$0xff] }
   0xb   :  { %294 = vadd.xlane.f32.xlu2 %v293_v9  ;;  %288 = vadd.xlane.f32.xlu1 %v287_v10  ;;  %v338_v39 = vsel %vm277_vm0, %v41_v36, 0.0  ;;  %v335_v40 = vsel %vm277_vm0, %v40_v37, 0.0  ;;  %v44_v42 = vld [vmem:[%s8992_s0 + $0xb8] sm:$0xff]  ;;  %v42_v44 = vld [vmem:[%s8992_s0 + $0xa8] sm:$0xff]  ;;  %v344_v46 = vsel %vm277_vm0, %v43_v43, 0.0  ;;  %v47_v48 = vld [vmem:[%s8992_s0 + $0xd0] sm:$0xff] }
   0xc   :  { %282 = vadd.xlane.f32.xlu0 %v281_v11  ;;  %v347_v45 = vsel %vm277_vm0, %v44_v42, 0.0  ;;  %v341_v47 = vsel %vm277_vm0, %v42_v44, 0.0  ;;  %v46_v49 = vld [vmem:[%s8992_s0 + $0xc8] sm:$0xff]  ;;  %v45_v50 = vld [vmem:[%s8992_s0 + $0xc0] sm:$0xff]  ;;  %v356_v51 = vsel %vm277_vm0, %v47_v48, 0.0  ;;  %v48_v56 = vld [vmem:[%s8992_s0 + $0xd8] sm:$0xff] }
   0xd   :  { %v353_v52 = vsel %vm277_vm0, %v46_v49, 0.0  ;;  %v350_v53 = vsel %vm277_vm0, %v45_v50, 0.0  ;;  %v50_v54 = vld [vmem:[%s8992_s0 + $0xe8] sm:$0xff]  ;;  %v49_v55 = vld [vmem:[%s8992_s0 + $0xe0] sm:$0xff]  ;;  %v359_v59 = vsel %vm277_vm0, %v48_v56, 0.0  ;;  %v52_v61 = vld [vmem:[%s8992_s0 + $0xf8] sm:$0xff] }
   0xe   :  { %v365_v57 = vsel %vm277_vm0, %v50_v54, 0.0  ;;  %v362_v58 = vsel %vm277_vm0, %v49_v55, 0.0  ;;  %v53_v60 = vld [vmem:[%s8992_s0 + $0x100] sm:$0xff]  ;;  %v51_v62 = vld [vmem:[%s8992_s0 + $0xf0] sm:$0xff]  ;;  %v371_v0 = vsel %vm277_vm0, %v52_v61, 0.0  ;;  %v56_v2 = vld [vmem:[%s8992_s0 + $0x118] sm:$0xff] }
   0xf   :  { %v374_v63 = vsel %vm277_vm0, %v53_v60, 0.0  ;;  %v368_v1 = vsel %vm277_vm0, %v51_v62, 0.0  ;;  %v55_v3 = vld [vmem:[%s8992_s0 + $0x110] sm:$0xff]  ;;  %v54_v4 = vld [vmem:[%s8992_s0 + $0x108] sm:$0xff]  ;;  %v383_v5 = vsel %vm277_vm0, %v56_v2, 0.0  ;;  %v57_v10 = vld [vmem:[%s8992_s0 + $0x120] sm:$0xff] }
  0x10   :  { %v380_v6 = vsel %vm277_vm0, %v55_v3, 0.0  ;;  %v377_v7 = vsel %vm277_vm0, %v54_v4, 0.0  ;;  %v59_v8 = vld [vmem:[%s8992_s0 + $0x130] sm:$0xff]  ;;  %v58_v9 = vld [vmem:[%s8992_s0 + $0x128] sm:$0xff]  ;;  %v386_v13 = vsel %vm277_vm0, %v57_v10, 0.0  ;;  %v65_v20 = vld [vmem:[%s8992_s0 + $0x160] sm:$0xff] }
  0x11   :  { %v392_v11 = vsel %vm277_vm0, %v59_v8, 0.0  ;;  %v389_v12 = vsel %vm277_vm0, %v58_v9, 0.0  ;;  %v62_v14 = vld [vmem:[%s8992_s0 + $0x148] sm:$0xff]  ;;  %v68_v26 = vld [vmem:[%s8992_s0 + $0x178] sm:$0xff]  ;;  %vm9004_vm3 = vcmask 261312   ;;  %vm1781_vm4 = vcmask 326912  }
  0x12   :  { %v66_v30 = vld [vmem:[%s8992_s0 + $0x168] sm:$0xff]  ;;  %v419_v32 = vsel %vm277_vm0, %v68_v26, 0.0  ;;  %v72_v48 = vld [vmem:[%s8992_s0 + $0x198] sm:$0xff]  ;;  %vm1785_vm5 = vcmask 392512   ;;  %vm1789_vm6 = vcmask 458112   ;;  %vm1793_vm7 = vcmask 523712  }
  0x13   :  { %303 = vadd.xlane.f32.xlu2 %v302_v15  ;;  %300 = vadd.xlane.f32.xlu1 %v299_v16  ;;  %v61_v15 = vld [vmem:[%s8992_s0 + $0x140] sm:$0xff]  ;;  %v60_v16 = vld [vmem:[%s8992_s0 + $0x138] sm:$0xff]  ;;  %v70_v38 = vld [vmem:[%s8992_s0 + $0x188] sm:$0xff]  ;;  %vm1797_vm8 = vcmask 589312   ;;  %vm1801_vm9 = vcmask 654912   ;;  %vm1805_vm10 = vcmask 720512  }
  0x14   :  { %297 = vadd.xlane.f32.xlu0 %v296_v17  ;;  %v401_v17 = vsel %vm277_vm0, %v62_v14, 0.0  ;;  %v398_v18 = vsel %vm277_vm0, %v61_v15, 0.0  ;;  %v395_v19 = vsel %vm277_vm0, %v60_v16, 0.0  ;;  %v425_v42 = vsel %vm277_vm0, %v70_v38, 0.0  ;;  %v74_v44 = vld [vmem:[%s8992_s0 + $0x1a8] sm:$0xff]  ;;  %v76_v56 = vld [vmem:[%s8992_s0 + $0x1b8] sm:$0xff] }
  0x15   :  { %v437_v50 = vsel %vm277_vm0, %v74_v44, 0.0  ;;  %v443_v60 = vsel %vm277_vm0, %v76_v56, 0.0  ;;  %v80_v62 = vld [vmem:[%s8992_s0 + $0x1d8] sm:$0xff]  ;;  %v78_v2 = vld [vmem:[%s8992_s0 + $0x1c8] sm:$0xff]  ;;  %vm1809_vm11 = vcmask 786112   ;;  %vm1813_vm12 = vcmask 851712  }
  0x16   :  { %v455_v4 = vsel %vm277_vm0, %v80_v62, 0.0  ;;  %v82_v10 = vld [vmem:[%s8992_s0 + $0x1e8] sm:$0xff]  ;;  %vm1817_vm13 = vcmask 917312   ;;  %vm1821_vm14 = vcmask 982912   ;;  %vm1825_vm15 = vcmask 1048512   ;;  %s5310_s8 = smov [#allocation2]  }
  0x17   :  { %v461_v14 = vsel %vm277_vm0, %v82_v10, 0.0  ;;  %v86_v16 = vld [vmem:[%s8992_s0 + $0x208] sm:$0xff]  ;;  %s4071_s9 = sshll.u32 %s5310_s8, 4  ;;  %s4073_s12 = sshll.u32 %s8997_s5, 4  ;;  %s4072_s9 = int_to_ptr.vmem [resolvable:$true] %s4071_s9  ;;  %s4074_s12 = int_to_ptr.hbm [resolvable:$true] %s4073_s12 }
  0x18   :  { %v90_v44 = vld [vmem:[%s8992_s0 + $0x228] sm:$0xff] }
  0x1b   :  { %312 = vadd.xlane.f32.xlu2 %v311_v21  ;;  %309 = vadd.xlane.f32.xlu1 %v308_v22  ;;  %v64_v21 = vld [vmem:[%s8992_s0 + $0x158] sm:$0xff]  ;;  %v63_v22 = vld [vmem:[%s8992_s0 + $0x150] sm:$0xff] }
  0x1c   :  { %306 = vadd.xlane.f32.xlu0 %v305_v23  ;;  %v410_v23 = vsel %vm277_vm0, %v65_v20, 0.0  ;;  %v407_v24 = vsel %vm277_vm0, %v64_v21, 0.0  ;;  %v404_v25 = vsel %vm277_vm0, %v63_v22, 0.0  ;;  %v84_v20 = vld [vmem:[%s8992_s0 + $0x1f8] sm:$0xff]  ;;  %v473_v22 = vsel %vm277_vm0, %v86_v16, 0.0 }
  0x23   :  { %321 = vadd.xlane.f32.xlu2 %v320_v27  ;;  %318 = vadd.xlane.f32.xlu1 %v317_v28  ;;  %v67_v27 = vld [vmem:[%s8992_s0 + $0x170] sm:$0xff] }
  0x24   :  { %315 = vadd.xlane.f32.xlu0 %v314_v29 }
  0x2b   :  { %330 = vadd.xlane.f32.xlu2 %v329_v33  ;;  %327 = vadd.xlane.f32.xlu1 %v326_v34  ;;  %v416_v33 = vsel %vm277_vm0, %v67_v27, 0.0  ;;  %v413_v34 = vsel %vm277_vm0, %v66_v30, 0.0  ;;  %v88_v30 = vld [vmem:[%s8992_s0 + $0x218] sm:$0xff] }
  0x2c   :  { %324 = vadd.xlane.f32.xlu0 %v323_v35  ;;  %v71_v35 = vld [vmem:[%s8992_s0 + $0x190] sm:$0xff] }
  0x33   :  { %339 = vadd.xlane.f32.xlu2 %v338_v39  ;;  %336 = vadd.xlane.f32.xlu1 %v335_v40  ;;  %v69_v39 = vld [vmem:[%s8992_s0 + $0x180] sm:$0xff] }
  0x34   :  { %333 = vadd.xlane.f32.xlu0 %v332_v41  ;;  %v428_v41 = vsel %vm277_vm0, %v71_v35, 0.0  ;;  %v422_v43 = vsel %vm277_vm0, %v69_v39, 0.0  ;;  %v479_v35 = vsel %vm277_vm0, %v88_v30, 0.0  ;;  %v92_v39 = vld [vmem:[%s8992_s0 + $0x238] sm:$0xff] }
  0x3b   :  { %348 = vadd.xlane.f32.xlu2 %v347_v45  ;;  %345 = vadd.xlane.f32.xlu1 %v344_v46 }
  0x3c   :  { %342 = vadd.xlane.f32.xlu0 %v341_v47  ;;  %v73_v47 = vld [vmem:[%s8992_s0 + $0x1a0] sm:$0xff] }
  0x43   :  { %357 = vadd.xlane.f32.xlu2 %v356_v51  ;;  %354 = vadd.xlane.f32.xlu1 %v353_v52  ;;  %v434_v51 = vsel %vm277_vm0, %v73_v47, 0.0  ;;  %v431_v52 = vsel %vm277_vm0, %v72_v48, 0.0  ;;  %v491_v48 = vsel %vm277_vm0, %v92_v39, 0.0  ;;  %v102_v39 = vld [vmem:[%s8992_s0 + $0x288] sm:$0xff] }
  0x44   :  { %351 = vadd.xlane.f32.xlu0 %v350_v53  ;;  %v77_v53 = vld [vmem:[%s8992_s0 + $0x1c0] sm:$0xff] }
  0x4b   :  { %366 = vadd.xlane.f32.xlu2 %v365_v57  ;;  %363 = vadd.xlane.f32.xlu1 %v362_v58  ;;  %v75_v57 = vld [vmem:[%s8992_s0 + $0x1b0] sm:$0xff] }
  0x4c   :  { %360 = vadd.xlane.f32.xlu0 %v359_v59  ;;  %v446_v59 = vsel %vm277_vm0, %v77_v53, 0.0  ;;  %v440_v61 = vsel %vm277_vm0, %v75_v57, 0.0  ;;  %v94_v57 = vld [vmem:[%s8992_s0 + $0x248] sm:$0xff] }
  0x4d   :  { %v497_v62 = vsel %vm277_vm0, %v94_v57, 0.0 }
  0x53   :  { %375 = vadd.xlane.f32.xlu2 %v374_v63  ;;  %372 = vadd.xlane.f32.xlu1 %v371_v0 }
  0x54   :  { %369 = vadd.xlane.f32.xlu0 %v368_v1  ;;  %v79_v1 = vld [vmem:[%s8992_s0 + $0x1d0] sm:$0xff] }
  0x5b   :  { %384 = vadd.xlane.f32.xlu2 %v383_v5  ;;  %381 = vadd.xlane.f32.xlu1 %v380_v6  ;;  %v452_v5 = vsel %vm277_vm0, %v79_v1, 0.0  ;;  %v449_v6 = vsel %vm277_vm0, %v78_v2, 0.0  ;;  %v98_v2 = vld [vmem:[%s8992_s0 + $0x268] sm:$0xff] }
  0x5c   :  { %378 = vadd.xlane.f32.xlu0 %v377_v7  ;;  %v83_v7 = vld [vmem:[%s8992_s0 + $0x1f0] sm:$0xff] }
  0x63   :  { %393 = vadd.xlane.f32.xlu2 %v392_v11  ;;  %390 = vadd.xlane.f32.xlu1 %v389_v12  ;;  %v81_v11 = vld [vmem:[%s8992_s0 + $0x1e0] sm:$0xff] }
  0x64   :  { %387 = vadd.xlane.f32.xlu0 %v386_v13  ;;  %v464_v13 = vsel %vm277_vm0, %v83_v7, 0.0  ;;  %v458_v15 = vsel %vm277_vm0, %v81_v11, 0.0  ;;  %v96_v7 = vld [vmem:[%s8992_s0 + $0x258] sm:$0xff]  ;;  %v509_v11 = vsel %vm277_vm0, %v98_v2, 0.0 }
  0x6b   :  { %402 = vadd.xlane.f32.xlu2 %v401_v17  ;;  %399 = vadd.xlane.f32.xlu1 %v398_v18 }
  0x6c   :  { %396 = vadd.xlane.f32.xlu0 %v395_v19  ;;  %v85_v19 = vld [vmem:[%s8992_s0 + $0x200] sm:$0xff] }
  0x73   :  { %411 = vadd.xlane.f32.xlu2 %v410_v23  ;;  %408 = vadd.xlane.f32.xlu1 %v407_v24  ;;  %v470_v23 = vsel %vm277_vm0, %v85_v19, 0.0  ;;  %v467_v24 = vsel %vm277_vm0, %v84_v20, 0.0  ;;  %v100_v20 = vld [vmem:[%s8992_s0 + $0x278] sm:$0xff] }
  0x74   :  { %405 = vadd.xlane.f32.xlu0 %v404_v25  ;;  %v89_v25 = vld [vmem:[%s8992_s0 + $0x220] sm:$0xff] }
  0x76   :  { %v5527_v28 = vpop.xlane.xlu2 %291  ;;  %v5529_v29 = vpop.xlane.xlu1 %285 }
  0x77   :  { %v5534_v31 = vpop.xlane.xlu0 %279 }
  0x7b   :  { %420 = vadd.xlane.f32.xlu2 %v419_v32  ;;  %417 = vadd.xlane.f32.xlu1 %v416_v33  ;;  %v87_v32 = vld [vmem:[%s8992_s0 + $0x210] sm:$0xff] }
  0x7c   :  { %414 = vadd.xlane.f32.xlu0 %v413_v34  ;;  %v482_v34 = vsel %vm277_vm0, %v89_v25, 0.0  ;;  %v476_v38 = vsel %vm277_vm0, %v87_v32, 0.0  ;;  %v515_v25 = vsel %vm277_vm0, %v100_v20, 0.0  ;;  %v104_v32 = vld [vmem:[%s8992_s0 + $0x298] sm:$0xff] }
  0x7e   :  { %v5542_v36 = vpop.xlane.xlu2 %294  ;;  %v5544_v37 = vpop.xlane.xlu1 %288 }
  0x7f   :  { %v5552_v40 = vpop.xlane.xlu0 %282 }
  0x83   :  { %429 = vadd.xlane.f32.xlu2 %v428_v41  ;;  %426 = vadd.xlane.f32.xlu1 %v425_v42 }
  0x84   :  { %423 = vadd.xlane.f32.xlu0 %v422_v43  ;;  %v91_v43 = vld [vmem:[%s8992_s0 + $0x230] sm:$0xff] }
  0x86   :  { %v5560_v45 = vpop.xlane.xlu2 %303  ;;  %v5562_v46 = vpop.xlane.xlu1 %300 }
  0x87   :  { %v5570_v49 = vpop.xlane.xlu0 %297 }
  0x8b   :  { %438 = vadd.xlane.f32.xlu2 %v437_v50  ;;  %435 = vadd.xlane.f32.xlu1 %v434_v51  ;;  %v488_v50 = vsel %vm277_vm0, %v91_v43, 0.0  ;;  %v485_v51 = vsel %vm277_vm0, %v90_v44, 0.0  ;;  %v527_v44 = vsel %vm277_vm0, %v104_v32, 0.0 }
  0x8c   :  { %432 = vadd.xlane.f32.xlu0 %v431_v52  ;;  %v95_v52 = vld [vmem:[%s8992_s0 + $0x250] sm:$0xff] }
  0x8e   :  { %v5578_v54 = vpop.xlane.xlu2 %312  ;;  %v5580_v55 = vpop.xlane.xlu1 %309 }
  0x8f   :  { %v5588_v58 = vpop.xlane.xlu0 %306 }
  0x93   :  { %447 = vadd.xlane.f32.xlu2 %v446_v59  ;;  %444 = vadd.xlane.f32.xlu1 %v443_v60  ;;  %v93_v59 = vld [vmem:[%s8992_s0 + $0x240] sm:$0xff] }
  0x94   :  { %441 = vadd.xlane.f32.xlu0 %v440_v61  ;;  %v500_v61 = vsel %vm277_vm0, %v95_v52, 0.0  ;;  %v494_v1 = vsel %vm277_vm0, %v93_v59, 0.0  ;;  %v106_v59 = vld [vmem:[%s8992_s0 + $0x2a8] sm:$0xff] }
  0x95   :  { %v533_v2 = vsel %vm277_vm0, %v106_v59, 0.0 }
  0x96   :  { %v5596_v63 = vpop.xlane.xlu2 %321  ;;  %v5598_v0 = vpop.xlane.xlu1 %318 }
  0x97   :  { %v5606_v3 = vpop.xlane.xlu0 %315 }
  0x9b   :  { %456 = vadd.xlane.f32.xlu2 %v455_v4  ;;  %453 = vadd.xlane.f32.xlu1 %v452_v5 }
  0x9c   :  { %450 = vadd.xlane.f32.xlu0 %v449_v6  ;;  %v97_v6 = vld [vmem:[%s8992_s0 + $0x260] sm:$0xff] }
  0x9e   :  { %v5614_v8 = vpop.xlane.xlu2 %330  ;;  %v5616_v9 = vpop.xlane.xlu1 %327 }
  0x9f   :  { %v5624_v12 = vpop.xlane.xlu0 %324 }
  0xa3   :  { %465 = vadd.xlane.f32.xlu2 %v464_v13  ;;  %462 = vadd.xlane.f32.xlu1 %v461_v14  ;;  %v506_v13 = vsel %vm277_vm0, %v97_v6, 0.0  ;;  %v503_v14 = vsel %vm277_vm0, %v96_v7, 0.0  ;;  %v110_v7 = vld [vmem:[%s8992_s0 + $0x2c8] sm:$0xff] }
  0xa4   :  { %459 = vadd.xlane.f32.xlu0 %v458_v15  ;;  %v101_v15 = vld [vmem:[%s8992_s0 + $0x280] sm:$0xff] }
  0xa6   :  { %v5632_v17 = vpop.xlane.xlu2 %339  ;;  %v5634_v18 = vpop.xlane.xlu1 %336 }
  0xa7   :  { %9005 = vst [vmem:[#allocation5_spill] sm:$0xff] %v5632_v17  ;;  %v5642_v21 = vpop.xlane.xlu0 %333 }
  0xab   :  { %474 = vadd.xlane.f32.xlu2 %v473_v22  ;;  %471 = vadd.xlane.f32.xlu1 %v470_v23  ;;  %v99_v22 = vld [vmem:[%s8992_s0 + $0x270] sm:$0xff] }
  0xac   :  { %468 = vadd.xlane.f32.xlu0 %v467_v24  ;;  %v518_v24 = vsel %vm277_vm0, %v101_v15, 0.0  ;;  %v512_v30 = vsel %vm277_vm0, %v99_v22, 0.0  ;;  %v108_v15 = vld [vmem:[%s8992_s0 + $0x2b8] sm:$0xff]  ;;  %v545_v22 = vsel %vm277_vm0, %v110_v7, 0.0 }
  0xae   :  { %v5650_v26 = vpop.xlane.xlu2 %348  ;;  %v5652_v27 = vpop.xlane.xlu1 %345 }
  0xaf   :  { %9006 = vst [vmem:[#allocation6_spill] sm:$0xff] %v5650_v26  ;;  %v5660_v33 = vpop.xlane.xlu0 %342 }
  0xb0   :  { %9007 = vst [vmem:[#allocation7_spill] sm:$0xff] %v5652_v27 }
  0xb1   :  { %9008 = vst [vmem:[#allocation8_spill] sm:$0xff] %v5660_v33 }
  0xb3   :  { %483 = vadd.xlane.f32.xlu2 %v482_v34  ;;  %480 = vadd.xlane.f32.xlu1 %v479_v35 }
  0xb4   :  { %477 = vadd.xlane.f32.xlu0 %v476_v38  ;;  %v103_v38 = vld [vmem:[%s8992_s0 + $0x290] sm:$0xff] }
  0xb6   :  { %v5668_v41 = vpop.xlane.xlu2 %357  ;;  %v5670_v42 = vpop.xlane.xlu1 %354 }
  0xb7   :  { %9009 = vst [vmem:[#allocation9_spill] sm:$0xff] %v5668_v41  ;;  %v5678_v47 = vpop.xlane.xlu0 %351 }
  0xb8   :  { %9010 = vst [vmem:[#allocation10_spill] sm:$0xff] %v5670_v42 }
  0xb9   :  { %9011 = vst [vmem:[#allocation11_spill] sm:$0xff] %v5678_v47 }
  0xbb   :  { %492 = vadd.xlane.f32.xlu2 %v491_v48  ;;  %489 = vadd.xlane.f32.xlu1 %v488_v50  ;;  %v524_v48 = vsel %vm277_vm0, %v103_v38, 0.0  ;;  %v521_v50 = vsel %vm277_vm0, %v102_v39, 0.0  ;;  %v112_v39 = vld [vmem:[%s8992_s0 + $0x2d8] sm:$0xff] }
  0xbc   :  { %486 = vadd.xlane.f32.xlu0 %v485_v51  ;;  %v107_v51 = vld [vmem:[%s8992_s0 + $0x2b0] sm:$0xff] }
  0xbe   :  { %v5686_v53 = vpop.xlane.xlu2 %366  ;;  %v5688_v56 = vpop.xlane.xlu1 %363 }
  0xbf   :  { %9012 = vst [vmem:[#allocation12_spill] sm:$0xff] %v5686_v53  ;;  %v5696_v60 = vpop.xlane.xlu0 %360 }
  0xc0   :  { %9013 = vst [vmem:[#allocation13_spill] sm:$0xff] %v5688_v56 }
  0xc1   :  { %9014 = vst [vmem:[#allocation14_spill] sm:$0xff] %v5696_v60 }
  0xc3   :  { %501 = vadd.xlane.f32.xlu2 %v500_v61  ;;  %498 = vadd.xlane.f32.xlu1 %v497_v62  ;;  %v105_v61 = vld [vmem:[%s8992_s0 + $0x2a0] sm:$0xff] }
  0xc4   :  { %495 = vadd.xlane.f32.xlu0 %v494_v1  ;;  %v536_v1 = vsel %vm277_vm0, %v107_v51, 0.0  ;;  %v530_v6 = vsel %vm277_vm0, %v105_v61, 0.0  ;;  %v551_v51 = vsel %vm277_vm0, %v112_v39, 0.0  ;;  %v116_v61 = vld [vmem:[%s8992_s0 + $0x2f8] sm:$0xff]  ;;  %v118_v39 = vld [vmem:[%s8992_s0 + $0x308] sm:$0xff] }
  0xc6   :  { %v5704_v4 = vpop.xlane.xlu2 %375  ;;  %v5706_v5 = vpop.xlane.xlu1 %372 }
  0xc7   :  { %9015 = vst [vmem:[#allocation15_spill] sm:$0xff] %v5706_v5  ;;  %v5714_v10 = vpop.xlane.xlu0 %369 }
  0xc8   :  { %9016 = vst [vmem:[#allocation16_spill] sm:$0xff] %v5714_v10  ;;  %v124_v10 = vld [vmem:[%s8992_s0 + $0x338] sm:$0xff] }
  0xcb   :  { %510 = vadd.xlane.f32.xlu2 %v509_v11  ;;  %507 = vadd.xlane.f32.xlu1 %v506_v13 }
  0xcc   :  { %504 = vadd.xlane.f32.xlu0 %v503_v14  ;;  %v109_v14 = vld [vmem:[%s8992_s0 + $0x2c0] sm:$0xff] }
  0xce   :  { %v5722_v16 = vpop.xlane.xlu2 %384  ;;  %v5724_v19 = vpop.xlane.xlu1 %381 }
  0xcf   :  { %9017 = vst [vmem:[#allocation17_spill] sm:$0xff] %v5722_v16  ;;  %v5732_v23 = vpop.xlane.xlu0 %378 }
  0xd0   :  { %9018 = vst [vmem:[#allocation18_spill] sm:$0xff] %v5724_v19 }
  0xd3   :  { %519 = vadd.xlane.f32.xlu2 %v518_v24  ;;  %516 = vadd.xlane.f32.xlu1 %v515_v25  ;;  %v542_v24 = vsel %vm277_vm0, %v109_v14, 0.0  ;;  %v539_v25 = vsel %vm277_vm0, %v108_v15, 0.0  ;;  %v563_v15 = vsel %vm277_vm0, %v116_v61, 0.0  ;;  %v569_v61 = vsel %vm277_vm0, %v118_v39, 0.0  ;;  %v120_v39 = vld [vmem:[%s8992_s0 + $0x318] sm:$0xff] }
  0xd4   :  { %513 = vadd.xlane.f32.xlu0 %v512_v30  ;;  %v113_v30 = vld [vmem:[%s8992_s0 + $0x2e0] sm:$0xff] }
  0xd6   :  { %v5740_v34 = vpop.xlane.xlu2 %393  ;;  %v5742_v35 = vpop.xlane.xlu1 %390 }
  0xd7   :  { %9019 = vst [vmem:[#allocation19_spill] sm:$0xff] %v5740_v34  ;;  %v5750_v43 = vpop.xlane.xlu0 %387 }
  0xd8   :  { %9020 = vst [vmem:[#allocation20_spill] sm:$0xff] %v5742_v35 }
  0xd9   :  { %9021 = vst [vmem:[#allocation21_spill] sm:$0xff] %v5750_v43 }
  0xdb   :  { %528 = vadd.xlane.f32.xlu2 %v527_v44  ;;  %525 = vadd.xlane.f32.xlu1 %v524_v48  ;;  %v111_v44 = vld [vmem:[%s8992_s0 + $0x2d0] sm:$0xff] }
  0xdc   :  { %522 = vadd.xlane.f32.xlu0 %v521_v50  ;;  %v554_v50 = vsel %vm277_vm0, %v113_v30, 0.0  ;;  %v548_v59 = vsel %vm277_vm0, %v111_v44, 0.0 }
  0xde   :  { %v5758_v52 = vpop.xlane.xlu2 %402  ;;  %v5760_v57 = vpop.xlane.xlu1 %399 }
  0xdf   :  { %9022 = vst [vmem:[#allocation22_spill] sm:$0xff] %v5758_v52  ;;  %v5768_v62 = vpop.xlane.xlu0 %396 }
  0xe0   :  { %9023 = vst [vmem:[#allocation23_spill] sm:$0xff] %v5760_v57 }
  0xe1   :  { %9024 = vst [vmem:[#allocation24_spill] sm:$0xff] %v5768_v62 }
  0xe3   :  { %537 = vadd.xlane.f32.xlu2 %v536_v1  ;;  %534 = vadd.xlane.f32.xlu1 %v533_v2  ;;  %v115_v2 = vld [vmem:[%s8992_s0 + $0x2f0] sm:$0xff] }
  0xe4   :  { %531 = vadd.xlane.f32.xlu0 %v530_v6  ;;  %v114_v6 = vld [vmem:[%s8992_s0 + $0x2e8] sm:$0xff] }
  0xe6   :  { %v5776_v11 = vpop.xlane.xlu2 %411  ;;  %v5778_v13 = vpop.xlane.xlu1 %408 }
  0xe7   :  { %9025 = vst [vmem:[#allocation25_spill] sm:$0xff] %v5776_v11  ;;  %v5786_v20 = vpop.xlane.xlu0 %405 }
  0xe8   :  { %9026 = vst [vmem:[#allocation26_spill] sm:$0xff] %v5778_v13 }
  0xe9   :  { %9027 = vst [vmem:[#allocation27_spill] sm:$0xff] %v5786_v20 }
  0xeb   :  { %546 = vadd.xlane.f32.xlu2 %v545_v22  ;;  %543 = vadd.xlane.f32.xlu1 %v542_v24  ;;  %v560_v22 = vsel %vm277_vm0, %v115_v2, 0.0  ;;  %v557_v24 = vsel %vm277_vm0, %v114_v6, 0.0  ;;  %v122_v6 = vld [vmem:[%s8992_s0 + $0x328] sm:$0xff] }
  0xec   :  { %540 = vadd.xlane.f32.xlu0 %v539_v25  ;;  %v119_v25 = vld [vmem:[%s8992_s0 + $0x310] sm:$0xff] }
  0xee   :  { %v5794_v32 = vpop.xlane.xlu2 %420  ;;  %v5796_v38 = vpop.xlane.xlu1 %417 }
  0xef   :  { %9028 = vst [vmem:[#allocation28_spill] sm:$0xff] %v5794_v32  ;;  %v5804_v48 = vpop.xlane.xlu0 %414 }
  0xf0   :  { %9029 = vst [vmem:[#allocation29_spill] sm:$0xff] %v5796_v38 }
  0xf1   :  { %9030 = vst [vmem:[#allocation30_spill] sm:$0xff] %v5804_v48 }
  0xf3   :  { %555 = vadd.xlane.f32.xlu2 %v554_v50  ;;  %552 = vadd.xlane.f32.xlu1 %v551_v51  ;;  %v117_v51 = vld [vmem:[%s8992_s0 + $0x300] sm:$0xff] }
  0xf4   :  { %549 = vadd.xlane.f32.xlu0 %v548_v59  ;;  %v572_v59 = vsel %vm277_vm0, %v119_v25, 0.0  ;;  %v566_v2 = vsel %vm277_vm0, %v117_v51, 0.0  ;;  %v581_v51 = vsel %vm277_vm0, %v122_v6, 0.0 }
  0xf6   :  { %v5812_v1 = vpop.xlane.xlu2 %429  ;;  %v5820_v7 = vpop.xlane.xlu1 %426 }
  0xf7   :  { %9031 = vst [vmem:[#allocation31_spill] sm:$0xff] %v5812_v1  ;;  %v5822_v14 = vpop.xlane.xlu0 %423 }
  0xf8   :  { %9032 = vst [vmem:[#allocation32_spill] sm:$0xff] %v5820_v7 }
  0xf9   :  { %9033 = vst [vmem:[#allocation33_spill] sm:$0xff] %v5822_v14 }
  0xfb   :  { %564 = vadd.xlane.f32.xlu2 %v563_v15  ;;  %561 = vadd.xlane.f32.xlu1 %v560_v22  ;;  %v121_v22 = vld [vmem:[%s8992_s0 + $0x320] sm:$0xff] }
  0xfc   :  { %558 = vadd.xlane.f32.xlu0 %v557_v24 }
  0xfe   :  { %v5830_v30 = vpop.xlane.xlu2 %438  ;;  %v5835_v44 = vpop.xlane.xlu1 %435 }
  0xff   :  { %9034 = vst [vmem:[#allocation34_spill] sm:$0xff] %v5830_v30  ;;  %v5837_v50 = vpop.xlane.xlu0 %432 }
 0x100   :  { %9035 = vst [vmem:[#allocation35_spill] sm:$0xff] %v5835_v44  ;;  %v250_v44 = vld [vmem:[%s8992_s0 + $0x728] sm:$0xff] }
 0x101   :  { %9036 = vst [vmem:[#allocation36_spill] sm:$0xff] %v5837_v50 }
 0x103   :  { %573 = vadd.xlane.f32.xlu2 %v572_v59  ;;  %570 = vadd.xlane.f32.xlu1 %v569_v61  ;;  %v578_v59 = vsel %vm277_vm0, %v121_v22, 0.0  ;;  %v575_v61 = vsel %vm277_vm0, %v120_v39, 0.0  ;;  %v123_v22 = vld [vmem:[%s8992_s0 + $0x330] sm:$0xff] }
 0x104   :  { %567 = vadd.xlane.f32.xlu0 %v566_v2  ;;  %v125_v2 = vld [vmem:[%s8992_s0 + $0x340] sm:$0xff] }
 0x105   :  { %v590_v39 = vsel %vm277_vm0, %v125_v2, 0.0 }
 0x106   :  { %v5848_v15 = vpop.xlane.xlu2 %447  ;;  %v5853_v24 = vpop.xlane.xlu1 %444 }
 0x107   :  { %9037 = vst [vmem:[#allocation37_spill] sm:$0xff] %v5848_v15  ;;  %v5855_v25 = vpop.xlane.xlu0 %441 }
 0x108   :  { %9038 = vst [vmem:[#allocation38_spill] sm:$0xff] %v5853_v24  ;;  %v136_v24 = vld [vmem:[%s8992_s0 + $0x398] sm:$0xff] }
 0x109   :  { %9039 = vst [vmem:[#allocation39_spill] sm:$0xff] %v5855_v25 }
 0x10b   :  { %582 = vadd.xlane.f32.xlu2 %v581_v51  ;;  %579 = vadd.xlane.f32.xlu1 %v578_v59  ;;  %v587_v51 = vsel %vm277_vm0, %v124_v10, 0.0  ;;  %v584_v59 = vsel %vm277_vm0, %v123_v22, 0.0  ;;  %v126_v10 = vld [vmem:[%s8992_s0 + $0x348] sm:$0xff] }
 0x10c   :  { %576 = vadd.xlane.f32.xlu0 %v575_v61  ;;  %v128_v61 = vld [vmem:[%s8992_s0 + $0x358] sm:$0xff] }
 0x10d   :  { %v599_v22 = vsel %vm277_vm0, %v128_v61, 0.0 }
 0x10e   :  { %v5866_v5 = vpop.xlane.xlu2 %456  ;;  %v5871_v60 = vpop.xlane.xlu1 %453 }
 0x10f   :  { %9040 = vst [vmem:[#allocation40_spill] sm:$0xff] %v5866_v5  ;;  %v5873_v6 = vpop.xlane.xlu0 %450 }
 0x110   :  { %9041 = vst [vmem:[#allocation41_spill] sm:$0xff] %v5871_v60  ;;  %v127_v60 = vld [vmem:[%s8992_s0 + $0x350] sm:$0xff] }
 0x111   :  { %9042 = vst [vmem:[#allocation42_spill] sm:$0xff] %v5873_v6 }
 0x113   :  { %591 = vadd.xlane.f32.xlu2 %v590_v39  ;;  %588 = vadd.xlane.f32.xlu1 %v587_v51  ;;  %v596_v39 = vsel %vm277_vm0, %v127_v60, 0.0  ;;  %v593_v51 = vsel %vm277_vm0, %v126_v10, 0.0  ;;  %v129_v60 = vld [vmem:[%s8992_s0 + $0x360] sm:$0xff] }
 0x114   :  { %585 = vadd.xlane.f32.xlu0 %v584_v59  ;;  %v131_v59 = vld [vmem:[%s8992_s0 + $0x370] sm:$0xff] }
 0x115   :  { %v608_v10 = vsel %vm277_vm0, %v131_v59, 0.0 }
 0x116   :  { %v5884_v5 = vpop.xlane.xlu2 %465  ;;  %v5889_v41 = vpop.xlane.xlu1 %462 }
 0x117   :  { %9043 = vst [vmem:[#allocation43_spill] sm:$0xff] %v5884_v5  ;;  %v5891_v2 = vpop.xlane.xlu0 %459 }
 0x118   :  { %9044 = vst [vmem:[#allocation44_spill] sm:$0xff] %v5889_v41  ;;  %v130_v41 = vld [vmem:[%s8992_s0 + $0x368] sm:$0xff] }
 0x119   :  { %9045 = vst [vmem:[#allocation45_spill] sm:$0xff] %v5891_v2 }
 0x11b   :  { %600 = vadd.xlane.f32.xlu2 %v599_v22  ;;  %597 = vadd.xlane.f32.xlu1 %v596_v39  ;;  %v605_v22 = vsel %vm277_vm0, %v130_v41, 0.0  ;;  %v602_v39 = vsel %vm277_vm0, %v129_v60, 0.0  ;;  %v132_v41 = vld [vmem:[%s8992_s0 + $0x378] sm:$0xff] }
 0x11c   :  { %594 = vadd.xlane.f32.xlu0 %v593_v51  ;;  %v134_v51 = vld [vmem:[%s8992_s0 + $0x388] sm:$0xff] }
 0x11d   :  { %v617_v60 = vsel %vm277_vm0, %v134_v51, 0.0 }
 0x11e   :  { %v5902_v5 = vpop.xlane.xlu2 %474  ;;  %v5907_v2 = vpop.xlane.xlu1 %471 }
 0x11f   :  { %9046 = vst [vmem:[#allocation46_spill] sm:$0xff] %v5902_v5  ;;  %v5909_v61 = vpop.xlane.xlu0 %468 }
 0x120   :  { %9047 = vst [vmem:[#allocation47_spill] sm:$0xff] %v5907_v2 }
 0x121   :  { %9048 = vst [vmem:[#allocation48_spill] sm:$0xff] %v5909_v61  ;;  %v133_v61 = vld [vmem:[%s8992_s0 + $0x380] sm:$0xff] }
 0x123   :  { %609 = vadd.xlane.f32.xlu2 %v608_v10  ;;  %606 = vadd.xlane.f32.xlu1 %v605_v22  ;;  %v614_v10 = vsel %vm277_vm0, %v133_v61, 0.0  ;;  %v611_v22 = vsel %vm277_vm0, %v132_v41, 0.0  ;;  %v135_v61 = vld [vmem:[%s8992_s0 + $0x390] sm:$0xff] }
 0x124   :  { %603 = vadd.xlane.f32.xlu0 %v602_v39  ;;  %v137_v39 = vld [vmem:[%s8992_s0 + $0x3a0] sm:$0xff] }
 0x125   :  { %v626_v41 = vsel %vm277_vm0, %v137_v39, 0.0 }
 0x126   :  { %v5920_v6 = vpop.xlane.xlu2 %483  ;;  %v5925_v15 = vpop.xlane.xlu1 %480 }
 0x127   :  { %9049 = vst [vmem:[#allocation49_spill] sm:$0xff] %v5920_v6  ;;  %v5927_v59 = vpop.xlane.xlu0 %477 }
 0x128   :  { %9050 = vst [vmem:[#allocation50_spill] sm:$0xff] %v5925_v15  ;;  %v263_v15 = vld [vmem:[%s8992_s0 + $0x790] sm:$0xff] }
 0x129   :  { %9051 = vst [vmem:[#allocation51_spill] sm:$0xff] %v5927_v59 }
 0x12b   :  { %618 = vadd.xlane.f32.xlu2 %v617_v60  ;;  %615 = vadd.xlane.f32.xlu1 %v614_v10  ;;  %v623_v60 = vsel %vm277_vm0, %v136_v24, 0.0  ;;  %v620_v10 = vsel %vm277_vm0, %v135_v61, 0.0  ;;  %v181_v24 = vld [vmem:[%s8992_s0 + $0x500] sm:$0xff] }
 0x12c   :  { %612 = vadd.xlane.f32.xlu0 %v611_v22  ;;  %v183_v22 = vld [vmem:[%s8992_s0 + $0x510] sm:$0xff] }
 0x12d   :  { %v764_v61 = vsel %vm277_vm0, %v183_v22, 0.0 }
 0x12e   :  { %v5938_v6 = vpop.xlane.xlu2 %492  ;;  %v5943_v25 = vpop.xlane.xlu1 %489 }
 0x12f   :  { %9052 = vst [vmem:[#allocation52_spill] sm:$0xff] %v5938_v6  ;;  %v5945_v51 = vpop.xlane.xlu0 %486 }
 0x130   :  { %9053 = vst [vmem:[#allocation53_spill] sm:$0xff] %v5943_v25  ;;  %v182_v25 = vld [vmem:[%s8992_s0 + $0x508] sm:$0xff] }
 0x131   :  { %9054 = vst [vmem:[#allocation54_spill] sm:$0xff] %v5945_v51 }
 0x133   :  { %627 = vadd.xlane.f32.xlu2 %v626_v41  ;;  %624 = vadd.xlane.f32.xlu1 %v623_v60  ;;  %v761_v41 = vsel %vm277_vm0, %v182_v25, 0.0  ;;  %v758_v60 = vsel %vm277_vm0, %v181_v24, 0.0  ;;  %v184_v25 = vld [vmem:[%s8992_s0 + $0x518] sm:$0xff] }
 0x134   :  { %621 = vadd.xlane.f32.xlu0 %v620_v10  ;;  %v246_v10 = vld [vmem:[%s8992_s0 + $0x708] sm:$0xff] }
 0x135   :  { %v953_v24 = vsel %vm277_vm0, %v246_v10, 0.0 }
 0x136   :  { %v5956_v6 = vpop.xlane.xlu2 %501  ;;  %v5961_v51 = vpop.xlane.xlu1 %498 }
 0x137   :  { %9055 = vst [vmem:[#allocation55_spill] sm:$0xff] %v5956_v6  ;;  %v5963_v39 = vpop.xlane.xlu0 %495 }
 0x138   :  { %9056 = vst [vmem:[#allocation56_spill] sm:$0xff] %v5961_v51  ;;  %v245_v51 = vld [vmem:[%s8992_s0 + $0x700] sm:$0xff] }
 0x139   :  { %9057 = vst [vmem:[#allocation57_spill] sm:$0xff] %v5963_v39 }
 0x13b   :  { %765 = vadd.xlane.f32.xlu2 %v764_v61  ;;  %762 = vadd.xlane.f32.xlu1 %v761_v41  ;;  %v950_v61 = vsel %vm277_vm0, %v245_v51, 0.0  ;;  %v767_v41 = vsel %vm277_vm0, %v184_v25, 0.0  ;;  %v149_v51 = vld [vmem:[%s8992_s0 + $0x400] sm:$0xff] }
 0x13c   :  { %759 = vadd.xlane.f32.xlu0 %v758_v60  ;;  %v197_v60 = vld [vmem:[%s8992_s0 + $0x580] sm:$0xff] }
 0x13d   :  { %v806_v25 = vsel %vm277_vm0, %v197_v60, 0.0 }
 0x13e   :  { %v5974_v6 = vpop.xlane.xlu2 %510  ;;  %v5979_v39 = vpop.xlane.xlu1 %507 }
 0x13f   :  { %9058 = vst [vmem:[#allocation58_spill] sm:$0xff] %v5974_v6  ;;  %v5981_v22 = vpop.xlane.xlu0 %504 }
 0x140   :  { %9059 = vst [vmem:[#allocation59_spill] sm:$0xff] %v5979_v39  ;;  %v150_v39 = vld [vmem:[%s8992_s0 + $0x408] sm:$0xff] }
 0x141   :  { %9060 = vst [vmem:[#allocation60_spill] sm:$0xff] %v5981_v22 }
 0x143   :  { %954 = vadd.xlane.f32.xlu2 %v953_v24  ;;  %951 = vadd.xlane.f32.xlu1 %v950_v61  ;;  %v665_v24 = vsel %vm277_vm0, %v150_v39, 0.0  ;;  %v662_v61 = vsel %vm277_vm0, %v149_v51, 0.0  ;;  %v198_v39 = vld [vmem:[%s8992_s0 + $0x588] sm:$0xff] }
 0x144   :  { %768 = vadd.xlane.f32.xlu0 %v767_v41  ;;  %v248_v41 = vld [vmem:[%s8992_s0 + $0x718] sm:$0xff] }
 0x145   :  { %v959_v51 = vsel %vm277_vm0, %v248_v41, 0.0 }
 0x146   :  { %v5992_v6 = vpop.xlane.xlu2 %519  ;;  %v5997_v22 = vpop.xlane.xlu1 %516 }
 0x147   :  { %9061 = vst [vmem:[#allocation61_spill] sm:$0xff] %v5992_v6  ;;  %v5999_v10 = vpop.xlane.xlu0 %513 }
 0x148   :  { %9062 = vst [vmem:[#allocation62_spill] sm:$0xff] %v5997_v22 }
 0x149   :  { %9063 = vst [vmem:[#allocation63_spill] sm:$0xff] %v5999_v10  ;;  %v247_v10 = vld [vmem:[%s8992_s0 + $0x710] sm:$0xff] }
 0x14b   :  { %807 = vadd.xlane.f32.xlu2 %v806_v25  ;;  %666 = vadd.xlane.f32.xlu1 %v665_v24  ;;  %v956_v25 = vsel %vm277_vm0, %v247_v10, 0.0  ;;  %v809_v24 = vsel %vm277_vm0, %v198_v39, 0.0  ;;  %v151_v10 = vld [vmem:[%s8992_s0 + $0x410] sm:$0xff] }
 0x14c   :  { %663 = vadd.xlane.f32.xlu0 %v662_v61  ;;  %v185_v61 = vld [vmem:[%s8992_s0 + $0x520] sm:$0xff] }
 0x14d   :  { %v770_v39 = vsel %vm277_vm0, %v185_v61, 0.0 }
 0x14e   :  { %v6010_v22 = vpop.xlane.xlu2 %528  ;;  %v6015_v6 = vpop.xlane.xlu1 %525 }
 0x14f   :  { %9064 = vst [vmem:[#allocation64_spill] sm:$0xff] %v6010_v22  ;;  %v6017_v60 = vpop.xlane.xlu0 %522 }
 0x150   :  { %9065 = vst [vmem:[#allocation65_spill] sm:$0xff] %v6015_v6  ;;  %v152_v6 = vld [vmem:[%s8992_s0 + $0x418] sm:$0xff] }
 0x151   :  { %9066 = vst [vmem:[#allocation66_spill] sm:$0xff] %v6017_v60 }
 0x153   :  { %960 = vadd.xlane.f32.xlu2 %v959_v51  ;;  %957 = vadd.xlane.f32.xlu1 %v956_v25  ;;  %v671_v51 = vsel %vm277_vm0, %v152_v6, 0.0  ;;  %v668_v25 = vsel %vm277_vm0, %v151_v10, 0.0  ;;  %v186_v6 = vld [vmem:[%s8992_s0 + $0x528] sm:$0xff] }
 0x154   :  { %810 = vadd.xlane.f32.xlu0 %v809_v24  ;;  %v200_v24 = vld [vmem:[%s8992_s0 + $0x598] sm:$0xff] }
 0x155   :  { %v815_v10 = vsel %vm277_vm0, %v200_v24, 0.0 }
 0x156   :  { %v6028_v22 = vpop.xlane.xlu2 %537  ;;  %v6033_v60 = vpop.xlane.xlu1 %534 }
 0x157   :  { %9067 = vst [vmem:[#allocation67_spill] sm:$0xff] %v6028_v22  ;;  %v6035_v41 = vpop.xlane.xlu0 %531 }
 0x158   :  { %9068 = vst [vmem:[#allocation68_spill] sm:$0xff] %v6033_v60  ;;  %v199_v60 = vld [vmem:[%s8992_s0 + $0x590] sm:$0xff] }
 0x159   :  { %9069 = vst [vmem:[#allocation69_spill] sm:$0xff] %v6035_v41 }
 0x15b   :  { %771 = vadd.xlane.f32.xlu2 %v770_v39  ;;  %672 = vadd.xlane.f32.xlu1 %v671_v51  ;;  %v812_v39 = vsel %vm277_vm0, %v199_v60, 0.0  ;;  %v773_v51 = vsel %vm277_vm0, %v186_v6, 0.0  ;;  %v213_v60 = vld [vmem:[%s8992_s0 + $0x600] sm:$0xff] }
 0x15c   :  { %669 = vadd.xlane.f32.xlu0 %v668_v25  ;;  %v261_v25 = vld [vmem:[%s8992_s0 + $0x780] sm:$0xff] }
 0x15d   :  { %v998_v6 = vsel %vm277_vm0, %v261_v25, 0.0 }
 0x15e   :  { %v6046_v22 = vpop.xlane.xlu2 %546  ;;  %v6051_v41 = vpop.xlane.xlu1 %543 }
 0x15f   :  { %9070 = vst [vmem:[#allocation70_spill] sm:$0xff] %v6046_v22  ;;  %v6053_v61 = vpop.xlane.xlu0 %540 }
 0x160   :  { %9071 = vst [vmem:[#allocation71_spill] sm:$0xff] %v6051_v41  ;;  %v214_v41 = vld [vmem:[%s8992_s0 + $0x608] sm:$0xff] }
 0x161   :  { %9072 = vst [vmem:[#allocation72_spill] sm:$0xff] %v6053_v61 }
 0x163   :  { %816 = vadd.xlane.f32.xlu2 %v815_v10  ;;  %813 = vadd.xlane.f32.xlu1 %v812_v39  ;;  %v857_v10 = vsel %vm277_vm0, %v214_v41, 0.0  ;;  %v854_v39 = vsel %vm277_vm0, %v213_v60, 0.0  ;;  %v262_v41 = vld [vmem:[%s8992_s0 + $0x788] sm:$0xff] }
 0x164   :  { %774 = vadd.xlane.f32.xlu0 %v773_v51  ;;  %v165_v51 = vld [vmem:[%s8992_s0 + $0x480] sm:$0xff] }
 0x165   :  { %v710_v60 = vsel %vm277_vm0, %v165_v51, 0.0  ;;  %v166_v51 = vld [vmem:[%s8992_s0 + $0x488] sm:$0xff] }
 0x166   :  { %v6064_v22 = vpop.xlane.xlu2 %555  ;;  %v6069_v61 = vpop.xlane.xlu1 %552 }
 0x167   :  { %9073 = vst [vmem:[#allocation73_spill] sm:$0xff] %v6064_v22  ;;  %v6071_v24 = vpop.xlane.xlu0 %549 }
 0x168   :  { %9074 = vst [vmem:[#allocation74_spill] sm:$0xff] %v6069_v61  ;;  %v138_v61 = vld [vmem:[%s8992_s0 + $0x3a8] sm:$0xff] }
 0x169   :  { %9075 = vst [vmem:[#allocation75_spill] sm:$0xff] %v6071_v24 }
 0x16b   :  { %999 = vadd.xlane.f32.xlu2 %v998_v6  ;;  %858 = vadd.xlane.f32.xlu1 %v857_v10  ;;  %v629_v6 = vsel %vm277_vm0, %v138_v61, 0.0  ;;  %v1001_v10 = vsel %vm277_vm0, %v262_v41, 0.0 }
 0x16c   :  { %855 = vadd.xlane.f32.xlu0 %v854_v39  ;;  %v216_v39 = vld [vmem:[%s8992_s0 + $0x618] sm:$0xff] }
 0x16d   :  { %v863_v41 = vsel %vm277_vm0, %v216_v39, 0.0 }
 0x16e   :  { %v6082_v22 = vpop.xlane.xlu2 %564  ;;  %v6087_v24 = vpop.xlane.xlu1 %561 }
 0x16f   :  { %9076 = vst [vmem:[#allocation76_spill] sm:$0xff] %v6082_v22  ;;  %v6089_v25 = vpop.xlane.xlu0 %558 }
 0x170   :  { %9077 = vst [vmem:[#allocation77_spill] sm:$0xff] %v6087_v24  ;;  %v215_v24 = vld [vmem:[%s8992_s0 + $0x610] sm:$0xff] }
 0x171   :  { %9078 = vst [vmem:[#allocation78_spill] sm:$0xff] %v6089_v25 }
 0x173   :  { %711 = vadd.xlane.f32.xlu2 %v710_v60  ;;  %630 = vadd.xlane.f32.xlu1 %v629_v6  ;;  %v860_v60 = vsel %vm277_vm0, %v215_v24, 0.0  ;;  %v713_v6 = vsel %vm277_vm0, %v166_v51, 0.0  ;;  %v249_v24 = vld [vmem:[%s8992_s0 + $0x720] sm:$0xff] }
 0x174   :  { %1002 = vadd.xlane.f32.xlu0 %v1001_v10  ;;  %v1764_v10 = vlaneseq }
 0x176   :  { %v574_v22 = vpop.xlane.xlu2 %573  ;;  %v571_v25 = vpop.xlane.xlu1 %570  ;;  %v6118_v39 = vand.u32 127, %v1764_v10 }
 0x177   :  { %v568_v61 = vpop.xlane.xlu0 %567 }
 0x178   :  { %v1094_v59 = vpack.c.bf16 %v571_v25, %v568_v61  ;;  %v962_v61 = vsel %vm277_vm0, %v249_v24, 0.0  ;;  %v6124_v56 = vadd.s32 4294967288, %v6118_v39  ;;  %v6127_v50 = vadd.s32 4294967280, %v6118_v39 }
 0x179   :  { %v6150_v48 = vadd.s32 4294967264, %v6118_v39  ;;  %v6176_v13 = vadd.s32 4294967240, %v6118_v39  ;;  %v6180_v42 = vadd.s32 4294967232, %v6118_v39  ;;  %v6239_v34 = vadd.s32 4294967176, %v6118_v39 }
 0x17a   :  { %v1604_v2 = vunpack.c.l.b16 %v1094_v59  ;;  %v1605_v25 = vunpack.c.h.b16 %v1094_v59 }
 0x17b   :  { %864 = vadd.xlane.f32.xlu2 %v863_v41  ;;  %861 = vadd.xlane.f32.xlu1 %v860_v60  ;;  %v1004_v41 = vsel %vm277_vm0, %v263_v15, 0.0  ;;  %v154_v15 = vld [vmem:[%s8992_s0 + $0x428] sm:$0xff]  ;;  %9081 = vst [vmem:[#allocation81_spill] sm:$0xff] %v6239_v34 }
 0x17c   :  { %714 = vadd.xlane.f32.xlu0 %v713_v6  ;;  %v965_v6 = vsel %vm277_vm0, %v250_v44, 0.0  ;;  %v1982_v44 = vperm.slane %v1604_v2, %v6118_v39  ;;  %v1983_v59 = vperm.slane %v1605_v25, %v6124_v56  ;;  %v677_v2 = vsel %vm277_vm0, %v154_v15, 0.0 }
 0x17e   :  { %v583_v30 = vpop.xlane.xlu2 %582  ;;  %v580_v5 = vpop.xlane.xlu1 %579  ;;  %v1984_v7 = vsel %vm1769_vm1, %v1983_v59, %v1982_v44  ;;  %v187_v44 = vld [vmem:[%s8992_s0 + $0x530] sm:$0xff]  ;;  %v6158_v59 = vadd.s32 4294967256, %v6118_v39 }
 0x17f   :  { %v577_v51 = vpop.xlane.xlu0 %576  ;;  %v1096_v10 = vpack.c.bf16 %v583_v30, %v580_v5  ;;  %v264_v5 = vld [vmem:[%s8992_s0 + $0x798] sm:$0xff]  ;;  %v6142_v30 = vadd.s32 4294967272, %v6118_v39 }
 0x180   :  { %v1095_v60 = vpack.c.bf16 %v577_v51, %v574_v22  ;;  %v153_v51 = vld [vmem:[%s8992_s0 + $0x420] sm:$0xff]  ;;  %v1007_v14 = vsel %vm277_vm0, %v264_v5, 0.0 }
 0x181   :  { %v674_v1 = vsel %vm277_vm0, %v153_v51, 0.0  ;;  %v1609_v32 = vunpack.c.h.b16 %v1096_v10 }
 0x182   :  { %v1606_v53 = vunpack.c.l.b16 %v1095_v60  ;;  %v1607_v22 = vunpack.c.h.b16 %v1095_v60  ;;  %v1608_v60 = vunpack.c.l.b16 %v1096_v10 }
 0x183   :  { %1005 = vadd.xlane.f32.xlu2 %v1004_v41  ;;  %966 = vadd.xlane.f32.xlu1 %v965_v6 }
 0x184   :  { %963 = vadd.xlane.f32.xlu0 %v962_v61  ;;  %v1985_v41 = vperm.slane %v1606_v53, %v6127_v50  ;;  %v1987_v53 = vperm.slane %v1607_v22, %v6142_v30  ;;  %v1989_v15 = vperm.slane %v1608_v60, %v6150_v48 }
 0x186   :  { %v592_v24 = vpop.xlane.xlu2 %591  ;;  %v589_v6 = vpop.xlane.xlu1 %588  ;;  %v1986_v11 = vsel %vm1773_vm2, %v1985_v41, %v1984_v7  ;;  %v168_v7 = vld [vmem:[%s8992_s0 + $0x498] sm:$0xff]  ;;  %v1991_v41 = vperm.slane %v1609_v32, %v6158_v59 }
 0x187   :  { %v586_v61 = vpop.xlane.xlu0 %585  ;;  %v1988_v22 = vsel %vm9004_vm3, %v1987_v53, %v1986_v11  ;;  %v776_v11 = vsel %vm277_vm0, %v187_v44, 0.0  ;;  %v719_v38 = vsel %vm277_vm0, %v168_v7, 0.0  ;;  %v202_v7 = vld [vmem:[%s8992_s0 + $0x5a8] sm:$0xff] }
 0x188   :  { %v1097_v25 = vpack.c.bf16 %v589_v6, %v586_v61 }
 0x18a   :  { %v1610_v6 = vunpack.c.l.b16 %v1097_v25  ;;  %v1611_v5 = vunpack.c.h.b16 %v1097_v25 }
 0x18b   :  { %678 = vadd.xlane.f32.xlu2 %v677_v2  ;;  %675 = vadd.xlane.f32.xlu1 %v674_v1  ;;  %v6165_v1 = vadd.s32 4294967248, %v6118_v39  ;;  %v1990_v2 = vsel %vm1781_vm4, %v1989_v15, %v1988_v22 }
 0x18c   :  { %1008 = vadd.xlane.f32.xlu0 %v1007_v14  ;;  %v167_v14 = vld [vmem:[%s8992_s0 + $0x490] sm:$0xff]  ;;  %v1992_v15 = vsel %vm1785_vm5, %v1991_v41, %v1990_v2  ;;  %v821_v2 = vsel %vm277_vm0, %v202_v7, 0.0  ;;  %v6213_v7 = vadd.s32 4294967200, %v6118_v39 }
 0x18d   :  { %v1993_v60 = vperm.slane %v1610_v6, %v6165_v1  ;;  %v716_v20 = vsel %vm277_vm0, %v167_v14, 0.0  ;;  %v1995_v6 = vperm.slane %v1611_v5, %v6176_v13  ;;  %v201_v14 = vld [vmem:[%s8992_s0 + $0x5a0] sm:$0xff]  ;;  %v188_v5 = vld [vmem:[%s8992_s0 + $0x538] sm:$0xff] }
 0x18e   :  { %v601_v51 = vpop.xlane.xlu2 %600  ;;  %v598_v10 = vpop.xlane.xlu1 %597  ;;  %v779_v52 = vsel %vm277_vm0, %v188_v5, 0.0 }
 0x18f   :  { %v595_v61 = vpop.xlane.xlu0 %594  ;;  %v1099_v32 = vpack.c.bf16 %v601_v51, %v598_v10  ;;  %v1994_v44 = vsel %vm1789_vm6, %v1993_v60, %v1992_v15  ;;  %v6190_v51 = vadd.s32 4294967224, %v6118_v39  ;;  %v6202_v60 = vadd.s32 4294967216, %v6118_v39 }
 0x190   :  { %v1098_v53 = vpack.c.bf16 %v595_v61, %v592_v24  ;;  %v818_v15 = vsel %vm277_vm0, %v201_v14, 0.0 }
 0x191   :  { %v1614_v41 = vunpack.c.l.b16 %v1099_v32  ;;  %v1615_v47 = vunpack.c.h.b16 %v1099_v32  ;;  %v139_v32 = vld [vmem:[%s8992_s0 + $0x3b0] sm:$0xff] }
 0x192   :  { %v1612_v25 = vunpack.c.l.b16 %v1098_v53  ;;  %v1613_v24 = vunpack.c.h.b16 %v1098_v53 }
 0x193   :  { %777 = vadd.xlane.f32.xlu2 %v776_v11  ;;  %720 = vadd.xlane.f32.xlu1 %v719_v38  ;;  %v2001_v57 = vperm.slane %v1614_v41, %v6202_v60 }
 0x194   :  { %v1997_v22 = vperm.slane %v1612_v25, %v6180_v42  ;;  %717 = vadd.xlane.f32.xlu0 %v716_v20  ;;  %v1996_v20 = vsel %vm1793_vm7, %v1995_v6, %v1994_v44  ;;  %v1999_v61 = vperm.slane %v1613_v24, %v6190_v51  ;;  %v6209_v24 = vadd.s32 4294967208, %v6118_v39 }
 0x196   :  { %v610_v10 = vpop.xlane.xlu2 %609  ;;  %v607_v38 = vpop.xlane.xlu1 %606  ;;  %v1998_v53 = vsel %vm1797_vm8, %v1997_v22, %v1996_v20  ;;  %v2003_v22 = vperm.slane %v1615_v47, %v6209_v24 }
 0x197   :  { %v604_v11 = vpop.xlane.xlu0 %603  ;;  %v2000_v44 = vsel %vm1801_vm9, %v1999_v61, %v1998_v53  ;;  %v632_v53 = vsel %vm277_vm0, %v139_v32, 0.0 }
 0x198   :  { %v1100_v25 = vpack.c.bf16 %v607_v38, %v604_v11  ;;  %v230_v38 = vld [vmem:[%s8992_s0 + $0x688] sm:$0xff]  ;;  %v2002_v5 = vsel %vm1805_vm10, %v2001_v57, %v2000_v44  ;;  %v6228_v11 = vadd.s32 4294967192, %v6118_v39  ;;  %v6233_v57 = vadd.s32 4294967184, %v6118_v39 }
 0x19a   :  { %v1616_v6 = vunpack.c.l.b16 %v1100_v25  ;;  %v1617_v14 = vunpack.c.h.b16 %v1100_v25  ;;  %9079 = vst [vmem:[#allocation79_spill] sm:$0xff] %v6228_v11 }
 0x19b   :  { %822 = vadd.xlane.f32.xlu2 %v821_v2  ;;  %819 = vadd.xlane.f32.xlu1 %v818_v15  ;;  %v905_v15 = vsel %vm277_vm0, %v230_v38, 0.0  ;;  %9080 = vst [vmem:[#allocation80_spill] sm:$0xff] %v6233_v57 }
 0x19c   :  { %780 = vadd.xlane.f32.xlu0 %v779_v52  ;;  %v2005_v20 = vperm.slane %v1616_v6, %v6213_v7  ;;  %v229_v52 = vld [vmem:[%s8992_s0 + $0x680] sm:$0xff]  ;;  %v2004_v6 = vsel %vm1809_vm11, %v2003_v22, %v2002_v5  ;;  %v2007_v44 = vperm.slane %v1617_v14, %v6228_v11  ;;  %v218_v14 = vld [vmem:[%s8992_s0 + $0x628] sm:$0xff] }
 0x19d   :  { %v902_v62 = vsel %vm277_vm0, %v229_v52, 0.0  ;;  %v217_v52 = vld [vmem:[%s8992_s0 + $0x620] sm:$0xff] }
 0x19e   :  { %v619_v41 = vpop.xlane.xlu2 %618  ;;  %v616_v61 = vpop.xlane.xlu1 %615 }
 0x19f   :  { %v1102_v2 = vpack.c.bf16 %v619_v41, %v616_v61  ;;  %v613_v47 = vpop.xlane.xlu0 %612  ;;  %v2006_v41 = vsel %vm1813_vm12, %v2005_v20, %v2004_v6 }
 0x1a0   :  { %v1101_v25 = vpack.c.bf16 %v613_v47, %v610_v10  ;;  %v2008_v5 = vsel %vm1817_vm13, %v2007_v44, %v2006_v41  ;;  %v869_v41 = vsel %vm277_vm0, %v218_v14, 0.0 }
 0x1a1   :  { %v1620_v10 = vunpack.c.l.b16 %v1102_v2  ;;  %v1621_v47 = vunpack.c.h.b16 %v1102_v2 }
 0x1a2   :  { %v1618_v32 = vunpack.c.l.b16 %v1101_v25  ;;  %v1619_v61 = vunpack.c.h.b16 %v1101_v25 }
 0x1a3   :  { %633 = vadd.xlane.f32.xlu2 %v632_v53  ;;  %906 = vadd.xlane.f32.xlu1 %v905_v15  ;;  %v2013_v25 = vperm.slane %v1620_v10, %v6118_v39  ;;  %v2014_v15 = vperm.slane %v1621_v47, %v6124_v56 }
 0x1a4   :  { %v2009_v38 = vperm.slane %v1618_v32, %v6233_v57  ;;  %v2011_v22 = vperm.slane %v1619_v61, %v6239_v34  ;;  %903 = vadd.xlane.f32.xlu0 %v902_v62  ;;  %v140_v62 = vld [vmem:[%s8992_s0 + $0x3b8] sm:$0xff]  ;;  %v866_v61 = vsel %vm277_vm0, %v217_v52, 0.0 }
 0x1a5   :  { %v2015_v26 = vsel %vm1769_vm1, %v2014_v15, %v2013_v25  ;;  %v232_v52 = vld [vmem:[%s8992_s0 + $0x698] sm:$0xff] }
 0x1a6   :  { %v6248_v20 = vpop.xlane.xlu2 %627  ;;  %v2010_v2 = vsel %vm1821_vm14, %v2009_v38, %v2008_v5  ;;  %v625_v53 = vpop.xlane.xlu1 %624  ;;  %v635_v38 = vsel %vm277_vm0, %v140_v62, 0.0  ;;  %v231_v62 = vld [vmem:[%s8992_s0 + $0x690] sm:$0xff] }
 0x1a7   :  { %v6260_v6 = vsel %vm1825_vm15, %v2011_v22, %v2010_v2  ;;  %v622_v44 = vpop.xlane.xlu0 %621  ;;  %v251_v22 = vld [vmem:[%s8992_s0 + $0x730] sm:$0xff] }
 0x1a8   :  { %9082 = vst [vmem:[#allocation82_spill] sm:$0xff] %v6260_v6  ;;  %v1103_v32 = vpack.c.bf16 %v625_v53, %v622_v44  ;;  %v968_v15 = vsel %vm277_vm0, %v251_v22, 0.0  ;;  %v252_v22 = vld [vmem:[%s8992_s0 + $0x738] sm:$0xff] }
 0x1aa   :  { %v1622_v5 = vunpack.c.l.b16 %v1103_v32  ;;  %v1623_v34 = vunpack.c.h.b16 %v1103_v32  ;;  %v908_v32 = vsel %vm277_vm0, %v231_v62, 0.0 }
 0x1ab   :  { %870 = vadd.xlane.f32.xlu2 %v869_v41  ;;  %867 = vadd.xlane.f32.xlu1 %v866_v61  ;;  %v911_v41 = vsel %vm277_vm0, %v232_v52, 0.0 }
 0x1ac   :  { %v2016_v10 = vperm.slane %v1622_v5, %v6127_v50  ;;  %v2018_v47 = vperm.slane %v1623_v34, %v6142_v30  ;;  %636 = vadd.xlane.f32.xlu0 %v635_v38 }
 0x1ae   :  { %v766_v14 = vpop.xlane.xlu2 %765  ;;  %v2017_v2 = vsel %vm1773_vm2, %v2016_v10, %v2015_v26  ;;  %v763_v53 = vpop.xlane.xlu1 %762  ;;  %v266_v26 = vld [vmem:[%s8992_s0 + $0x7a8] sm:$0xff]  ;;  %v265_v10 = vld [vmem:[%s8992_s0 + $0x7a0] sm:$0xff] }
 0x1af   :  { %v6279_v25 = vsel %vm9004_vm3, %v2018_v47, %v2017_v2  ;;  %v760_v34 = vpop.xlane.xlu0 %759 }
 0x1b0   :  { %v1126_v44 = vpack.c.bf16 %v763_v53, %v760_v34  ;;  %v1013_v53 = vsel %vm277_vm0, %v266_v26, 0.0  ;;  %v1010_v34 = vsel %vm277_vm0, %v265_v10, 0.0 }
 0x1b2   :  { %v1668_v61 = vunpack.c.l.b16 %v1126_v44  ;;  %v1669_v38 = vunpack.c.h.b16 %v1126_v44 }
 0x1b3   :  { %969 = vadd.xlane.f32.xlu2 %v968_v15  ;;  %912 = vadd.xlane.f32.xlu1 %v911_v41  ;;  %v971_v41 = vsel %vm277_vm0, %v252_v22, 0.0  ;;  %v155_v22 = vld [vmem:[%s8992_s0 + $0x430] sm:$0xff] }
 0x1b4   :  { %909 = vadd.xlane.f32.xlu0 %v908_v32  ;;  %v2106_v15 = vperm.slane %v1668_v61, %v6118_v39  ;;  %v2107_v44 = vperm.slane %v1669_v38, %v6124_v56  ;;  %v156_v38 = vld [vmem:[%s8992_s0 + $0x438] sm:$0xff] }
 0x1b6   :  { %v955_v5 = vpop.xlane.xlu2 %954  ;;  %v952_v47 = vpop.xlane.xlu1 %951  ;;  %v2108_v26 = vsel %vm1769_vm1, %v2107_v44, %v2106_v15  ;;  %v680_v15 = vsel %vm277_vm0, %v155_v22, 0.0 }
 0x1b7   :  { %v1158_v52 = vpack.c.bf16 %v955_v5, %v952_v47  ;;  %v769_v2 = vpop.xlane.xlu0 %768 }
 0x1b8   :  { %v1127_v62 = vpack.c.bf16 %v769_v2, %v766_v14  ;;  %v169_v14 = vld [vmem:[%s8992_s0 + $0x4a0] sm:$0xff] }
 0x1b9   :  { %v1732_v44 = vunpack.c.l.b16 %v1158_v52 }
 0x1ba   :  { %v1670_v32 = vunpack.c.l.b16 %v1127_v62  ;;  %v1671_v6 = vunpack.c.h.b16 %v1127_v62 }
 0x1bb   :  { %1014 = vadd.xlane.f32.xlu2 %v1013_v53  ;;  %1011 = vadd.xlane.f32.xlu1 %v1010_v34  ;;  %v722_v53 = vsel %vm277_vm0, %v169_v14, 0.0  ;;  %v683_v34 = vsel %vm277_vm0, %v156_v38, 0.0 }
 0x1bc   :  { %v2109_v27 = vperm.slane %v1670_v32, %v6127_v50  ;;  %v2111_v5 = vperm.slane %v1671_v6, %v6142_v30  ;;  %972 = vadd.xlane.f32.xlu0 %v971_v41  ;;  %v190_v41 = vld [vmem:[%s8992_s0 + $0x548] sm:$0xff] }
 0x1be   :  { %v808_v61 = vpop.xlane.xlu2 %807  ;;  %v2110_v10 = vsel %vm1773_vm2, %v2109_v27, %v2108_v26  ;;  %v667_v47 = vpop.xlane.xlu1 %666  ;;  %v1733_v27 = vunpack.c.h.b16 %v1158_v52  ;;  %v170_v26 = vld [vmem:[%s8992_s0 + $0x4a8] sm:$0xff]  ;;  %v2230_v52 = vperm.slane %v1732_v44, %v6118_v39  ;;  %v141_v44 = vld [vmem:[%s8992_s0 + $0x3c0] sm:$0xff] }
 0x1bf   :  { %v6312_v6 = vsel %vm9004_vm3, %v2111_v5, %v2110_v10  ;;  %v664_v2 = vpop.xlane.xlu0 %663  ;;  %v189_v5 = vld [vmem:[%s8992_s0 + $0x540] sm:$0xff]  ;;  %v725_v35 = vsel %vm277_vm0, %v170_v26, 0.0 }
 0x1c0   :  { %v1110_v62 = vpack.c.bf16 %v667_v47, %v664_v2  ;;  %v785_v47 = vsel %vm277_vm0, %v190_v41, 0.0  ;;  %v2231_v22 = vperm.slane %v1733_v27, %v6124_v56 }
 0x1c2   :  { %v1637_v27 = vunpack.c.h.b16 %v1110_v62 }
 0x1c3   :  { %723 = vadd.xlane.f32.xlu2 %v722_v53  ;;  %684 = vadd.xlane.f32.xlu1 %v683_v34  ;;  %v782_v53 = vsel %vm277_vm0, %v189_v5, 0.0 }
 0x1c4   :  { %681 = vadd.xlane.f32.xlu0 %v680_v15 }
 0x1c6   :  { %v961_v32 = vpop.xlane.xlu2 %960  ;;  %v958_v14 = vpop.xlane.xlu1 %957 }
 0x1c7   :  { %v1159_v38 = vpack.c.bf16 %v961_v32, %v958_v14  ;;  %v811_v10 = vpop.xlane.xlu0 %810  ;;  %v2232_v32 = vsel %vm1769_vm1, %v2231_v22, %v2230_v52  ;;  %v204_v14 = vld [vmem:[%s8992_s0 + $0x5b8] sm:$0xff]  ;;  %v2045_v22 = vperm.slane %v1637_v27, %v6124_v56 }
 0x1c8   :  { %v1134_v2 = vpack.c.bf16 %v811_v10, %v808_v61  ;;  %v1636_v61 = vunpack.c.l.b16 %v1110_v62  ;;  %v827_v62 = vsel %vm277_vm0, %v204_v14, 0.0  ;;  %v219_v14 = vld [vmem:[%s8992_s0 + $0x630] sm:$0xff] }
 0x1c9   :  { %v1734_v34 = vunpack.c.l.b16 %v1159_v38  ;;  %v1735_v15 = vunpack.c.h.b16 %v1159_v38 }
 0x1cb   :  { %786 = vadd.xlane.f32.xlu2 %v785_v47  ;;  %v2233_v43 = vperm.slane %v1734_v34, %v6127_v50  ;;  %v2235_v57 = vperm.slane %v1735_v15, %v6142_v30  ;;  %783 = vadd.xlane.f32.xlu1 %v782_v53  ;;  %v638_v47 = vsel %vm277_vm0, %v141_v44, 0.0  ;;  %v1684_v15 = vunpack.c.l.b16 %v1134_v2  ;;  %v220_v44 = vld [vmem:[%s8992_s0 + $0x638] sm:$0xff] }
 0x1cc   :  { %726 = vadd.xlane.f32.xlu0 %v725_v35  ;;  %v203_v35 = vld [vmem:[%s8992_s0 + $0x5b0] sm:$0xff] }
 0x1cd   :  { %v2234_v41 = vsel %vm1773_vm2, %v2233_v43, %v2232_v32  ;;  %v2044_v43 = vperm.slane %v1636_v61, %v6118_v39  ;;  %v824_v53 = vsel %vm277_vm0, %v203_v35, 0.0  ;;  %v1685_v32 = vunpack.c.h.b16 %v1134_v2  ;;  %v142_v2 = vld [vmem:[%s8992_s0 + $0x3c8] sm:$0xff] }
 0x1ce   :  { %v772_v5 = vpop.xlane.xlu2 %771  ;;  %v6342_v26 = vsel %vm9004_vm3, %v2235_v57, %v2234_v41  ;;  %v673_v38 = vpop.xlane.xlu1 %672 }
 0x1cf   :  { %v670_v10 = vpop.xlane.xlu0 %669  ;;  %v2046_v61 = vsel %vm1769_vm1, %v2045_v22, %v2044_v43  ;;  %v2137_v43 = vperm.slane %v1684_v15, %v6118_v39  ;;  %v2138_v22 = vperm.slane %v1685_v32, %v6124_v56  ;;  %v253_v32 = vld [vmem:[%s8992_s0 + $0x740] sm:$0xff] }
 0x1d0   :  { %v1111_v52 = vpack.c.bf16 %v673_v38, %v670_v10 }
 0x1d2   :  { %v1638_v34 = vunpack.c.l.b16 %v1111_v52  ;;  %v1639_v57 = vunpack.c.h.b16 %v1111_v52 }
 0x1d3   :  { %639 = vadd.xlane.f32.xlu2 %v638_v47  ;;  %828 = vadd.xlane.f32.xlu1 %v827_v62  ;;  %v875_v62 = vsel %vm277_vm0, %v220_v44, 0.0  ;;  %v2139_v44 = vsel %vm1769_vm1, %v2138_v22, %v2137_v43  ;;  %v974_v43 = vsel %vm277_vm0, %v253_v32, 0.0 }
 0x1d4   :  { %v2047_v41 = vperm.slane %v1638_v34, %v6127_v50  ;;  %v2049_v33 = vperm.slane %v1639_v57, %v6142_v30  ;;  %825 = vadd.xlane.f32.xlu0 %v824_v53  ;;  %v872_v34 = vsel %vm277_vm0, %v219_v14, 0.0 }
 0x1d6   :  { %v817_v27 = vpop.xlane.xlu2 %816  ;;  %v2048_v38 = vsel %vm1773_vm2, %v2047_v41, %v2046_v61  ;;  %v814_v35 = vpop.xlane.xlu1 %813  ;;  %v641_v61 = vsel %vm277_vm0, %v142_v2, 0.0 }
 0x1d7   :  { %v6366_v10 = vsel %vm9004_vm3, %v2049_v33, %v2048_v38  ;;  %v1135_v47 = vpack.c.bf16 %v817_v27, %v814_v35  ;;  %v775_v52 = vpop.xlane.xlu0 %774  ;;  %v234_v35 = vld [vmem:[%s8992_s0 + $0x6a8] sm:$0xff] }
 0x1d8   :  { %v1128_v53 = vpack.c.bf16 %v775_v52, %v772_v5 }
 0x1d9   :  { %v1686_v57 = vunpack.c.l.b16 %v1135_v47  ;;  %v1687_v41 = vunpack.c.h.b16 %v1135_v47 }
 0x1da   :  { %v1672_v17 = vunpack.c.l.b16 %v1128_v53  ;;  %v1673_v16 = vunpack.c.h.b16 %v1128_v53  ;;  %v917_v53 = vsel %vm277_vm0, %v234_v35, 0.0 }
 0x1db   :  { %876 = vadd.xlane.f32.xlu2 %v875_v62  ;;  %v2140_v33 = vperm.slane %v1686_v57, %v6127_v50  ;;  %v2142_v27 = vperm.slane %v1687_v41, %v6142_v30  ;;  %873 = vadd.xlane.f32.xlu1 %v872_v34  ;;  %v267_v41 = vld [vmem:[%s8992_s0 + $0x7b0] sm:$0xff] }
 0x1dc   :  { %v2113_v15 = vperm.slane %v1672_v17, %v6150_v48  ;;  %v2115_v5 = vperm.slane %v1673_v16, %v6158_v59  ;;  %642 = vadd.xlane.f32.xlu0 %v641_v61  ;;  %v233_v16 = vld [vmem:[%s8992_s0 + $0x6a0] sm:$0xff]  ;;  %v1016_v32 = vsel %vm277_vm0, %v267_v41, 0.0 }
 0x1dd   :  { %v2141_v14 = vsel %vm1773_vm2, %v2140_v33, %v2139_v44  ;;  %v914_v34 = vsel %vm277_vm0, %v233_v16, 0.0  ;;  %v254_v33 = vld [vmem:[%s8992_s0 + $0x748] sm:$0xff] }
 0x1de   :  { %v1000_v38 = vpop.xlane.xlu2 %999  ;;  %v6386_v2 = vsel %vm9004_vm3, %v2142_v27, %v2141_v14  ;;  %v2114_v17 = vsel %vm1781_vm4, %v2113_v15, %v6312_v6  ;;  %v859_v47 = vpop.xlane.xlu1 %858  ;;  %v268_v6 = vld [vmem:[%s8992_s0 + $0x7b8] sm:$0xff] }
 0x1df   :  { %v6394_v52 = vsel %vm1785_vm5, %v2115_v5, %v2114_v17  ;;  %v856_v62 = vpop.xlane.xlu0 %855  ;;  %v1019_v15 = vsel %vm277_vm0, %v268_v6, 0.0  ;;  %v977_v17 = vsel %vm277_vm0, %v254_v33, 0.0 }
 0x1e0   :  { %v1142_v22 = vpack.c.bf16 %v859_v47, %v856_v62 }
 0x1e2   :  { %v1700_v62 = vunpack.c.l.b16 %v1142_v22 }
 0x1e3   :  { %975 = vadd.xlane.f32.xlu2 %v974_v43  ;;  %918 = vadd.xlane.f32.xlu1 %v917_v53  ;;  %v1701_v43 = vunpack.c.h.b16 %v1142_v22  ;;  %v157_v22 = vld [vmem:[%s8992_s0 + $0x440] sm:$0xff] }
 0x1e4   :  { %915 = vadd.xlane.f32.xlu0 %v914_v34  ;;  %v158_v34 = vld [vmem:[%s8992_s0 + $0x448] sm:$0xff] }
 0x1e6   :  { %v712_v57 = vpop.xlane.xlu2 %711  ;;  %v631_v61 = vpop.xlane.xlu1 %630 }
 0x1e7   :  { %v1104_v27 = vpack.c.bf16 %v631_v61, %v6248_v20  ;;  %v1003_v44 = vpop.xlane.xlu0 %1002  ;;  %v171_v20 = vld [vmem:[%s8992_s0 + $0x4b0] sm:$0xff] }
 0x1e8   :  { %v6410_v5 = vpack.c.bf16 %v1003_v44, %v1000_v38  ;;  %v2168_v44 = vperm.slane %v1700_v62, %v6118_v39 }
 0x1e9   :  { %v1624_v14 = vunpack.c.l.b16 %v1104_v27  ;;  %v1625_v35 = vunpack.c.h.b16 %v1104_v27  ;;  %v728_v27 = vsel %vm277_vm0, %v171_v20, 0.0 }
 0x1eb   :  { %1020 = vadd.xlane.f32.xlu2 %v1019_v15  ;;  %v2020_v47 = vperm.slane %v1624_v14, %v6150_v48  ;;  %v2022_v16 = vperm.slane %v1625_v35, %v6158_v59  ;;  %1017 = vadd.xlane.f32.xlu1 %v1016_v32  ;;  %v689_v32 = vsel %vm277_vm0, %v158_v34, 0.0 }
 0x1ec   :  { %978 = vadd.xlane.f32.xlu0 %v977_v17  ;;  %v686_v17 = vsel %vm277_vm0, %v157_v22, 0.0 }
 0x1ed   :  { %v2021_v38 = vsel %vm1781_vm4, %v2020_v47, %v6279_v25  ;;  %v2169_v25 = vperm.slane %v1701_v43, %v6124_v56 }
 0x1ee   :  { %v865_v53 = vpop.xlane.xlu2 %864  ;;  %v6425_v6 = vsel %vm1785_vm5, %v2022_v16, %v2021_v38  ;;  %v862_v41 = vpop.xlane.xlu1 %861  ;;  %v191_v38 = vld [vmem:[%s8992_s0 + $0x550] sm:$0xff] }
 0x1ef   :  { %v1143_v61 = vpack.c.bf16 %v865_v53, %v862_v41  ;;  %v715_v33 = vpop.xlane.xlu0 %714  ;;  %v2170_v20 = vsel %vm1769_vm1, %v2169_v25, %v2168_v44  ;;  %v172_v41 = vld [vmem:[%s8992_s0 + $0x4b8] sm:$0xff] }
 0x1f0   :  { %v6433_v15 = vpack.c.bf16 %v715_v33, %v712_v57  ;;  %v192_v57 = vld [vmem:[%s8992_s0 + $0x558] sm:$0xff]  ;;  %v731_v44 = vsel %vm277_vm0, %v172_v41, 0.0 }
 0x1f1   :  { %v1702_v14 = vunpack.c.l.b16 %v1143_v61  ;;  %v1703_v35 = vunpack.c.h.b16 %v1143_v61  ;;  %v791_v61 = vsel %vm277_vm0, %v192_v57, 0.0  ;;  %v206_v57 = vld [vmem:[%s8992_s0 + $0x5c8] sm:$0xff] }
 0x1f3   :  { %729 = vadd.xlane.f32.xlu2 %v728_v27  ;;  %v2171_v47 = vperm.slane %v1702_v14, %v6127_v50  ;;  %v2173_v16 = vperm.slane %v1703_v35, %v6142_v30  ;;  %690 = vadd.xlane.f32.xlu1 %v689_v32  ;;  %v788_v27 = vsel %vm277_vm0, %v191_v38, 0.0 }
 0x1f4   :  { %687 = vadd.xlane.f32.xlu0 %v686_v17  ;;  %v143_v17 = vld [vmem:[%s8992_s0 + $0x3d0] sm:$0xff] }
 0x1f5   :  { %v2172_v62 = vsel %vm1773_vm2, %v2171_v47, %v2170_v20  ;;  %v1748_v47 = vunpack.c.l.b16 %v6410_v5 }
 0x1f6   :  { %v1006_v43 = vpop.xlane.xlu2 %1005  ;;  %v6448_v53 = vsel %vm9004_vm3, %v2173_v16, %v2172_v62  ;;  %v967_v34 = vpop.xlane.xlu1 %966  ;;  %v1749_v16 = vunpack.c.h.b16 %v6410_v5  ;;  %v205_v62 = vld [vmem:[%s8992_s0 + $0x5c0] sm:$0xff]  ;;  %v644_v5 = vsel %vm277_vm0, %v143_v17, 0.0 }
 0x1f7   :  { %v964_v22 = vpop.xlane.xlu0 %963 }
 0x1f8   :  { %v1160_v33 = vpack.c.bf16 %v967_v34, %v964_v22 }
 0x1fa   :  { %v1736_v25 = vunpack.c.l.b16 %v1160_v33  ;;  %v1737_v32 = vunpack.c.h.b16 %v1160_v33 }
 0x1fb   :  { %792 = vadd.xlane.f32.xlu2 %v791_v61  ;;  %789 = vadd.xlane.f32.xlu1 %v788_v27  ;;  %v833_v27 = vsel %vm277_vm0, %v206_v57, 0.0  ;;  %v1652_v57 = vunpack.c.l.b16 %v6433_v15 }
 0x1fc   :  { %v2237_v14 = vperm.slane %v1736_v25, %v6150_v48  ;;  %v2239_v35 = vperm.slane %v1737_v32, %v6158_v59  ;;  %732 = vadd.xlane.f32.xlu0 %v731_v44  ;;  %v830_v44 = vsel %vm277_vm0, %v205_v62, 0.0  ;;  %v2261_v25 = vperm.slane %v1748_v47, %v6118_v39  ;;  %v222_v47 = vld [vmem:[%s8992_s0 + $0x648] sm:$0xff] }
 0x1fd   :  { %v2262_v32 = vperm.slane %v1749_v16, %v6124_v56  ;;  %v1653_v62 = vunpack.c.h.b16 %v6433_v15 }
 0x1fe   :  { %v679_v20 = vpop.xlane.xlu2 %678  ;;  %v2238_v38 = vsel %vm1781_vm4, %v2237_v14, %v6342_v26  ;;  %v676_v34 = vpop.xlane.xlu1 %675 }
 0x1ff   :  { %v6472_v41 = vsel %vm1785_vm5, %v2239_v35, %v2238_v38  ;;  %v1112_v22 = vpack.c.bf16 %v679_v20, %v676_v34  ;;  %v1009_v61 = vpop.xlane.xlu0 %1008  ;;  %v2263_v16 = vsel %vm1769_vm1, %v2262_v32, %v2261_v25  ;;  %v221_v38 = vld [vmem:[%s8992_s0 + $0x640] sm:$0xff]  ;;  %v2075_v25 = vperm.slane %v1652_v57, %v6118_v39  ;;  %v236_v57 = vld [vmem:[%s8992_s0 + $0x6b8] sm:$0xff] }
 0x200   :  { %v1167_v33 = vpack.c.bf16 %v1009_v61, %v1006_v43  ;;  %v2076_v32 = vperm.slane %v1653_v62, %v6124_v56 }
 0x201   :  { %v1640_v19 = vunpack.c.l.b16 %v1112_v22  ;;  %v1641_v11 = vunpack.c.h.b16 %v1112_v22 }
 0x202   :  { %v1750_v26 = vunpack.c.l.b16 %v1167_v33  ;;  %v1751_v14 = vunpack.c.h.b16 %v1167_v33 }
 0x203   :  { %645 = vadd.xlane.f32.xlu2 %v644_v5  ;;  %v2051_v35 = vperm.slane %v1640_v19, %v6150_v48  ;;  %v2053_v20 = vperm.slane %v1641_v11, %v6158_v59  ;;  %834 = vadd.xlane.f32.xlu1 %v833_v27  ;;  %v144_v5 = vld [vmem:[%s8992_s0 + $0x3d8] sm:$0xff] }
 0x204   :  { %v2264_v43 = vperm.slane %v1750_v26, %v6127_v50  ;;  %v2266_v17 = vperm.slane %v1751_v14, %v6142_v30  ;;  %831 = vadd.xlane.f32.xlu0 %v830_v44  ;;  %v878_v44 = vsel %vm277_vm0, %v221_v38, 0.0  ;;  %v647_v26 = vsel %vm277_vm0, %v144_v5, 0.0  ;;  %v235_v38 = vld [vmem:[%s8992_s0 + $0x6b0] sm:$0xff] }
 0x205   :  { %v2052_v19 = vsel %vm1781_vm4, %v2051_v35, %v6366_v10  ;;  %v881_v10 = vsel %vm277_vm0, %v222_v47, 0.0  ;;  %v2077_v47 = vsel %vm1769_vm1, %v2076_v32, %v2075_v25  ;;  %v920_v32 = vsel %vm277_vm0, %v235_v38, 0.0 }
 0x206   :  { %v778_v11 = vpop.xlane.xlu2 %777  ;;  %v6495_v34 = vsel %vm1785_vm5, %v2053_v20, %v2052_v19  ;;  %v2265_v22 = vsel %vm1773_vm2, %v2264_v43, %v2263_v16  ;;  %v721_v61 = vpop.xlane.xlu1 %720 }
 0x207   :  { %v6502_v15 = vsel %vm9004_vm3, %v2266_v17, %v2265_v22  ;;  %v718_v33 = vpop.xlane.xlu0 %717  ;;  %v255_v17 = vld [vmem:[%s8992_s0 + $0x750] sm:$0xff] }
 0x208   :  { %v1119_v27 = vpack.c.bf16 %v721_v61, %v718_v33  ;;  %v980_v33 = vsel %vm277_vm0, %v255_v17, 0.0 }
 0x20a   :  { %v1654_v14 = vunpack.c.l.b16 %v1119_v27  ;;  %v1655_v35 = vunpack.c.h.b16 %v1119_v27  ;;  %v923_v27 = vsel %vm277_vm0, %v236_v57, 0.0  ;;  %v269_v57 = vld [vmem:[%s8992_s0 + $0x7c0] sm:$0xff] }
 0x20b   :  { %882 = vadd.xlane.f32.xlu2 %v881_v10  ;;  %879 = vadd.xlane.f32.xlu1 %v878_v44 }
 0x20c   :  { %v2078_v20 = vperm.slane %v1654_v14, %v6127_v50  ;;  %v2080_v43 = vperm.slane %v1655_v35, %v6142_v30  ;;  %648 = vadd.xlane.f32.xlu0 %v647_v26 }
 0x20e   :  { %v823_v16 = vpop.xlane.xlu2 %822  ;;  %v2079_v62 = vsel %vm1773_vm2, %v2078_v20, %v2077_v47  ;;  %v820_v19 = vpop.xlane.xlu1 %819 }
 0x20f   :  { %v6523_v22 = vsel %vm9004_vm3, %v2080_v43, %v2079_v62  ;;  %v1136_v61 = vpack.c.bf16 %v823_v16, %v820_v19  ;;  %v781_v5 = vpop.xlane.xlu0 %780 }
 0x210   :  { %v1129_v10 = vpack.c.bf16 %v781_v5, %v778_v11  ;;  %v270_v11 = vld [vmem:[%s8992_s0 + $0x7c8] sm:$0xff] }
 0x211   :  { %v1688_v44 = vunpack.c.l.b16 %v1136_v61  ;;  %v1689_v25 = vunpack.c.h.b16 %v1136_v61  ;;  %v256_v61 = vld [vmem:[%s8992_s0 + $0x758] sm:$0xff] }
 0x212   :  { %v1674_v26 = vunpack.c.l.b16 %v1129_v10  ;;  %v1675_v14 = vunpack.c.h.b16 %v1129_v10 }
 0x213   :  { %981 = vadd.xlane.f32.xlu2 %v980_v33  ;;  %v2144_v35 = vperm.slane %v1688_v44, %v6150_v48  ;;  %v2146_v20 = vperm.slane %v1689_v25, %v6158_v59  ;;  %924 = vadd.xlane.f32.xlu1 %v923_v27  ;;  %v1025_v33 = vsel %vm277_vm0, %v270_v11, 0.0  ;;  %v1022_v27 = vsel %vm277_vm0, %v269_v57, 0.0 }
 0x214   :  { %v2117_v43 = vperm.slane %v1674_v26, %v6165_v1  ;;  %v2119_v47 = vperm.slane %v1675_v14, %v6176_v13  ;;  %921 = vadd.xlane.f32.xlu0 %v920_v32  ;;  %v983_v44 = vsel %vm277_vm0, %v256_v61, 0.0  ;;  %v160_v32 = vld [vmem:[%s8992_s0 + $0x458] sm:$0xff]  ;;  %v159_v14 = vld [vmem:[%s8992_s0 + $0x450] sm:$0xff] }
 0x215   :  { %v2145_v17 = vsel %vm1781_vm4, %v2144_v35, %v6386_v2  ;;  %v695_v11 = vsel %vm277_vm0, %v160_v32, 0.0 }
 0x216   :  { %v634_v16 = vpop.xlane.xlu2 %633  ;;  %v6541_v62 = vsel %vm1785_vm5, %v2146_v20, %v2145_v17  ;;  %v2118_v19 = vsel %vm1789_vm6, %v2117_v43, %v6394_v52  ;;  %v907_v38 = vpop.xlane.xlu1 %906  ;;  %v173_v52 = vld [vmem:[%s8992_s0 + $0x4c0] sm:$0xff] }
 0x217   :  { %v6549_v5 = vsel %vm1793_vm7, %v2119_v47, %v2118_v19  ;;  %v904_v2 = vpop.xlane.xlu0 %903  ;;  %v734_v43 = vsel %vm277_vm0, %v173_v52, 0.0  ;;  %v692_v19 = vsel %vm277_vm0, %v159_v14, 0.0  ;;  %v193_v14 = vld [vmem:[%s8992_s0 + $0x560] sm:$0xff] }
 0x218   :  { %v1150_v10 = vpack.c.bf16 %v907_v38, %v904_v2 }
 0x21a   :  { %v1716_v52 = vunpack.c.l.b16 %v1150_v10 }
 0x21b   :  { %1026 = vadd.xlane.f32.xlu2 %v1025_v33  ;;  %1023 = vadd.xlane.f32.xlu1 %v1022_v27 }
 0x21c   :  { %984 = vadd.xlane.f32.xlu0 %v983_v44 }
 0x21e   :  { %v871_v25 = vpop.xlane.xlu2 %870  ;;  %v868_v26 = vpop.xlane.xlu1 %867 }
 0x21f   :  { %v1144_v35 = vpack.c.bf16 %v871_v25, %v868_v26  ;;  %v637_v20 = vpop.xlane.xlu0 %636  ;;  %v1717_v25 = vunpack.c.h.b16 %v1150_v10 }
 0x220   :  { %v1105_v47 = vpack.c.bf16 %v637_v20, %v634_v16  ;;  %v194_v16 = vld [vmem:[%s8992_s0 + $0x568] sm:$0xff] }
 0x221   :  { %v1704_v17 = vunpack.c.l.b16 %v1144_v35  ;;  %v1705_v57 = vunpack.c.h.b16 %v1144_v35 }
 0x222   :  { %v1626_v38 = vunpack.c.l.b16 %v1105_v47  ;;  %v1627_v61 = vunpack.c.h.b16 %v1105_v47  ;;  %v174_v47 = vld [vmem:[%s8992_s0 + $0x4c8] sm:$0xff] }
 0x223   :  { %735 = vadd.xlane.f32.xlu2 %v734_v43  ;;  %v2175_v2 = vperm.slane %v1704_v17, %v6150_v48  ;;  %v2177_v33 = vperm.slane %v1705_v57, %v6158_v59  ;;  %696 = vadd.xlane.f32.xlu1 %v695_v11  ;;  %v797_v11 = vsel %vm277_vm0, %v194_v16, 0.0  ;;  %v794_v57 = vsel %vm277_vm0, %v193_v14, 0.0 }
 0x224   :  { %v2024_v27 = vperm.slane %v1626_v38, %v6165_v1  ;;  %v2026_v44 = vperm.slane %v1627_v61, %v6176_v13  ;;  %693 = vadd.xlane.f32.xlu0 %v692_v19  ;;  %v2199_v19 = vperm.slane %v1716_v52, %v6118_v39  ;;  %v2200_v38 = vperm.slane %v1717_v25, %v6124_v56  ;;  %v208_v25 = vld [vmem:[%s8992_s0 + $0x5d8] sm:$0xff] }
 0x225   :  { %v2176_v32 = vsel %vm1781_vm4, %v2175_v2, %v6448_v53 }
 0x226   :  { %v970_v26 = vpop.xlane.xlu2 %969  ;;  %v6579_v35 = vsel %vm1785_vm5, %v2177_v33, %v2176_v32  ;;  %v2025_v20 = vsel %vm1789_vm6, %v2024_v27, %v6425_v6  ;;  %v913_v43 = vpop.xlane.xlu1 %912  ;;  %v737_v6 = vsel %vm277_vm0, %v174_v47, 0.0  ;;  %v2201_v16 = vsel %vm1769_vm1, %v2200_v38, %v2199_v19 }
 0x227   :  { %v6587_v10 = vsel %vm1793_vm7, %v2026_v44, %v2025_v20  ;;  %v910_v53 = vpop.xlane.xlu0 %909  ;;  %v145_v44 = vld [vmem:[%s8992_s0 + $0x3e0] sm:$0xff]  ;;  %v207_v20 = vld [vmem:[%s8992_s0 + $0x5d0] sm:$0xff] }
 0x228   :  { %v1151_v17 = vpack.c.bf16 %v913_v43, %v910_v53 }
 0x22a   :  { %v1718_v61 = vunpack.c.l.b16 %v1151_v17  ;;  %v1719_v2 = vunpack.c.h.b16 %v1151_v17 }
 0x22b   :  { %798 = vadd.xlane.f32.xlu2 %v797_v11  ;;  %795 = vadd.xlane.f32.xlu1 %v794_v57  ;;  %v650_v11 = vsel %vm277_vm0, %v145_v44, 0.0  ;;  %v839_v57 = vsel %vm277_vm0, %v208_v25, 0.0 }
 0x22c   :  { %v2202_v33 = vperm.slane %v1718_v61, %v6127_v50  ;;  %v2204_v27 = vperm.slane %v1719_v2, %v6142_v30  ;;  %738 = vadd.xlane.f32.xlu0 %v737_v6  ;;  %v836_v6 = vsel %vm277_vm0, %v207_v20, 0.0 }
 0x22e   :  { %v1015_v52 = vpop.xlane.xlu2 %1014  ;;  %v2203_v32 = vsel %vm1773_vm2, %v2202_v33, %v2201_v16  ;;  %v1012_v14 = vpop.xlane.xlu1 %1011 }
 0x22f   :  { %v6608_v43 = vsel %vm9004_vm3, %v2204_v27, %v2203_v32  ;;  %v1168_v47 = vpack.c.bf16 %v1015_v52, %v1012_v14  ;;  %v973_v53 = vpop.xlane.xlu0 %972  ;;  %v223_v32 = vld [vmem:[%s8992_s0 + $0x650] sm:$0xff] }
 0x230   :  { %v1161_v17 = vpack.c.bf16 %v973_v53, %v970_v26  ;;  %v224_v26 = vld [vmem:[%s8992_s0 + $0x658] sm:$0xff]  ;;  %v146_v53 = vld [vmem:[%s8992_s0 + $0x3e8] sm:$0xff] }
 0x231   :  { %v1752_v19 = vunpack.c.l.b16 %v1168_v47  ;;  %v1753_v38 = vunpack.c.h.b16 %v1168_v47 }
 0x232   :  { %v1738_v61 = vunpack.c.l.b16 %v1161_v17  ;;  %v1739_v2 = vunpack.c.h.b16 %v1161_v17  ;;  %v887_v17 = vsel %vm277_vm0, %v224_v26, 0.0 }
 0x233   :  { %651 = vadd.xlane.f32.xlu2 %v650_v11  ;;  %v2268_v33 = vperm.slane %v1752_v19, %v6150_v48  ;;  %v2270_v16 = vperm.slane %v1753_v38, %v6158_v59  ;;  %840 = vadd.xlane.f32.xlu1 %v839_v57  ;;  %v884_v19 = vsel %vm277_vm0, %v223_v32, 0.0  ;;  %v653_v38 = vsel %vm277_vm0, %v146_v53, 0.0 }
 0x234   :  { %v2241_v27 = vperm.slane %v1738_v61, %v6165_v1  ;;  %v2243_v52 = vperm.slane %v1739_v2, %v6176_v13  ;;  %837 = vadd.xlane.f32.xlu0 %v836_v6 }
 0x235   :  { %v2269_v44 = vsel %vm1781_vm4, %v2268_v33, %v6502_v15  ;;  %v257_v33 = vld [vmem:[%s8992_s0 + $0x760] sm:$0xff] }
 0x236   :  { %v724_v25 = vpop.xlane.xlu2 %723  ;;  %v6626_v14 = vsel %vm1785_vm5, %v2270_v16, %v2269_v44  ;;  %v2242_v20 = vsel %vm1789_vm6, %v2241_v27, %v6472_v41  ;;  %v685_v47 = vpop.xlane.xlu1 %684  ;;  %v238_v27 = vld [vmem:[%s8992_s0 + $0x6c8] sm:$0xff]  ;;  %v237_v44 = vld [vmem:[%s8992_s0 + $0x6c0] sm:$0xff]  ;;  %v986_v53 = vsel %vm277_vm0, %v257_v33, 0.0 }
 0x237   :  { %v6634_v11 = vsel %vm1793_vm7, %v2243_v52, %v2242_v20  ;;  %v682_v15 = vpop.xlane.xlu0 %681 }
 0x238   :  { %v1113_v57 = vpack.c.bf16 %v685_v47, %v682_v15 }
 0x23a   :  { %v1642_v6 = vunpack.c.l.b16 %v1113_v57  ;;  %v1643_v61 = vunpack.c.h.b16 %v1113_v57 }
 0x23b   :  { %888 = vadd.xlane.f32.xlu2 %v887_v17  ;;  %885 = vadd.xlane.f32.xlu1 %v884_v19  ;;  %v929_v17 = vsel %vm277_vm0, %v238_v27, 0.0 }
 0x23c   :  { %v2055_v41 = vperm.slane %v1642_v6, %v6165_v1  ;;  %v2057_v2 = vperm.slane %v1643_v61, %v6176_v13  ;;  %654 = vadd.xlane.f32.xlu0 %v653_v38  ;;  %v926_v38 = vsel %vm277_vm0, %v237_v44, 0.0 }
 0x23e   :  { %v787_v16 = vpop.xlane.xlu2 %786  ;;  %v2056_v52 = vsel %vm1789_vm6, %v2055_v41, %v6495_v34  ;;  %v784_v26 = vpop.xlane.xlu1 %783 }
 0x23f   :  { %v6653_v32 = vsel %vm1793_vm7, %v2057_v2, %v2056_v52  ;;  %v1130_v20 = vpack.c.bf16 %v787_v16, %v784_v26  ;;  %v727_v47 = vpop.xlane.xlu0 %726  ;;  %v271_v52 = vld [vmem:[%s8992_s0 + $0x7d0] sm:$0xff] }
 0x240   :  { %v1120_v15 = vpack.c.bf16 %v727_v47, %v724_v25  ;;  %v272_v25 = vld [vmem:[%s8992_s0 + $0x7d8] sm:$0xff]  ;;  %v258_v47 = vld [vmem:[%s8992_s0 + $0x768] sm:$0xff] }
 0x241   :  { %v1676_v57 = vunpack.c.l.b16 %v1130_v20  ;;  %v1677_v19 = vunpack.c.h.b16 %v1130_v20 }
 0x242   :  { %v1656_v34 = vunpack.c.l.b16 %v1120_v15  ;;  %v1657_v6 = vunpack.c.h.b16 %v1120_v15  ;;  %v1031_v15 = vsel %vm277_vm0, %v272_v25, 0.0 }
 0x243   :  { %987 = vadd.xlane.f32.xlu2 %v986_v53  ;;  %v2121_v61 = vperm.slane %v1676_v57, %v6180_v42  ;;  %v2123_v41 = vperm.slane %v1677_v19, %v6190_v51  ;;  %930 = vadd.xlane.f32.xlu1 %v929_v17  ;;  %v1028_v57 = vsel %vm277_vm0, %v271_v52, 0.0  ;;  %v989_v19 = vsel %vm277_vm0, %v258_v47, 0.0 }
 0x244   :  { %v2082_v2 = vperm.slane %v1656_v34, %v6150_v48  ;;  %v2084_v16 = vperm.slane %v1657_v6, %v6158_v59  ;;  %927 = vadd.xlane.f32.xlu0 %v926_v38 }
 0x245   :  { %v2122_v33 = vsel %vm1797_vm8, %v2121_v61, %v6549_v5  ;;  %v175_v61 = vld [vmem:[%s8992_s0 + $0x4d0] sm:$0xff] }
 0x246   :  { %v640_v27 = vpop.xlane.xlu2 %639  ;;  %v6671_v26 = vsel %vm1801_vm9, %v2123_v41, %v2122_v33  ;;  %v2083_v44 = vsel %vm1781_vm4, %v2082_v2, %v6523_v22  ;;  %v829_v20 = vpop.xlane.xlu1 %828  ;;  %v162_v2 = vld [vmem:[%s8992_s0 + $0x468] sm:$0xff]  ;;  %v161_v33 = vld [vmem:[%s8992_s0 + $0x460] sm:$0xff]  ;;  %v740_v47 = vsel %vm277_vm0, %v175_v61, 0.0 }
 0x247   :  { %v6679_v53 = vsel %vm1785_vm5, %v2084_v16, %v2083_v44  ;;  %v826_v5 = vpop.xlane.xlu0 %825 }
 0x248   :  { %v1137_v17 = vpack.c.bf16 %v829_v20, %v826_v5 }
 0x24a   :  { %v1690_v38 = vunpack.c.l.b16 %v1137_v17  ;;  %v1691_v34 = vunpack.c.h.b16 %v1137_v17 }
 0x24b   :  { %1032 = vadd.xlane.f32.xlu2 %v1031_v15  ;;  %1029 = vadd.xlane.f32.xlu1 %v1028_v57  ;;  %v701_v15 = vsel %vm277_vm0, %v162_v2, 0.0 }
 0x24c   :  { %v2148_v22 = vperm.slane %v1690_v38, %v6165_v1  ;;  %v2150_v6 = vperm.slane %v1691_v34, %v6176_v13  ;;  %990 = vadd.xlane.f32.xlu0 %v989_v19  ;;  %v698_v19 = vsel %vm277_vm0, %v161_v33, 0.0 }
 0x24e   :  { %v877_v41 = vpop.xlane.xlu2 %876  ;;  %v2149_v16 = vsel %vm1789_vm6, %v2148_v22, %v6541_v62  ;;  %v874_v25 = vpop.xlane.xlu1 %873 }
 0x24f   :  { %v6698_v52 = vsel %vm1793_vm7, %v2150_v6, %v2149_v16  ;;  %v1145_v44 = vpack.c.bf16 %v877_v41, %v874_v25  ;;  %v643_v20 = vpop.xlane.xlu0 %642  ;;  %v195_v16 = vld [vmem:[%s8992_s0 + $0x570] sm:$0xff] }
 0x250   :  { %v1106_v5 = vpack.c.bf16 %v643_v20, %v640_v27  ;;  %v196_v27 = vld [vmem:[%s8992_s0 + $0x578] sm:$0xff] }
 0x251   :  { %v1706_v17 = vunpack.c.l.b16 %v1145_v44  ;;  %v1707_v57 = vunpack.c.h.b16 %v1145_v44  ;;  %v176_v20 = vld [vmem:[%s8992_s0 + $0x4d8] sm:$0xff] }
 0x252   :  { %v1628_v62 = vunpack.c.l.b16 %v1106_v5  ;;  %v1629_v38 = vunpack.c.h.b16 %v1106_v5  ;;  %v803_v5 = vsel %vm277_vm0, %v196_v27, 0.0 }
 0x253   :  { %741 = vadd.xlane.f32.xlu2 %v740_v47  ;;  %v2179_v34 = vperm.slane %v1706_v17, %v6165_v1  ;;  %v2181_v22 = vperm.slane %v1707_v57, %v6176_v13  ;;  %702 = vadd.xlane.f32.xlu1 %v701_v15  ;;  %v800_v17 = vsel %vm277_vm0, %v195_v16, 0.0  ;;  %v743_v57 = vsel %vm277_vm0, %v176_v20, 0.0 }
 0x254   :  { %v2028_v6 = vperm.slane %v1628_v62, %v6180_v42  ;;  %v2030_v41 = vperm.slane %v1629_v38, %v6190_v51  ;;  %699 = vadd.xlane.f32.xlu0 %v698_v19 }
 0x255   :  { %v2180_v61 = vsel %vm1789_vm6, %v2179_v34, %v6579_v35  ;;  %v147_v34 = vld [vmem:[%s8992_s0 + $0x3f0] sm:$0xff] }
 0x256   :  { %v976_v2 = vpop.xlane.xlu2 %975  ;;  %v6716_v25 = vsel %vm1793_vm7, %v2181_v22, %v2180_v61  ;;  %v2029_v33 = vsel %vm1797_vm8, %v2028_v6, %v6587_v10  ;;  %v919_v44 = vpop.xlane.xlu1 %918  ;;  %v210_v6 = vld [vmem:[%s8992_s0 + $0x5e8] sm:$0xff]  ;;  %v209_v61 = vld [vmem:[%s8992_s0 + $0x5e0] sm:$0xff]  ;;  %v656_v20 = vsel %vm277_vm0, %v147_v34, 0.0 }
 0x257   :  { %v6724_v47 = vsel %vm1801_vm9, %v2030_v41, %v2029_v33  ;;  %v916_v35 = vpop.xlane.xlu0 %915 }
 0x258   :  { %v1152_v15 = vpack.c.bf16 %v919_v44, %v916_v35 }
 0x25a   :  { %v1720_v19 = vunpack.c.l.b16 %v1152_v15  ;;  %v1721_v62 = vunpack.c.h.b16 %v1152_v15 }
 0x25b   :  { %804 = vadd.xlane.f32.xlu2 %v803_v5  ;;  %801 = vadd.xlane.f32.xlu1 %v800_v17  ;;  %v845_v5 = vsel %vm277_vm0, %v210_v6, 0.0 }
 0x25c   :  { %v2206_v10 = vperm.slane %v1720_v19, %v6150_v48  ;;  %v2208_v38 = vperm.slane %v1721_v62, %v6158_v59  ;;  %744 = vadd.xlane.f32.xlu0 %v743_v57  ;;  %v842_v57 = vsel %vm277_vm0, %v209_v61, 0.0 }
 0x25e   :  { %v1021_v22 = vpop.xlane.xlu2 %1020  ;;  %v2207_v41 = vsel %vm1781_vm4, %v2206_v10, %v6608_v43  ;;  %v1018_v27 = vpop.xlane.xlu1 %1017 }
 0x25f   :  { %v6743_v16 = vsel %vm1785_vm5, %v2208_v38, %v2207_v41  ;;  %v1169_v33 = vpack.c.bf16 %v1021_v22, %v1018_v27  ;;  %v979_v44 = vpop.xlane.xlu0 %978  ;;  %v225_v41 = vld [vmem:[%s8992_s0 + $0x660] sm:$0xff] }
 0x260   :  { %v1162_v35 = vpack.c.bf16 %v979_v44, %v976_v2  ;;  %v226_v2 = vld [vmem:[%s8992_s0 + $0x668] sm:$0xff]  ;;  %v148_v44 = vld [vmem:[%s8992_s0 + $0x3f8] sm:$0xff] }
 0x261   :  { %v1754_v15 = vunpack.c.l.b16 %v1169_v33  ;;  %v1755_v17 = vunpack.c.h.b16 %v1169_v33 }
 0x262   :  { %v1740_v43 = vunpack.c.l.b16 %v1162_v35  ;;  %v1741_v19 = vunpack.c.h.b16 %v1162_v35  ;;  %v893_v35 = vsel %vm277_vm0, %v226_v2, 0.0  ;;  %v240_v2 = vld [vmem:[%s8992_s0 + $0x6d8] sm:$0xff] }
 0x263   :  { %657 = vadd.xlane.f32.xlu2 %v656_v20  ;;  %v2272_v62 = vperm.slane %v1754_v15, %v6165_v1  ;;  %v2274_v10 = vperm.slane %v1755_v17, %v6176_v13  ;;  %846 = vadd.xlane.f32.xlu1 %v845_v5  ;;  %v1046_v5 = vpack.c.bf16 %v5552_v40, %v5534_v31  ;;  %v890_v17 = vsel %vm277_vm0, %v225_v41, 0.0  ;;  %v259_v31 = vld [vmem:[%s8992_s0 + $0x770] sm:$0xff] }
 0x264   :  { %v2245_v38 = vperm.slane %v1740_v43, %v6180_v42  ;;  %v2247_v22 = vperm.slane %v1741_v19, %v6190_v51  ;;  %843 = vadd.xlane.f32.xlu0 %v842_v57  ;;  %v659_v57 = vsel %vm277_vm0, %v148_v44, 0.0  ;;  %v1047_v19 = vpack.c.bf16 %v5544_v37, %v5529_v29  ;;  %v239_v37 = vld [vmem:[%s8992_s0 + $0x6d0] sm:$0xff] }
 0x265   :  { %v2273_v34 = vsel %vm1789_vm6, %v2272_v62, %v6626_v14  ;;  %v1508_v62 = vunpack.c.l.b16 %v1046_v5  ;;  %v1509_v40 = vunpack.c.h.b16 %v1046_v5  ;;  %v992_v44 = vsel %vm277_vm0, %v259_v31, 0.0 }
 0x266   :  { %v730_v6 = vpop.xlane.xlu2 %729  ;;  %v6761_v27 = vsel %vm1793_vm7, %v2274_v10, %v2273_v34  ;;  %v2246_v61 = vsel %vm1797_vm8, %v2245_v38, %v6634_v11  ;;  %v691_v33 = vpop.xlane.xlu1 %690 }
 0x267   :  { %v6769_v20 = vsel %vm1801_vm9, %v2247_v22, %v2246_v61  ;;  %v688_v14 = vpop.xlane.xlu0 %687 }
 0x268   :  { %v1114_v15 = vpack.c.bf16 %v691_v33, %v688_v14  ;;  %v1510_v14 = vunpack.c.l.b16 %v1047_v19 }
 0x26a   :  { %v1644_v11 = vunpack.c.l.b16 %v1114_v15  ;;  %v1645_v43 = vunpack.c.h.b16 %v1114_v15  ;;  %v935_v15 = vsel %vm277_vm0, %v240_v2, 0.0  ;;  %v274_v2 = vld [vmem:[%s8992_s0 + $0x7e8] sm:$0xff] }
 0x26b   :  { %894 = vadd.xlane.f32.xlu2 %v893_v35  ;;  %891 = vadd.xlane.f32.xlu1 %v890_v17  ;;  %v1766_v35 = vperm.slane %v1508_v62, %v6118_v39 }
 0x26c   :  { %v2059_v10 = vperm.slane %v1644_v11, %v6180_v42  ;;  %v2061_v38 = vperm.slane %v1645_v43, %v6190_v51  ;;  %660 = vadd.xlane.f32.xlu0 %v659_v57  ;;  %v932_v11 = vsel %vm277_vm0, %v239_v37, 0.0  ;;  %v273_v37 = vld [vmem:[%s8992_s0 + $0x7e0] sm:$0xff] }
 0x26e   :  { %v793_v22 = vpop.xlane.xlu2 %792  ;;  %v2060_v34 = vsel %vm1797_vm8, %v2059_v10, %v6653_v32  ;;  %v790_v29 = vpop.xlane.xlu1 %789  ;;  %v1768_v32 = vperm.slane %v1509_v40, %v6124_v56 }
 0x26f   :  { %v6792_v41 = vsel %vm1801_vm9, %v2061_v38, %v2060_v34  ;;  %v1131_v61 = vpack.c.bf16 %v793_v22, %v790_v29  ;;  %v733_v33 = vpop.xlane.xlu0 %732  ;;  %v1048_v38 = vpack.c.bf16 %v5542_v36, %v5527_v28  ;;  %v1511_v34 = vunpack.c.h.b16 %v1047_v19  ;;  %v260_v19 = vld [vmem:[%s8992_s0 + $0x778] sm:$0xff] }
 0x270   :  { %v1121_v5 = vpack.c.bf16 %v733_v33, %v730_v6  ;;  %v1772_v6 = vperm.slane %v1510_v14, %v6127_v50  ;;  %v1770_v29 = vsel %vm1769_vm1, %v1768_v32, %v1766_v35  ;;  %v1049_v32 = vpack.c.bf16 %v5562_v46, %v5570_v49 }
 0x271   :  { %v1678_v17 = vunpack.c.l.b16 %v1131_v61  ;;  %v1679_v57 = vunpack.c.h.b16 %v1131_v61  ;;  %v1512_v14 = vunpack.c.l.b16 %v1048_v38  ;;  %v1050_v46 = vpack.c.bf16 %v5588_v58, %v5560_v45 }
 0x272   :  { %v1658_v43 = vunpack.c.l.b16 %v1121_v5  ;;  %v1659_v10 = vunpack.c.h.b16 %v1121_v5  ;;  %v1037_v5 = vsel %vm277_vm0, %v274_v2, 0.0 }
 0x273   :  { %993 = vadd.xlane.f32.xlu2 %v992_v44  ;;  %v2125_v31 = vperm.slane %v1678_v17, %v6202_v60  ;;  %v2127_v22 = vperm.slane %v1679_v57, %v6209_v24  ;;  %936 = vadd.xlane.f32.xlu1 %v935_v15  ;;  %v1774_v15 = vsel %vm1773_vm2, %v1772_v6, %v1770_v29  ;;  %v1514_v6 = vunpack.c.l.b16 %v1049_v32 }
 0x274   :  { %v2086_v62 = vperm.slane %v1658_v43, %v6165_v1  ;;  %v2088_v40 = vperm.slane %v1659_v10, %v6176_v13  ;;  %933 = vadd.xlane.f32.xlu0 %v932_v11  ;;  %v1776_v57 = vperm.slane %v1511_v34, %v6142_v30  ;;  %v995_v11 = vsel %vm277_vm0, %v260_v19, 0.0  ;;  %v164_v34 = vld [vmem:[%s8992_s0 + $0x478] sm:$0xff] }
 0x275   :  { %v2126_v28 = vsel %vm1805_vm10, %v2125_v31, %v6671_v26  ;;  %v1513_v43 = vunpack.c.h.b16 %v1048_v38  ;;  %v177_v38 = vld [vmem:[%s8992_s0 + $0x4e0] sm:$0xff] }
 0x276   :  { %v646_v36 = vpop.xlane.xlu2 %645  ;;  %v6816_v61 = vsel %vm1809_vm11, %v2127_v22, %v2126_v28  ;;  %v2087_v33 = vsel %vm1789_vm6, %v2086_v62, %v6679_v53  ;;  %v835_v44 = vpop.xlane.xlu1 %834  ;;  %v1034_v53 = vsel %vm277_vm0, %v273_v37, 0.0  ;;  %v1780_v22 = vperm.slane %v1512_v14, %v6150_v48  ;;  %v163_v37 = vld [vmem:[%s8992_s0 + $0x470] sm:$0xff] }
 0x277   :  { %v6824_v35 = vsel %vm1793_vm7, %v2088_v40, %v2087_v33  ;;  %v832_v26 = vpop.xlane.xlu0 %831  ;;  %v1778_v62 = vsel %vm9004_vm3, %v1776_v57, %v1774_v15  ;;  %v1784_v29 = vperm.slane %v1513_v43, %v6158_v59  ;;  %v1515_v33 = vunpack.c.h.b16 %v1049_v32 }
 0x278   :  { %v1138_v17 = vpack.c.bf16 %v835_v44, %v832_v26  ;;  %v1782_v28 = vsel %vm1781_vm4, %v1780_v22, %v1778_v62  ;;  %v746_v26 = vsel %vm277_vm0, %v177_v38, 0.0  ;;  %v1516_v15 = vunpack.c.l.b16 %v1050_v46 }
 0x279   :  { %v1786_v43 = vsel %vm1785_vm5, %v1784_v29, %v1782_v28  ;;  %v1051_v32 = vpack.c.bf16 %v5578_v54, %v5580_v55  ;;  %v1792_v22 = vperm.slane %v1515_v33, %v6176_v13  ;;  %v1517_v62 = vunpack.c.h.b16 %v1050_v46  ;;  %v212_v54 = vld [vmem:[%s8992_s0 + $0x5f8] sm:$0xff] }
 0x27a   :  { %v1692_v10 = vunpack.c.l.b16 %v1138_v17  ;;  %v1693_v31 = vunpack.c.h.b16 %v1138_v17 }
 0x27b   :  { %1038 = vadd.xlane.f32.xlu2 %v1037_v5  ;;  %1035 = vadd.xlane.f32.xlu1 %v1034_v53  ;;  %v1788_v5 = vperm.slane %v1514_v6, %v6165_v1  ;;  %v707_v53 = vsel %vm277_vm0, %v164_v34, 0.0  ;;  %v211_v34 = vld [vmem:[%s8992_s0 + $0x5f0] sm:$0xff]  ;;  %v1518_v29 = vunpack.c.l.b16 %v1051_v32 }
 0x27c   :  { %v2152_v49 = vperm.slane %v1692_v10, %v6180_v42  ;;  %v2154_v40 = vperm.slane %v1693_v31, %v6190_v51  ;;  %996 = vadd.xlane.f32.xlu0 %v995_v11  ;;  %v704_v11 = vsel %vm277_vm0, %v163_v37, 0.0  ;;  %v178_v37 = vld [vmem:[%s8992_s0 + $0x4e8] sm:$0xff] }
 0x27e   :  { %v883_v2 = vpop.xlane.xlu2 %882  ;;  %v2153_v45 = vsel %vm1797_vm8, %v2152_v49, %v6698_v52  ;;  %v880_v58 = vpop.xlane.xlu1 %879  ;;  %v1790_v49 = vsel %vm1789_vm6, %v1788_v5, %v1786_v43 }
 0x27f   :  { %v6853_v44 = vsel %vm1801_vm9, %v2154_v40, %v2153_v45  ;;  %v1146_v19 = vpack.c.bf16 %v883_v2, %v880_v58  ;;  %v649_v14 = vpop.xlane.xlu0 %648  ;;  %v1796_v40 = vperm.slane %v1516_v15, %v6180_v42  ;;  %v1794_v33 = vsel %vm1793_vm7, %v1792_v22, %v1790_v49 }
 0x280   :  { %v1107_v17 = vpack.c.bf16 %v649_v14, %v646_v36 }
 0x281   :  { %v1708_v52 = vunpack.c.l.b16 %v1146_v19  ;;  %v1709_v57 = vunpack.c.h.b16 %v1146_v19  ;;  %v1798_v5 = vsel %vm1797_vm8, %v1796_v40, %v1794_v33  ;;  %v227_v40 = vld [vmem:[%s8992_s0 + $0x670] sm:$0xff] }
 0x282   :  { %v1630_v10 = vunpack.c.l.b16 %v1107_v17  ;;  %v1631_v31 = vunpack.c.h.b16 %v1107_v17  ;;  %v1519_v17 = vunpack.c.h.b16 %v1051_v32 }
 0x283   :  { %747 = vadd.xlane.f32.xlu2 %v746_v26  ;;  %v2183_v6 = vperm.slane %v1708_v52, %v6180_v42  ;;  %v2185_v36 = vperm.slane %v1709_v57, %v6190_v51  ;;  %708 = vadd.xlane.f32.xlu1 %v707_v53  ;;  %v851_v26 = vsel %vm277_vm0, %v212_v54, 0.0  ;;  %v749_v53 = vsel %vm277_vm0, %v178_v37, 0.0 }
 0x284   :  { %v2032_v38 = vperm.slane %v1630_v10, %v6202_v60  ;;  %v2034_v2 = vperm.slane %v1631_v31, %v6209_v24  ;;  %705 = vadd.xlane.f32.xlu0 %v704_v11  ;;  %v1804_v52 = vperm.slane %v1518_v29, %v6202_v60  ;;  %v1052_v57 = vpack.c.bf16 %v5598_v0, %v5606_v3  ;;  %v228_v0 = vld [vmem:[%s8992_s0 + $0x678] sm:$0xff] }
 0x285   :  { %v2184_v55 = vsel %vm1797_vm8, %v2183_v6, %v6716_v25  ;;  %v1800_v25 = vperm.slane %v1517_v62, %v6190_v51  ;;  %v1054_v31 = vpack.c.bf16 %v5614_v8, %v5616_v9  ;;  %v241_v62 = vld [vmem:[%s8992_s0 + $0x6e0] sm:$0xff]  ;;  %v1808_v3 = vperm.slane %v1519_v17, %v6209_v24 }
 0x286   :  { %v982_v46 = vpop.xlane.xlu2 %981  ;;  %v6878_v28 = vsel %vm1801_vm9, %v2185_v36, %v2184_v55  ;;  %v2033_v45 = vsel %vm1805_vm10, %v2032_v38, %v6724_v47  ;;  %v925_v58 = vpop.xlane.xlu1 %924  ;;  %v848_v47 = vsel %vm277_vm0, %v211_v34, 0.0  ;;  %v1520_v49 = vunpack.c.l.b16 %v1052_v57 }
 0x287   :  { %v6888_v19 = vsel %vm1809_vm11, %v2034_v2, %v2033_v45  ;;  %v922_v14 = vpop.xlane.xlu0 %921  ;;  %v1802_v10 = vsel %vm1801_vm9, %v1800_v25, %v1798_v5  ;;  %v1521_v38 = vunpack.c.h.b16 %v1052_v57  ;;  %v938_v34 = vsel %vm277_vm0, %v241_v62, 0.0  ;;  %v276_v57 = vld [vmem:[%s8992_s0 + $0x7f8] sm:$0xff]  ;;  %v275_v62 = vld [vmem:[%s8992_s0 + $0x7f0] sm:$0xff] }
 0x288   :  { %v1153_v15 = vpack.c.bf16 %v925_v58, %v922_v14  ;;  %v1806_v36 = vsel %vm1805_vm10, %v1804_v52, %v1802_v10  ;;  %v1524_v29 = vunpack.c.l.b16 %v1054_v31  ;;  %v1525_v45 = vunpack.c.h.b16 %v1054_v31  ;;  %v9085_v10 = vld [vmem:[#allocation17_spill] sm:$0xff] }
 0x289   :  { %v899_v37 = vsel %vm277_vm0, %v228_v0, 0.0  ;;  %v896_v14 = vsel %vm277_vm0, %v227_v40, 0.0  ;;  %v1062_v5 = vpack.c.bf16 %v5732_v23, %v5704_v4  ;;  %v1812_v17 = vperm.slane %v1520_v49, %v6213_v7 }
 0x28a   :  { %v1722_v11 = vunpack.c.l.b16 %v1153_v15  ;;  %v1723_v43 = vunpack.c.h.b16 %v1153_v15  ;;  %v1828_v52 = vperm.slane %v1525_v45, %v6124_v56 }
 0x28b   :  { %852 = vadd.xlane.f32.xlu2 %v851_v26  ;;  %849 = vadd.xlane.f32.xlu1 %v848_v47  ;;  %v1810_v26 = vsel %vm1809_vm11, %v1808_v3, %v1806_v36  ;;  %v1541_v0 = vunpack.c.h.b16 %v1062_v5 }
 0x28c   :  { %v2210_v22 = vperm.slane %v1722_v11, %v6165_v1  ;;  %v2212_v32 = vperm.slane %v1723_v43, %v6176_v13  ;;  %750 = vadd.xlane.f32.xlu0 %v749_v53  ;;  %v1827_v53 = vperm.slane %v1524_v29, %v6118_v39  ;;  %v9084_v43 = vld [vmem:[#allocation18_spill] sm:$0xff] }
 0x28d   :  { %v6943_v31 = vpack.c.bf16 %v9085_v10, %v9084_v43  ;;  %v9091_v10 = vld [vmem:[#allocation7_spill] sm:$0xff] }
 0x28e   :  { %v1027_v6 = vpop.xlane.xlu2 %1026  ;;  %v2211_v8 = vsel %vm1789_vm6, %v2210_v22, %v6743_v16  ;;  %v1024_v9 = vpop.xlane.xlu1 %1023  ;;  %v1055_v16 = vpack.c.bf16 %v5634_v18, %v5642_v21 }
 0x28f   :  { %v6916_v2 = vsel %vm1793_vm7, %v2212_v32, %v2211_v8  ;;  %v1170_v54 = vpack.c.bf16 %v1027_v6, %v1024_v9  ;;  %v985_v55 = vpop.xlane.xlu0 %984  ;;  %v1540_v6 = vunpack.c.l.b16 %v1062_v5  ;;  %v242_v8 = vld [vmem:[%s8992_s0 + $0x6e8] sm:$0xff]  ;;  %v1859_v5 = vperm.slane %v1541_v0, %v6124_v56 }
 0x290   :  { %v1163_v58 = vpack.c.bf16 %v985_v55, %v982_v46  ;;  %v6929_v46 = vpack.c.bf16 %v5624_v12, %v5596_v63  ;;  %v9083_v63 = vld [vmem:[#allocation79_spill] sm:$0xff]  ;;  %v1526_v11 = vunpack.c.l.b16 %v1055_v16  ;;  %v1829_v55 = vsel %vm1769_vm1, %v1828_v52, %v1827_v53  ;;  %v9089_v52 = vld [vmem:[#allocation21_spill] sm:$0xff] }
 0x291   :  { %v1756_v33 = vunpack.c.l.b16 %v1170_v54  ;;  %v1757_v25 = vunpack.c.h.b16 %v1170_v54  ;;  %v1816_v12 = vperm.slane %v1521_v38, %v9083_v63  ;;  %v1043_v54 = vsel %vm277_vm0, %v276_v57, 0.0 }
 0x292   :  { %v1742_v15 = vunpack.c.l.b16 %v1163_v58  ;;  %v1743_v47 = vunpack.c.h.b16 %v1163_v58  ;;  %v1522_v9 = vunpack.c.l.b16 %v6929_v46  ;;  %v1830_v45 = vperm.slane %v1526_v11, %v6127_v50  ;;  %v9086_v58 = vld [vmem:[#allocation5_spill] sm:$0xff] }
 0x293   :  { %939 = vadd.xlane.f32.xlu2 %v938_v34  ;;  %v2276_v18 = vperm.slane %v1756_v33, %v6180_v42  ;;  %v2278_v21 = vperm.slane %v1757_v25, %v6190_v51  ;;  %900 = vadd.xlane.f32.xlu1 %v899_v37  ;;  %v1527_v34 = vunpack.c.h.b16 %v1055_v16  ;;  %v9087_v37 = vld [vmem:[#allocation8_spill] sm:$0xff]  ;;  %v1542_v25 = vunpack.c.l.b16 %v6943_v31 }
 0x294   :  { %v2249_v4 = vperm.slane %v1742_v15, %v6202_v60  ;;  %v2251_v23 = vperm.slane %v1743_v47, %v6209_v24  ;;  %897 = vadd.xlane.f32.xlu0 %v896_v14  ;;  %v6969_v33 = vpack.c.bf16 %v9087_v37, %v9086_v58  ;;  %v941_v14 = vsel %vm277_vm0, %v242_v8, 0.0 }
 0x295   :  { %v2277_v22 = vsel %vm1797_vm8, %v2276_v18, %v6761_v27  ;;  %v1814_v27 = vsel %vm1813_vm12, %v1812_v17, %v1810_v26  ;;  %v1858_v26 = vperm.slane %v1540_v6, %v6118_v39  ;;  %v1523_v17 = vunpack.c.h.b16 %v6929_v46  ;;  %v9088_v18 = vld [vmem:[#allocation80_spill] sm:$0xff]  ;;  %v5165_v46 = vld [vmem:[%s8993_s1 + $0x3d4] sm:$0xf0] }
 0x296   :  { %v736_v32 = vpop.xlane.xlu2 %735  ;;  %v6951_v3 = vsel %vm1801_vm9, %v2278_v21, %v2277_v22  ;;  %v2250_v36 = vsel %vm1805_vm10, %v2249_v4, %v6769_v20  ;;  %v697_v49 = vpop.xlane.xlu1 %696  ;;  %v1040_v20 = vsel %vm277_vm0, %v275_v62, 0.0  ;;  %v6976_v16 = vsel %vm1817_vm13, %v1816_v12, %v1814_v27  ;;  %v9090_v4 = vld [vmem:[#allocation20_spill] sm:$0xff]  ;;  %v243_v12 = vld [vmem:[%s8992_s0 + $0x6f0] sm:$0xff] }
 0x297   :  { %v6961_v40 = vsel %vm1809_vm11, %v2251_v23, %v2250_v36  ;;  %v694_v38 = vpop.xlane.xlu0 %693  ;;  %v6980_v21 = vperm.slane %v1522_v9, %v9088_v18  ;;  %v1832_v53 = vperm.slane %v1527_v34, %v6142_v30  ;;  %v6985_v23 = vpack.c.bf16 %v9090_v4, %v9089_v52  ;;  %v9092_v22 = vld [vmem:[#allocation6_spill] sm:$0xff] }
 0x298   :  { %v1115_v29 = vpack.c.bf16 %v697_v49, %v694_v38  ;;  %v1831_v43 = vsel %vm1773_vm2, %v1830_v45, %v1829_v55  ;;  %v6995_v62 = vpack.c.bf16 %v9092_v22, %v9091_v10  ;;  %v1528_v6 = vunpack.c.l.b16 %v6969_v33  ;;  %v180_v49 = vld [vmem:[%s8992_s0 + $0x4f8] sm:$0xff]  ;;  %v179_v55 = vld [vmem:[%s8992_s0 + $0x4f0] sm:$0xff] }
 0x299   :  { %v1529_v0 = vunpack.c.h.b16 %v6969_v33  ;;  %v1543_v8 = vunpack.c.h.b16 %v6943_v31  ;;  %v1861_v27 = vperm.slane %v1542_v25, %v6127_v50  ;;  %v1860_v9 = vsel %vm1769_vm1, %v1859_v5, %v1858_v26  ;;  %v4636_v34 = vld [vmem:[%s8993_s1 + $0x450] sm:$0xf]  ;;  %v5183_v31 = vld [vmem:[%s8993_s1 + $0x464] sm:$0xf0]  ;;  %v9093_v33 = vld [vmem:[#allocation19_spill] sm:$0xff] }
 0x29a   :  { %v1646_v15 = vunpack.c.l.b16 %v1115_v29  ;;  %v1647_v47 = vunpack.c.h.b16 %v1115_v29  ;;  %v4637_v58 = vor.u32 %v5183_v31, %v4636_v34  ;;  %v1544_v37 = vunpack.c.l.b16 %v6985_v23  ;;  %v9094_v25 = vld [vmem:[#allocation24_spill] sm:$0xff]  ;;  %v5177_v22 = vld [vmem:[%s8993_s1 + $0x434] sm:$0xf0] }
 0x29b   :  { %1044 = vadd.xlane.f32.xlu2 %v1043_v54  ;;  %1041 = vadd.xlane.f32.xlu1 %v1040_v20  ;;  %v755_v5 = vsel %vm277_vm0, %v180_v49, 0.0  ;;  %v752_v4 = vsel %vm277_vm0, %v179_v55, 0.0  ;;  %v1833_v55 = vsel %vm9004_vm3, %v1832_v53, %v1831_v43  ;;  %v1530_v34 = vunpack.c.l.b16 %v6995_v62 }
 0x29c   :  { %v2063_v57 = vperm.slane %v1646_v15, %v6202_v60  ;;  %v2065_v11 = vperm.slane %v1647_v47, %v6209_v24  ;;  %942 = vadd.xlane.f32.xlu0 %v941_v14  ;;  %v1065_v14 = vpack.c.bf16 %v9094_v25, %v9093_v33  ;;  %v1834_v15 = vperm.slane %v1528_v6, %v6150_v48  ;;  %v5171_v25 = vld [vmem:[%s8993_s1 + $0x404] sm:$0xf0] }
 0x29d   :  { %3301 = vmatpush.bf16.msra.mxu2 %v4637_v58  ;;  %v1545_v6 = vunpack.c.h.b16 %v6985_v23  ;;  %v1836_v23 = vperm.slane %v1529_v0, %v6158_v59  ;;  %v9096_v58 = vld [vmem:[#allocation22_spill] sm:$0xff]  ;;  %v244_v0 = vld [vmem:[%s8992_s0 + $0x6f8] sm:$0xff] }
 0x29e   :  { %v799_v36 = vpop.xlane.xlu2 %798  ;;  %v2064_v38 = vsel %vm1805_vm10, %v2063_v57, %v6792_v41  ;;  %v796_v54 = vpop.xlane.xlu1 %795  ;;  %v944_v41 = vsel %vm277_vm0, %v243_v12, 0.0  ;;  %v1863_v57 = vperm.slane %v1543_v8, %v6142_v30 }
 0x29f   :  { %v7017_v29 = vsel %vm1809_vm11, %v2065_v11, %v2064_v38  ;;  %v1132_v20 = vpack.c.bf16 %v799_v36, %v796_v54  ;;  %v739_v45 = vpop.xlane.xlu0 %738  ;;  %v1862_v11 = vsel %vm1773_vm2, %v1861_v27, %v1860_v9  ;;  %v1865_v27 = vperm.slane %v1544_v37, %v6150_v48 }
 0x2a0   :  { %v1122_v26 = vpack.c.bf16 %v739_v45, %v736_v32  ;;  %v4612_v32 = vld [vmem:[%s8993_s1 + $0x420] sm:$0xf]  ;;  %v1546_v9 = vunpack.c.l.b16 %v1065_v14  ;;  %v1864_v45 = vsel %vm9004_vm3, %v1863_v57, %v1862_v11 }
 0x2a1   :  { %v1680_v47 = vunpack.c.l.b16 %v1132_v20  ;;  %v1681_v52 = vunpack.c.h.b16 %v1132_v20  ;;  %v4613_v8 = vor.u32 %v5177_v22, %v4612_v32  ;;  %v1866_v57 = vsel %vm1781_vm4, %v1865_v27, %v1864_v45  ;;  %v9101_v45 = vld [vmem:[#allocation26_spill] sm:$0xff] }
 0x2a2   :  { %v1660_v12 = vunpack.c.l.b16 %v1122_v26  ;;  %v1661_v10 = vunpack.c.h.b16 %v1122_v26  ;;  %v1867_v26 = vperm.slane %v1545_v6, %v6158_v59  ;;  %v1869_v11 = vperm.slane %v1546_v9, %v6165_v1  ;;  %v9098_v6 = vld [vmem:[#allocation11_spill] sm:$0xff]  ;;  %v4564_v9 = vld [vmem:[%s8993_s1 + $0x3c0] sm:$0xf] }
 0x2a3   :  { %945 = vadd.xlane.f32.xlu2 %v944_v41  ;;  %v2129_v36 = vperm.slane %v1680_v47, %v6213_v7  ;;  %v2131_v49 = vperm.slane %v1681_v52, %v9083_v63  ;;  %756 = vadd.xlane.f32.xlu1 %v755_v5  ;;  %v9095_v41 = vld [vmem:[#allocation23_spill] sm:$0xff]  ;;  %v1547_v5 = vunpack.c.h.b16 %v1065_v14  ;;  %v1531_v22 = vunpack.c.h.b16 %v6995_v62  ;;  %v9099_v14 = vld [vmem:[#allocation10_spill] sm:$0xff] }
 0x2a4   :  { %v2090_v38 = vperm.slane %v1660_v12, %v6180_v42  ;;  %v2092_v54 = vperm.slane %v1661_v10, %v6190_v51  ;;  %753 = vadd.xlane.f32.xlu0 %v752_v4  ;;  %3302 = vmatpush.bf16.msra.mxu2 %v4613_v8  ;;  %v7048_v37 = vpack.c.bf16 %v9096_v58, %v9095_v41  ;;  %v9097_v10 = vld [vmem:[#allocation81_spill] sm:$0xff] }
 0x2a5   :  { %v2130_v31 = vsel %vm1813_vm12, %v2129_v36, %v6816_v61  ;;  %v4588_v61 = vld [vmem:[%s8993_s1 + $0x3f0] sm:$0xf]  ;;  %v1835_v4 = vsel %vm1781_vm4, %v1834_v15, %v1833_v55  ;;  %v1824_v32 = vperm.slane %v1523_v17, %v9097_v10  ;;  %v1058_v36 = vpack.c.bf16 %v9099_v14, %v9098_v6 }
 0x2a6   :  { %v652_v20 = vpop.xlane.xlu2 %651  ;;  %v7051_v33 = vsel %vm1817_vm13, %v2131_v49, %v2130_v31  ;;  %v2091_v53 = vsel %vm1797_vm8, %v2090_v38, %v6824_v35  ;;  %v841_v43 = vpop.xlane.xlu1 %840  ;;  %v4589_v52 = vor.u32 %v5171_v25, %v4588_v61  ;;  %v947_v49 = vsel %vm277_vm0, %v244_v0, 0.0  ;;  %v9100_v31 = vld [vmem:[#allocation27_spill] sm:$0xff] }
 0x2a7   :  { %v7066_v47 = vsel %vm1801_vm9, %v2092_v54, %v2091_v53  ;;  %v838_v35 = vpop.xlane.xlu0 %837  ;;  %v1838_v8 = vperm.slane %v1530_v34, %v6165_v1  ;;  %v1548_v15 = vunpack.c.l.b16 %v7048_v37  ;;  %v1837_v17 = vsel %vm1785_vm5, %v1836_v23, %v1835_v4  ;;  %v4540_v4 = vld [vmem:[%s8993_s1 + $0x390] sm:$0xf] }
 0x2a8   :  { %v1139_v12 = vpack.c.bf16 %v841_v43, %v838_v35  ;;  %3303 = vmatpush.bf16.msra.mxu2 %v4589_v52  ;;  %v1868_v62 = vsel %vm1785_vm5, %v1867_v26, %v1866_v57  ;;  %v1871_v54 = vperm.slane %v1547_v5, %v6176_v13  ;;  %v4565_v55 = vor.u32 %v5165_v46, %v4564_v9 }
 0x2a9   :  { %v1870_v34 = vsel %vm1789_vm6, %v1869_v11, %v1868_v62  ;;  %v1067_v41 = vpack.c.bf16 %v9101_v45, %v9100_v31  ;;  %v1822_v43 = vsel %vm1821_vm14, %v6980_v21, %v6976_v16  ;;  %v1840_v23 = vperm.slane %v1531_v22, %v6176_v13  ;;  %v5159_v16 = vld [vmem:[%s8993_s1 + $0x3a4] sm:$0xf0] }
 0x2aa   :  { %v1694_v27 = vunpack.c.l.b16 %v1139_v12  ;;  %v1695_v38 = vunpack.c.h.b16 %v1139_v12  ;;  %v1532_v0 = vunpack.c.l.b16 %v1058_v36  ;;  %v1839_v25 = vsel %vm1789_vm6, %v1838_v8, %v1837_v17 }
 0x2ab   :  { %v1549_v26 = vunpack.c.h.b16 %v7048_v37  ;;  %v1873_v5 = vperm.slane %v1548_v15, %v6180_v42  ;;  %v1872_v21 = vsel %vm1793_vm7, %v1871_v54, %v1870_v34  ;;  %v4541_v12 = vor.u32 %v5159_v16, %v4540_v4  ;;  %v9107_v4 = vld [vmem:[#allocation32_spill] sm:$0xff] }
 0x2ac   :  { %v2156_v58 = vperm.slane %v1694_v27, %v6202_v60  ;;  %v2158_v53 = vperm.slane %v1695_v38, %v6209_v24  ;;  %948 = vadd.xlane.f32.xlu0 %v947_v49  ;;  %3304 = vmatpush.bf16.msra.mxu2 %v4565_v55  ;;  %v7114_v22 = vsel %vm1825_vm15, %v1824_v32, %v1822_v43  ;;  %v1550_v6 = vunpack.c.l.b16 %v1067_v41  ;;  %v4516_v32 = vld [vmem:[%s8993_s1 + $0x360] sm:$0xf]  ;;  %v9102_v43 = vld [vmem:[#allocation29_spill] sm:$0xff] }
 0x2ad   :  { %v1841_v49 = vsel %vm1793_vm7, %v1840_v23, %v1839_v25  ;;  %v1842_v8 = vperm.slane %v1532_v0, %v6180_v42  ;;  %v1875_v38 = vperm.slane %v1549_v26, %v6190_v51  ;;  %v1874_v9 = vsel %vm1797_vm8, %v1873_v5, %v1872_v21  ;;  %v9103_v23 = vld [vmem:[#allocation28_spill] sm:$0xff] }
 0x2ae   :  { %v889_v61 = vpop.xlane.xlu2 %888  ;;  %v2157_v35 = vsel %vm1805_vm10, %v2156_v58, %v6853_v44  ;;  %v886_v52 = vpop.xlane.xlu1 %885  ;;  %v1533_v44 = vunpack.c.h.b16 %v1058_v36  ;;  %v1551_v36 = vunpack.c.h.b16 %v1067_v41  ;;  %v1877_v31 = vperm.slane %v1550_v6, %v6202_v60  ;;  %v9104_v41 = vld [vmem:[#allocation25_spill] sm:$0xff] }
 0x2af   :  { %v7111_v57 = vsel %vm1809_vm11, %v2158_v53, %v2157_v35  ;;  %v1147_v37 = vpack.c.bf16 %v889_v61, %v886_v52  ;;  %v655_v11 = vpop.xlane.xlu0 %654  ;;  %v1843_v53 = vsel %vm1797_vm8, %v1842_v8, %v1841_v49  ;;  %v7135_v0 = vpack.c.bf16 %v9103_v23, %v9102_v43  ;;  %v9105_v61 = vld [vmem:[#allocation30_spill] sm:$0xff]  ;;  %v9106_v52 = vld [vmem:[#allocation33_spill] sm:$0xff]  ;;  %v9109_v49 = vld [vmem:[#allocation36_spill] sm:$0xff] }
 0x2b0   :  { %v1108_v14 = vpack.c.bf16 %v655_v11, %v652_v20  ;;  %3305 = vmatpush.bf16.msra.mxu2 %v4541_v12  ;;  %v5153_v20 = vld [vmem:[%s8993_s1 + $0x374] sm:$0xf0]  ;;  %v1844_v34 = vperm.slane %v1533_v44, %v6190_v51  ;;  %v1068_v25 = vpack.c.bf16 %v9105_v61, %v9104_v41  ;;  %v1876_v35 = vsel %vm1801_vm9, %v1875_v38, %v1874_v9  ;;  %v4252_v12 = vld [vmem:[%s8993_s1 + $0x150] sm:$0xf]  ;;  %v5147_v38 = vld [vmem:[%s8993_s1 + $0x344] sm:$0xf0] }
 0x2b1   :  { %v1710_v15 = vunpack.c.l.b16 %v1147_v37  ;;  %v1711_v27 = vunpack.c.h.b16 %v1147_v37  ;;  %v4517_v55 = vor.u32 %v5153_v20, %v4516_v32  ;;  %v1070_v16 = vpack.c.bf16 %v9107_v4, %v9106_v52  ;;  %v4492_v44 = vld [vmem:[%s8993_s1 + $0x330] sm:$0xf]  ;;  %v9110_v20 = vld [vmem:[#allocation13_spill] sm:$0xff]  ;;  %v5141_v52 = vld [vmem:[%s8993_s1 + $0x314] sm:$0xf0] }
 0x2b2   :  { %v1632_v46 = vunpack.c.l.b16 %v1108_v14  ;;  %v1633_v17 = vunpack.c.h.b16 %v1108_v14  ;;  %v1879_v6 = vperm.slane %v1551_v36, %v6209_v24  ;;  %v9108_v14 = vld [vmem:[#allocation31_spill] sm:$0xff]  ;;  %v7172_v9 = vsel %vm1801_vm9, %v1844_v34, %v1843_v53  ;;  %v9111_v36 = vld [vmem:[#allocation12_spill] sm:$0xff] }
 0x2b3   :  { %v2187_v62 = vperm.slane %v1710_v15, %v6202_v60  ;;  %v2189_v54 = vperm.slane %v1711_v27, %v6209_v24  ;;  %v7163_v8 = vpack.c.bf16 %v9109_v49, %v9108_v14  ;;  %v4493_v32 = vor.u32 %v5147_v38, %v4492_v44  ;;  %v4228_v34 = vld [vmem:[%s8993_s1 + $0x120] sm:$0xf]  ;;  %v5180_v4 = vld [vmem:[%s8993_s1 + $0x454] sm:$0xf] }
 0x2b4   :  { %v2036_v45 = vperm.slane %v1632_v46, %v6213_v7  ;;  %v2038_v58 = vperm.slane %v1633_v17, %v9083_v63  ;;  %3306 = vmatpush.bf16.msra.mxu2 %v4517_v55  ;;  %v1878_v46 = vsel %vm1805_vm10, %v1877_v31, %v1876_v35  ;;  %v1552_v55 = vunpack.c.l.b16 %v1068_v25  ;;  %v5081_v31 = vld [vmem:[%s8993_s1 + $0x134] sm:$0xf0]  ;;  %v4468_v53 = vld [vmem:[%s8993_s1 + $0x300] sm:$0xf] }
 0x2b5   :  { %v2188_v26 = vsel %vm1805_vm10, %v2187_v62, %v6878_v28  ;;  %v5087_v28 = vld [vmem:[%s8993_s1 + $0x164] sm:$0xf0]  ;;  %v7177_v62 = vpack.c.bf16 %v9111_v36, %v9110_v20  ;;  %v1557_v43 = vunpack.c.h.b16 %v1070_v16  ;;  %v1880_v61 = vsel %vm1809_vm11, %v1879_v6, %v1878_v46  ;;  %v9112_v49 = vld [vmem:[#allocation47_spill] sm:$0xff]  ;;  %v9115_v20 = vld [vmem:[#allocation34_spill] sm:$0xff] }
 0x2b6   :  { %v7141_v5 = vpop.xlane.xlu2 %987  ;;  %v7147_v21 = vsel %vm1809_vm11, %v2189_v54, %v2188_v26  ;;  %v2037_v37 = vsel %vm1813_vm12, %v2036_v45, %v6888_v19  ;;  %v931_v11 = vpop.xlane.xlu1 %930  ;;  %v4253_v27 = vor.u32 %v5087_v28, %v4252_v12  ;;  %v1554_v54 = vunpack.c.l.b16 %v7135_v0 }
 0x2b7   :  { %v7166_v19 = vsel %vm1817_vm13, %v2038_v58, %v2037_v37  ;;  %v928_v15 = vpop.xlane.xlu0 %927  ;;  %v1553_v45 = vunpack.c.h.b16 %v1068_v25  ;;  %v1556_v58 = vunpack.c.l.b16 %v1070_v16  ;;  %v1555_v25 = vunpack.c.h.b16 %v7135_v0  ;;  %v4638_v16 = vld [vmem:[%s8993_s1 + $0x468] sm:$0xf0]  ;;  %v4132_v0 = vld [vmem:[%s8993_s1 + $0x60] sm:$0xf] }
 0x2b8   :  { %v1154_v17 = vpack.c.bf16 %v931_v11, %v928_v15  ;;  %3275 = vmatpush.bf16.msra.mxu0 %v4253_v27  ;;  %3307 = vmatpush.bf16.msra.mxu2 %v4493_v32  ;;  %v1558_v26 = vunpack.c.l.b16 %v7163_v8  ;;  %v4229_v35 = vor.u32 %v5081_v31, %v4228_v34  ;;  %v4469_v12 = vor.u32 %v5141_v52, %v4468_v53  ;;  %v9113_v15 = vld [vmem:[#allocation46_spill] sm:$0xff]  ;;  %v9114_v32 = vld [vmem:[#allocation35_spill] sm:$0xff]  ;;  %v5231_v53 = vld [vmem:[%s8993_s1 + $0x5e4] sm:$0xf0] }
 0x2b9   :  { %v4641_v28 = vor.u32 %v5180_v4, %v4638_v16  ;;  %v7204_v44 = vperm.slane %v1554_v54, %v9088_v18  ;;  %v1881_v6 = vperm.slane %v1552_v55, %v6213_v7  ;;  %v1883_v14 = vperm.slane %v1553_v45, %v9083_v63  ;;  %v4204_v55 = vld [vmem:[%s8993_s1 + $0xf0] sm:$0xf]  ;;  %v5075_v45 = vld [vmem:[%s8993_s1 + $0x104] sm:$0xf0]  ;;  %v9117_v4 = vld [vmem:[#allocation51_spill] sm:$0xff] }
 0x2ba   :  { %v1724_v23 = vunpack.c.l.b16 %v1154_v17  ;;  %v1725_v41 = vunpack.c.h.b16 %v1154_v17  ;;  %v1078_v27 = vpack.c.bf16 %v9113_v15, %v9112_v49  ;;  %v1889_v46 = vperm.slane %v1556_v58, %v6118_v39  ;;  %v4828_v58 = vld [vmem:[%s8993_s1 + $0x5d0] sm:$0xf] }
 0x2bb   :  { %v1890_v17 = vperm.slane %v1557_v43, %v6124_v56  ;;  %v7214_v36 = vpack.c.bf16 %v9115_v20, %v9114_v32  ;;  %v1559_v43 = vunpack.c.h.b16 %v7163_v8  ;;  %v4205_v31 = vor.u32 %v5075_v45, %v4204_v55  ;;  %v4614_v8 = vld [vmem:[%s8993_s1 + $0x438] sm:$0xf0]  ;;  %v9118_v16 = vld [vmem:[#allocation50_spill] sm:$0xff]  ;;  %v4180_v45 = vld [vmem:[%s8993_s1 + $0xc0] sm:$0xf] }
 0x2bc   :  { %v2214_v37 = vperm.slane %v1724_v23, %v6180_v42  ;;  %v2216_v11 = vperm.slane %v1725_v41, %v6190_v51  ;;  %3276 = vmatpush.bf16.msra.mxu0 %v4229_v35  ;;  %3308 = vmatpush.bf16.msra.mxu2 %v4469_v12  ;;  %v5174_v35 = vld [vmem:[%s8993_s1 + $0x424] sm:$0xf]  ;;  %v1892_v52 = vperm.slane %v1558_v26, %v6127_v50  ;;  %v1573_v49 = vunpack.c.h.b16 %v1078_v27  ;;  %v9120_v55 = vld [vmem:[#allocation38_spill] sm:$0xff] }
 0x2bd   :  { %v4617_v12 = vor.u32 %v5174_v35, %v4614_v8  ;;  %v1882_v32 = vsel %vm1813_vm12, %v1881_v6, %v1880_v61  ;;  %v1891_v20 = vsel %vm1769_vm1, %v1890_v17, %v1889_v46  ;;  %v4804_v61 = vld [vmem:[%s8993_s1 + $0x5a0] sm:$0xf]  ;;  %v1894_v6 = vperm.slane %v1559_v43, %v6142_v30 }
 0x2be   :  { %v1033_v38 = vpop.xlane.xlu2 %1032  ;;  %v2215_v54 = vsel %vm1797_vm8, %v2214_v37, %v6916_v2  ;;  %v1030_v23 = vpop.xlane.xlu1 %1029  ;;  %v7245_v37 = vpack.c.bf16 %v9118_v16, %v9117_v4  ;;  %v1893_v43 = vsel %vm1773_vm2, %v1892_v52, %v1891_v20  ;;  %v1561_v16 = vunpack.c.h.b16 %v7214_v36 }
 0x2bf   :  { %v7229_v41 = vsel %vm1801_vm9, %v2216_v11, %v2215_v54  ;;  %v1171_v2 = vpack.c.bf16 %v1033_v38, %v1030_v23  ;;  %v7231_v34 = vpop.xlane.xlu0 %990  ;;  %v4829_v11 = vor.u32 %v5231_v53, %v4828_v58  ;;  %v1560_v54 = vunpack.c.l.b16 %v7214_v36  ;;  %v9119_v23 = vld [vmem:[#allocation39_spill] sm:$0xff]  ;;  %v4590_v53 = vld [vmem:[%s8993_s1 + $0x408] sm:$0xf0] }
 0x2c0   :  { %9116 = vst [vmem:[#allocation79_spill] sm:$0xff] %v7229_v41  ;;  %3353 = vmatpush.bf16.msrb.mxu2 %v4641_v28  ;;  %v1572_v28 = vunpack.c.l.b16 %v1078_v27  ;;  %3277 = vmatpush.bf16.msra.mxu0 %v4205_v31  ;;  %v7252_v26 = vpack.c.bf16 %v9120_v55, %v9119_v23  ;;  %v5069_v27 = vld [vmem:[%s8993_s1 + $0xd4] sm:$0xf0]  ;;  %v5168_v31 = vld [vmem:[%s8993_s1 + $0x3f4] sm:$0xf]  ;;  %v1574_v35 = vunpack.c.l.b16 %v7245_v37  ;;  %v1884_v23 = vsel %vm1817_vm13, %v1883_v14, %v1882_v32  ;;  %v9121_v32 = vld [vmem:[#allocation37_spill] sm:$0xff] }
 0x2c1   :  { %v1758_v15 = vunpack.c.l.b16 %v1171_v2  ;;  %v1759_v38 = vunpack.c.h.b16 %v1171_v2  ;;  %3314 = vmatpush.bf16.msra.mxu3 %v4829_v11  ;;  %v4181_v58 = vor.u32 %v5069_v27, %v4180_v45  ;;  %v5225_v2 = vld [vmem:[%s8993_s1 + $0x5b4] sm:$0xf0]  ;;  %v4593_v4 = vor.u32 %v5168_v31, %v4590_v53  ;;  %v4780_v14 = vld [vmem:[%s8993_s1 + $0x570] sm:$0xf]  ;;  %v9123_v31 = vld [vmem:[#allocation49_spill] sm:$0xff] }
 0x2c2   :  { %v4805_v8 = vor.u32 %v5225_v2, %v4804_v61  ;;  %v1920_v11 = vperm.slane %v1572_v28, %v6118_v39  ;;  %v1896_v52 = vperm.slane %v1560_v54, %v6150_v48  ;;  %v1562_v20 = vunpack.c.l.b16 %v7252_v26  ;;  %v4156_v28 = vld [vmem:[%s8993_s1 + $0x90] sm:$0xf]  ;;  %v9138_v41 = vld [vmem:[#allocation44_spill] sm:$0xff] }
 0x2c3   :  { %v2280_v46 = vperm.slane %v1758_v15, %v6202_v60  ;;  %v2282_v17 = vperm.slane %v1759_v38, %v6209_v24  ;;  %v9122_v54 = vld [vmem:[#allocation42_spill] sm:$0xff]  ;;  %v1575_v27 = vunpack.c.h.b16 %v7245_v37  ;;  %v1923_v2 = vperm.slane %v1574_v35, %v6127_v50 }
 0x2c4   :  { %3354 = vmatpush.bf16.msrb.mxu2 %v4617_v12  ;;  %v1921_v12 = vperm.slane %v1573_v49, %v6124_v56  ;;  %3278 = vmatpush.bf16.msra.mxu0 %v4181_v58  ;;  %v1895_v49 = vsel %vm9004_vm3, %v1894_v6, %v1893_v43  ;;  %v7304_v45 = vpack.c.bf16 %v9122_v54, %v9121_v32  ;;  %v5162_v58 = vld [vmem:[%s8993_s1 + $0x3c4] sm:$0xf]  ;;  %v4566_v6 = vld [vmem:[%s8993_s1 + $0x3d8] sm:$0xf0]  ;;  %v9124_v37 = vld [vmem:[#allocation54_spill] sm:$0xff]  ;;  %vm2292_vm0 = vcmask 1041409  }
 0x2c5   :  { %v2281_v15 = vsel %vm1805_vm10, %v2280_v46, %v6951_v3  ;;  %3315 = vmatpush.bf16.msra.mxu3 %v4805_v8  ;;  %v5063_v3 = vld [vmem:[%s8993_s1 + $0xa4] sm:$0xf0]  ;;  %v7321_v53 = vpack.c.bf16 %v9124_v37, %v9123_v31  ;;  %v4569_v8 = vor.u32 %v5162_v58, %v4566_v6  ;;  %v9126_v54 = vld [vmem:[#allocation14_spill] sm:$0xff]  ;;  %v1886_v31 = vsel %vm1821_vm14, %v7204_v44, %v1884_v23  ;;  %v5213_v23 = vld [vmem:[%s8993_s1 + $0x554] sm:$0xf0] }
 0x2c6   :  { %v7282_v38 = vpop.xlane.xlu2 %741  ;;  %v7288_v55 = vsel %vm1809_vm11, %v2282_v17, %v2281_v15  ;;  %v7290_v36 = vpop.xlane.xlu1 %702  ;;  %v4157_v46 = vor.u32 %v5063_v3, %v4156_v28  ;;  %v5219_v17 = vld [vmem:[%s8993_s1 + $0x584] sm:$0xf0]  ;;  %v1898_v15 = vperm.slane %v1561_v16, %v6158_v59  ;;  %v1563_v28 = vunpack.c.h.b16 %v7252_v26  ;;  %v4756_v26 = vld [vmem:[%s8993_s1 + $0x540] sm:$0xf] }
 0x2c7   :  { %v7307_v61 = vpop.xlane.xlu0 %699  ;;  %v4781_v43 = vor.u32 %v5219_v17, %v4780_v14  ;;  %v1922_v3 = vsel %vm1769_vm1, %v1921_v12, %v1920_v11  ;;  %v9125_v32 = vld [vmem:[#allocation9_spill] sm:$0xff]  ;;  %v1897_v14 = vsel %vm1781_vm4, %v1896_v52, %v1895_v49  ;;  %v1900_v17 = vperm.slane %v1562_v20, %v6165_v1  ;;  %v5156_v52 = vld [vmem:[%s8993_s1 + $0x394] sm:$0xf]  ;;  %v4542_v20 = vld [vmem:[%s8993_s1 + $0x3a8] sm:$0xf0] }
 0x2c8   :  { %3355 = vmatpush.bf16.msrb.mxu2 %v4593_v4  ;;  %v1887_v4 = vperm.slane %v1555_v25, %v9097_v10  ;;  %3279 = vmatpush.bf16.msra.mxu0 %v4157_v46  ;;  %v7331_v35 = vpack.c.bf16 %v9126_v54, %v9125_v32  ;;  %v5057_v25 = vld [vmem:[%s8993_s1 + $0x74] sm:$0xf0]  ;;  %v1564_v44 = vunpack.c.l.b16 %v7304_v45  ;;  %v1925_v11 = vperm.slane %v1575_v27, %v6142_v30  ;;  %v9127_v54 = vld [vmem:[#allocation41_spill] sm:$0xff] }
 0x2c9   :  { %3316 = vmatpush.bf16.msra.mxu3 %v4781_v43  ;;  %v4133_v12 = vor.u32 %v5057_v25, %v4132_v0  ;;  %v1924_v49 = vsel %vm1773_vm2, %v1923_v2, %v1922_v3  ;;  %v1576_v46 = vunpack.c.l.b16 %v7321_v53  ;;  %v4757_v58 = vor.u32 %v5213_v23, %v4756_v26  ;;  %v9128_v0 = vld [vmem:[#allocation40_spill] sm:$0xff]  ;;  %v9129_v3 = vld [vmem:[#allocation53_spill] sm:$0xff] }
 0x2ca   :  { %v4545_v27 = vor.u32 %v5156_v52, %v4542_v20  ;;  %v1899_v6 = vsel %vm1785_vm5, %v1898_v15, %v1897_v14  ;;  %v7362_v37 = vperm.slane %v1563_v28, %v6176_v13  ;;  %v1888_v43 = vsel %vm1825_vm15, %v1887_v4, %v1886_v31  ;;  %v9130_v25 = vld [vmem:[#allocation52_spill] sm:$0xff]  ;;  %v4108_v4 = vld [vmem:[%s8993_s1 + $0x30] sm:$0xf]  ;;  %v5051_v31 = vld [vmem:[%s8993_s1 + $0x44] sm:$0xf0] }
 0x2cb   :  { %v7366_v32 = vsel %vm1789_vm6, %v1900_v17, %v1899_v6  ;;  %v7370_v2 = vpack.c.bf16 %v9128_v0, %v9127_v54  ;;  %v7374_v26 = vpack.c.bf16 %v9130_v25, %v9129_v3  ;;  %v1577_v15 = vunpack.c.h.b16 %v7321_v53  ;;  %v4444_v14 = vld [vmem:[%s8993_s1 + $0x2d0] sm:$0xf]  ;;  %v5135_v20 = vld [vmem:[%s8993_s1 + $0x2e4] sm:$0xf0]  ;;  %v4518_v54 = vld [vmem:[%s8993_s1 + $0x378] sm:$0xf0] }
 0x2cc   :  { %3356 = vmatpush.bf16.msrb.mxu2 %v4569_v8  ;;  %3280 = vmatpush.bf16.msra.mxu0 %v4133_v12  ;;  %v7387_v17 = vperm.slane %v1564_v44, %v6180_v42  ;;  %v1926_v12 = vsel %vm9004_vm3, %v1925_v11, %v1924_v49  ;;  %v4109_v52 = vor.u32 %v5051_v31, %v4108_v4  ;;  %v5207_v6 = vld [vmem:[%s8993_s1 + $0x524] sm:$0xf0]  ;;  %vm2294_vm3 = vcmask 1042434   ;;  %v4084_v31 = vld [vmem:[%s8993_s1] sm:$0xf] }
 0x2cd   :  { %3317 = vmatpush.bf16.msra.mxu3 %v4757_v58  ;;  %v4732_v58 = vld [vmem:[%s8993_s1 + $0x510] sm:$0xf]  ;;  %v1927_v44 = vperm.slane %v1576_v46, %v6150_v48  ;;  %v4445_v49 = vor.u32 %v5135_v20, %v4444_v14  ;;  %v1929_v46 = vperm.slane %v1577_v15, %v6158_v59  ;;  %v5045_v14 = vld [vmem:[%s8993_s1 + $0x14] sm:$0xf0] }
 0x2ce   :  { %v805_v8 = vpop.xlane.xlu2 %804  ;;  %v802_v28 = vpop.xlane.xlu1 %801 }
 0x2cf   :  { %v1133_v53 = vpack.c.bf16 %v805_v8, %v802_v28  ;;  %v745_v23 = vpop.xlane.xlu0 %744  ;;  %v4733_v8 = vor.u32 %v5207_v6, %v4732_v58  ;;  %v1578_v28 = vunpack.c.l.b16 %v7374_v26  ;;  %3288 = vmatpush.bf16.msra.mxu1 %v4445_v49  ;;  %v4085_v6 = vor.u32 %v5045_v14, %v4084_v31  ;;  %v4708_v49 = vld [vmem:[%s8993_s1 + $0x4e0] sm:$0xf]  ;;  %v4254_v31 = vld [vmem:[%s8993_s1 + $0x168] sm:$0xf0]  ;;  %v5144_v14 = vld [vmem:[%s8993_s1 + $0x334] sm:$0xf] }
 0x2d0   :  { %3357 = vmatpush.bf16.msrb.mxu2 %v4545_v27  ;;  %v1123_v11 = vpack.c.bf16 %v745_v23, %v7282_v38  ;;  %v5150_v27 = vld [vmem:[%s8993_s1 + $0x364] sm:$0xf]  ;;  %3281 = vmatpush.bf16.msra.mxu0 %v4109_v52  ;;  %v9132_v52 = vld [vmem:[#allocation56_spill] sm:$0xff] }
 0x2d1   :  { %v1682_v0 = vunpack.c.l.b16 %v1133_v53  ;;  %v1683_v3 = vunpack.c.h.b16 %v1133_v53  ;;  %v4521_v25 = vor.u32 %v5150_v27, %v4518_v54  ;;  %3318 = vmatpush.bf16.msra.mxu3 %v4733_v8  ;;  %v4420_v53 = vld [vmem:[%s8993_s1 + $0x2a0] sm:$0xf]  ;;  %v9131_v23 = vld [vmem:[#allocation57_spill] sm:$0xff]  ;;  %v5201_v8 = vld [vmem:[%s8993_s1 + $0x4f4] sm:$0xf0] }
 0x2d2   :  { %v1662_v38 = vunpack.c.l.b16 %v1123_v11  ;;  %v1663_v4 = vunpack.c.h.b16 %v1123_v11  ;;  %v7420_v20 = vpack.c.bf16 %v9132_v52, %v9131_v23  ;;  %v5129_v11 = vld [vmem:[%s8993_s1 + $0x2b4] sm:$0xf0]  ;;  %v1928_v23 = vsel %vm1781_vm4, %v1927_v44, %v1926_v12  ;;  %v9133_v52 = vld [vmem:[#allocation82_spill] sm:$0xff] }
 0x2d3   :  { %v2133_v15 = vperm.slane %v1682_v0, %v9088_v18  ;;  %v2135_v58 = vperm.slane %v1683_v3, %v9097_v10  ;;  %v4421_v0 = vor.u32 %v5129_v11, %v4420_v53  ;;  %v4709_v3 = vor.u32 %v5201_v8, %v4708_v49  ;;  %v4494_v49 = vld [vmem:[%s8993_s1 + $0x348] sm:$0xf0] }
 0x2d4   :  { %3358 = vmatpush.bf16.msrb.mxu2 %v4521_v25  ;;  %v2094_v27 = vperm.slane %v1662_v38, %v6202_v60  ;;  %v2096_v54 = vperm.slane %v1663_v4, %v6209_v24  ;;  %v5084_v25 = vld [vmem:[%s8993_s1 + $0x154] sm:$0xf]  ;;  %v2301_v38 = vsel %vm2292_vm0, %v9133_v52, %v1888_v43  ;;  %3282 = vmatpush.bf16.msra.mxu0 %v4085_v6  ;;  %v1565_v8 = vunpack.c.h.b16 %v7304_v45  ;;  %v4396_v43 = vld [vmem:[%s8993_s1 + $0x270] sm:$0xf] }
 0x2d5   :  { %v2134_v4 = vsel %vm1821_vm14, %v2133_v15, %v7051_v33  ;;  %v4257_v11 = vor.u32 %v5084_v25, %v4254_v31  ;;  %3289 = vmatpush.bf16.msra.mxu1 %v4421_v0  ;;  %3319 = vmatpush.bf16.msra.mxu3 %v4709_v3  ;;  %v4497_v33 = vor.u32 %v5144_v14, %v4494_v49  ;;  %v5123_v15 = vld [vmem:[%s8993_s1 + $0x284] sm:$0xf0]  ;;  %v1579_v45 = vunpack.c.h.b16 %v7374_v26  ;;  %v4684_v0 = vld [vmem:[%s8993_s1 + $0x4b0] sm:$0xf]  ;;  %v9135_v25 = vld [vmem:[#allocation55_spill] sm:$0xff] }
 0x2d6   :  { %v7449_v53 = vpop.xlane.xlu2 %657  ;;  %v2136_v16 = vsel %vm1825_vm15, %v2135_v58, %v2134_v4  ;;  %v2095_v12 = vsel %vm1805_vm10, %v2094_v27, %v7066_v47  ;;  %v7458_v44 = vpop.xlane.xlu1 %846  ;;  %v4397_v27 = vor.u32 %v5123_v15, %v4396_v43  ;;  %v5195_v3 = vld [vmem:[%s8993_s1 + $0x4c4] sm:$0xf0]  ;;  %v1931_v26 = vperm.slane %v1578_v28, %v6165_v1  ;;  %v9136_v31 = vld [vmem:[#allocation60_spill] sm:$0xff]  ;;  %v5138_v4 = vld [vmem:[%s8993_s1 + $0x304] sm:$0xf] }
 0x2d7   :  { %v7468_v58 = vsel %vm2294_vm3, %v2136_v16, %v2301_v38  ;;  %v7471_v47 = vsel %vm1809_vm11, %v2096_v54, %v2095_v12  ;;  %v7473_v6 = vpop.xlane.xlu0 %843  ;;  %v5078_v16 = vld [vmem:[%s8993_s1 + $0x124] sm:$0xf]  ;;  %v1580_v54 = vunpack.c.l.b16 %v7420_v20  ;;  %v7488_v14 = vpack.c.bf16 %v9136_v31, %v9135_v25  ;;  %v4230_v38 = vld [vmem:[%s8993_s1 + $0x138] sm:$0xf0] }
 0x2d8   :  { %9134 = vst [vmem:[#allocation18_spill] sm:$0xff] %v7471_v47  ;;  %3327 = vmatpush.bf16.msrb.mxu0 %v4257_v11  ;;  %3359 = vmatpush.bf16.msrb.mxu2 %v4497_v33  ;;  %v4685_v52 = vor.u32 %v5195_v3, %v4684_v0  ;;  %v4470_v28 = vld [vmem:[%s8993_s1 + $0x318] sm:$0xf0]  ;;  %v1537_v11 = vunpack.c.h.b16 %v7177_v62  ;;  %v1930_v49 = vsel %vm1785_vm5, %v1929_v46, %v1928_v23  ;;  %v1534_v33 = vunpack.c.l.b16 %v7331_v35  ;;  %v9137_v31 = vld [vmem:[#allocation45_spill] sm:$0xff] }
 0x2d9   :  { %v4233_v12 = vor.u32 %v5078_v16, %v4230_v38  ;;  %v4473_v43 = vor.u32 %v5138_v4, %v4470_v28  ;;  %v1903_v15 = vsel %vm1793_vm7, %v7362_v37, %v7366_v32  ;;  %v1566_v0 = vunpack.c.l.b16 %v7370_v2  ;;  %3290 = vmatpush.bf16.msra.mxu1 %v4397_v27  ;;  %v4372_v37 = vld [vmem:[%s8993_s1 + $0x240] sm:$0xf]  ;;  %v5117_v32 = vld [vmem:[%s8993_s1 + $0x254] sm:$0xf0]  ;;  %v4206_v38 = vld [vmem:[%s8993_s1 + $0x108] sm:$0xf0] }
 0x2da   :  { %v1906_v3 = vperm.slane %v1565_v8, %v6190_v51  ;;  %3320 = vmatpush.bf16.msra.mxu3 %v4685_v52  ;;  %v1905_v25 = vsel %vm1797_vm8, %v7387_v17, %v1903_v15  ;;  %v7511_v46 = vpack.c.bf16 %v9138_v41, %v9137_v31  ;;  %v1933_v23 = vperm.slane %v1579_v45, %v6176_v13  ;;  %v4660_v17 = vld [vmem:[%s8993_s1 + $0x480] sm:$0xf]  ;;  %v5189_v27 = vld [vmem:[%s8993_s1 + $0x494] sm:$0xf0]  ;;  %v5072_v52 = vld [vmem:[%s8993_s1 + $0xf4] sm:$0xf] }
 0x2db   :  { %v1581_v16 = vunpack.c.h.b16 %v7420_v20  ;;  %v1932_v41 = vsel %vm1789_vm6, %v1931_v26, %v1930_v49  ;;  %v1935_v8 = vperm.slane %v1580_v54, %v6180_v42  ;;  %v1582_v45 = vunpack.c.l.b16 %v7488_v14  ;;  %v4830_v15 = vld [vmem:[%s8993_s1 + $0x5e8] sm:$0xf0] }
 0x2dc   :  { %3328 = vmatpush.bf16.msrb.mxu0 %v4233_v12  ;;  %3360 = vmatpush.bf16.msrb.mxu2 %v4473_v43  ;;  %v4373_v20 = vor.u32 %v5117_v32, %v4372_v37  ;;  %v9139_v26 = vunpack.c.l.b16 %v7177_v62  ;;  %v4661_v49 = vor.u32 %v5189_v27, %v4660_v17  ;;  %v4209_v12 = vor.u32 %v5072_v52, %v4206_v38  ;;  %v5228_v43 = vld [vmem:[%s8993_s1 + $0x5d4] sm:$0xf]  ;;  %v9142_v4 = vld [vmem:[#allocation58_spill] sm:$0xff] }
 0x2dd   :  { %v1567_v31 = vunpack.c.h.b16 %v7370_v2  ;;  %v1908_v62 = vperm.slane %v1566_v0, %v6202_v60  ;;  %v1907_v37 = vsel %vm1801_vm9, %v1906_v3, %v1905_v25  ;;  %v1568_v17 = vunpack.c.l.b16 %v7511_v46  ;;  %v9141_v38 = vld [vmem:[#allocation59_spill] sm:$0xff]  ;;  %v4348_v2 = vld [vmem:[%s8993_s1 + $0x210] sm:$0xf]  ;;  %v5111_v0 = vld [vmem:[%s8993_s1 + $0x224] sm:$0xf0] }
 0x2de   :  { %v7539_v54 = vperm.slane %v9139_v26, %v6213_v7  ;;  %v7542_v28 = vpop.xlane.xlu2 %894  ;;  %v7553_v32 = vpop.xlane.xlu1 %891  ;;  %3291 = vmatpush.bf16.msra.mxu1 %v4373_v20  ;;  %v4833_v26 = vor.u32 %v5228_v43, %v4830_v15  ;;  %v1934_v27 = vsel %vm1793_vm7, %v1933_v23, %v1932_v41  ;;  %v1937_v52 = vperm.slane %v1581_v16, %v6190_v51  ;;  %v5066_v41 = vld [vmem:[%s8993_s1 + $0xc4] sm:$0xf]  ;;  %v4182_v20 = vld [vmem:[%s8993_s1 + $0xd8] sm:$0xf0] }
 0x2df   :  { %v7560_v47 = vpack.c.bf16 %v9142_v4, %v9141_v38  ;;  %3321 = vmatpush.bf16.msra.mxu3 %v4661_v49  ;;  %v1936_v3 = vsel %vm1797_vm8, %v1935_v8, %v1934_v27  ;;  %v1583_v25 = vunpack.c.h.b16 %v7488_v14  ;;  %v1939_v23 = vperm.slane %v1582_v45, %v6202_v60  ;;  %v5222_v4 = vld [vmem:[%s8993_s1 + $0x5a4] sm:$0xf]  ;;  %v9145_v49 = vld [vmem:[#allocation66_spill] sm:$0xff]  ;;  %v4806_v15 = vld [vmem:[%s8993_s1 + $0x5b8] sm:$0xf0] }
 0x2e0   :  { %9140 = vst [vmem:[#allocation17_spill] sm:$0xff] %v7539_v54  ;;  %v7562_v54 = vpop.xlane.xlu0 %660  ;;  %3329 = vmatpush.bf16.msrb.mxu0 %v4209_v12  ;;  %v4349_v16 = vor.u32 %v5111_v0, %v4348_v2  ;;  %v7583_v8 = vperm.slane %v1537_v11, %v9083_v63  ;;  %v7586_v14 = vperm.slane %v1534_v33, %v6202_v60  ;;  %v9144_v45 = vld [vmem:[#allocation61_spill] sm:$0xff]  ;;  %v1569_v27 = vunpack.c.h.b16 %v7511_v46  ;;  %v9146_v38 = vld [vmem:[#allocation43_spill] sm:$0xff]  ;;  %v9147_v2 = vld [vmem:[#allocation48_spill] sm:$0xff] }
 0x2e1   :  { %v1086_v12 = vpack.c.bf16 %v9145_v49, %v9144_v45  ;;  %v4185_v43 = vor.u32 %v5066_v41, %v4182_v20  ;;  %v7597_v0 = vpack.c.bf16 %v9147_v2, %v9146_v38  ;;  %v4809_v11 = vor.u32 %v5222_v4, %v4806_v15  ;;  %v5105_v46 = vld [vmem:[%s8993_s1 + $0x1f4] sm:$0xf0]  ;;  %v4158_v45 = vld [vmem:[%s8993_s1 + $0xa8] sm:$0xf0] }
 0x2e2   :  { %9143 = vst [vmem:[#allocation5_spill] sm:$0xff] %v7583_v8  ;;  %3292 = vmatpush.bf16.msra.mxu1 %v4349_v16  ;;  %v1909_v33 = vsel %vm1805_vm10, %v1908_v62, %v1907_v37  ;;  %v1912_v8 = vperm.slane %v1568_v17, %v6213_v7  ;;  %v1938_v41 = vsel %vm1801_vm9, %v1937_v52, %v1936_v3  ;;  %v1584_v20 = vunpack.c.l.b16 %v7560_v47  ;;  %v9148_v62 = vld [vmem:[#allocation65_spill] sm:$0xff]  ;;  %v9149_v37 = vld [vmem:[#allocation64_spill] sm:$0xff]  ;;  %v5060_v3 = vld [vmem:[%s8993_s1 + $0x94] sm:$0xf] }
 0x2e3   :  { %3366 = vmatpush.bf16.msrb.mxu3 %v4833_v26  ;;  %v1910_v26 = vperm.slane %v1567_v31, %v6209_v24  ;;  %v4324_v31 = vld [vmem:[%s8993_s1 + $0x1e0] sm:$0xf]  ;;  %v1940_v16 = vsel %vm1805_vm10, %v1939_v23, %v1938_v41  ;;  %v1941_v4 = vperm.slane %v1583_v25, %v6209_v24  ;;  %v7613_v17 = vpack.c.bf16 %v9149_v37, %v9148_v62  ;;  %v5216_v23 = vld [vmem:[%s8993_s1 + $0x574] sm:$0xf]  ;;  %v4782_v2 = vld [vmem:[%s8993_s1 + $0x588] sm:$0xf0] }
 0x2e4   :  { %3330 = vmatpush.bf16.msrb.mxu0 %v4185_v43  ;;  %v4325_v52 = vor.u32 %v5105_v46, %v4324_v31  ;;  %v1588_v49 = vunpack.c.l.b16 %v1086_v12  ;;  %v1589_v25 = vunpack.c.h.b16 %v1086_v12  ;;  %v7626_v43 = vpack.c.bf16 %v7231_v34, %v7141_v5 }
 0x2e5   :  { %v4161_v38 = vor.u32 %v5060_v3, %v4158_v45  ;;  %v1914_v41 = vperm.slane %v1569_v27, %v9083_v63  ;;  %v1570_v31 = vunpack.c.l.b16 %v7597_v0  ;;  %v4785_v12 = vor.u32 %v5216_v23, %v4782_v2  ;;  %v9152_v3 = vld [vmem:[#allocation63_spill] sm:$0xff]  ;;  %v9153_v45 = vld [vmem:[#allocation62_spill] sm:$0xff]  ;;  %v4134_v2 = vld [vmem:[%s8993_s1 + $0x78] sm:$0xf0] }
 0x2e6   :  { %v7628_v15 = vpop.xlane.xlu2 %993  ;;  %v7636_v46 = vpop.xlane.xlu1 %936  ;;  %3293 = vmatpush.bf16.msra.mxu1 %v4325_v52  ;;  %v9151_v5 = vunpack.c.h.b16 %v7331_v35  ;;  %v1585_v37 = vunpack.c.h.b16 %v7560_v47  ;;  %v4300_v27 = vld [vmem:[%s8993_s1 + $0x1b0] sm:$0xf]  ;;  %v5099_v35 = vld [vmem:[%s8993_s1 + $0x1c4] sm:$0xf0]  ;;  %v1943_v52 = vperm.slane %v1584_v20, %v6213_v7  ;;  %v1590_v47 = vunpack.c.l.b16 %v7613_v17 }
 0x2e7   :  { %3367 = vmatpush.bf16.msrb.mxu3 %v4809_v11  ;;  %v1911_v11 = vsel %vm1809_vm11, %v1910_v26, %v1909_v33  ;;  %9150 = vst [vmem:[#allocation8_spill] sm:$0xff] %v7636_v46  ;;  %v1085_v26 = vpack.c.bf16 %v9153_v45, %v9152_v3  ;;  %v4301_v23 = vor.u32 %v5099_v35, %v4300_v27  ;;  %v1571_v45 = vunpack.c.h.b16 %v7597_v0  ;;  %v5093_v0 = vld [vmem:[%s8993_s1 + $0x194] sm:$0xf0] }
 0x2e8   :  { %v7641_v34 = vperm.slane %v9151_v5, %v6209_v24  ;;  %v1913_v62 = vsel %vm1813_vm12, %v1912_v8, %v1911_v11  ;;  %v7647_v33 = vpop.xlane.xlu0 %933  ;;  %3331 = vmatpush.bf16.msrb.mxu0 %v4161_v38  ;;  %v1942_v8 = vsel %vm1809_vm11, %v1941_v4, %v1940_v16  ;;  %v5054_v38 = vld [vmem:[%s8993_s1 + $0x64] sm:$0xf]  ;;  %v1951_v20 = vperm.slane %v1588_v49, %v6118_v39  ;;  %v4758_v5 = vld [vmem:[%s8993_s1 + $0x558] sm:$0xf0] }
 0x2e9   :  { %9154 = vst [vmem:[#allocation80_spill] sm:$0xff] %v7647_v33  ;;  %v5210_v11 = vld [vmem:[%s8993_s1 + $0x544] sm:$0xf]  ;;  %v1952_v16 = vperm.slane %v1589_v25, %v6124_v56  ;;  %v1744_v4 = vunpack.c.l.b16 %v7626_v43  ;;  %v1915_v3 = vsel %vm1817_vm13, %v1914_v41, %v1913_v62  ;;  %v1916_v27 = vperm.slane %v1570_v31, %v9088_v18  ;;  %v9156_v25 = vld [vmem:[#allocation68_spill] sm:$0xff] }
 0x2ea   :  { %3294 = vmatpush.bf16.msra.mxu1 %v4301_v23  ;;  %v4761_v35 = vor.u32 %v5210_v11, %v4758_v5  ;;  %v1945_v46 = vperm.slane %v1585_v37, %v9083_v63  ;;  %v1586_v39 = vunpack.c.l.b16 %v1085_v26  ;;  %v1587_v49 = vunpack.c.h.b16 %v1085_v26  ;;  %v9155_v56 = vld [vmem:[#allocation69_spill] sm:$0xff]  ;;  %v5048_v26 = vld [vmem:[%s8993_s1 + $0x34] sm:$0xf]  ;;  %v4110_v23 = vld [vmem:[%s8993_s1 + $0x48] sm:$0xf0] }
 0x2eb   :  { %3368 = vmatpush.bf16.msrb.mxu3 %v4785_v12  ;;  %v4137_v12 = vor.u32 %v5054_v38, %v4134_v2  ;;  %v7679_v33 = vpack.c.bf16 %v9156_v25, %v9155_v56  ;;  %v4276_v38 = vld [vmem:[%s8993_s1 + $0x180] sm:$0xf]  ;;  %v1944_v41 = vsel %vm1813_vm12, %v1943_v52, %v1942_v8  ;;  %v1591_v31 = vunpack.c.h.b16 %v7613_v17  ;;  %v5132_v2 = vld [vmem:[%s8993_s1 + $0x2d4] sm:$0xf]  ;;  %v4446_v11 = vld [vmem:[%s8993_s1 + $0x2e8] sm:$0xf0] }
 0x2ec   :  { %v1954_v62 = vperm.slane %v1590_v47, %v6127_v50  ;;  %v4277_v37 = vor.u32 %v5093_v0, %v4276_v38  ;;  %v1953_v52 = vsel %vm1769_vm1, %v1952_v16, %v1951_v20  ;;  %v1745_v17 = vunpack.c.h.b16 %v7626_v43  ;;  %v4734_v5 = vld [vmem:[%s8993_s1 + $0x528] sm:$0xf0] }
 0x2ed   :  { %3332 = vmatpush.bf16.msrb.mxu0 %v4137_v12  ;;  %v2253_v50 = vperm.slane %v1744_v4, %v6213_v7  ;;  %v4113_v47 = vor.u32 %v5048_v26, %v4110_v23  ;;  %v5204_v12 = vld [vmem:[%s8993_s1 + $0x514] sm:$0xf]  ;;  %v7714_v20 = vsel %vm1821_vm14, %v1916_v27, %v1915_v3  ;;  %v7717_v43 = vperm.slane %v1571_v45, %v9097_v10  ;;  %v4422_v23 = vld [vmem:[%s8993_s1 + $0x2b8] sm:$0xf0] }
 0x2ee   :  { %v7702_v8 = vpop.xlane.xlu2 %1038  ;;  %v7719_v16 = vpop.xlane.xlu1 %1035  ;;  %3295 = vmatpush.bf16.msra.mxu1 %v4277_v37  ;;  %v4449_v4 = vor.u32 %v5132_v2, %v4446_v11  ;;  %v1946_v56 = vsel %vm1817_vm13, %v1945_v46, %v1944_v41  ;;  %v1947_v25 = vperm.slane %v1586_v39, %v9088_v18  ;;  %v7724_v38 = vperm.slane %v1587_v49, %v9097_v10  ;;  %v5042_v46 = vld [vmem:[%s8993_s1 + $0x4] sm:$0xf]  ;;  %v4086_v39 = vld [vmem:[%s8993_s1 + $0x18] sm:$0xf0]  ;;  %v9157_v41 = vld [vmem:[#allocation67_spill] sm:$0xff] }
 0x2ef   :  { %3369 = vmatpush.bf16.msrb.mxu3 %v4761_v35  ;;  %v4737_v35 = vor.u32 %v5204_v12, %v4734_v5  ;;  %v1592_v0 = vunpack.c.l.b16 %v7679_v33  ;;  %v1956_v3 = vperm.slane %v1591_v31, %v6142_v30  ;;  %v1955_v45 = vsel %vm1773_vm2, %v1954_v62, %v1953_v52  ;;  %v5126_v49 = vld [vmem:[%s8993_s1 + $0x2a4] sm:$0xf]  ;;  %v9158_v30 = vld [vmem:[#allocation72_spill] sm:$0xff] }
 0x2f0   :  { %v997_v26 = vpop.xlane.xlu0 %996  ;;  %v7741_v31 = vpack.c.bf16 %v9158_v30, %v9157_v41  ;;  %v2255_v62 = vperm.slane %v1745_v17, %v9083_v63  ;;  %v4089_v37 = vor.u32 %v5042_v46, %v4086_v39  ;;  %v5198_v2 = vld [vmem:[%s8993_s1 + $0x4e4] sm:$0xf]  ;;  %v4710_v52 = vld [vmem:[%s8993_s1 + $0x4f8] sm:$0xf0]  ;;  %v4425_v12 = vor.u32 %v5126_v49, %v4422_v23  ;;  %v4644_v39 = vld [vmem:[%s8993_s1 + $0x458] sm:$0xf] }
 0x2f1   :  { %3333 = vmatpush.bf16.msrb.mxu0 %v4113_v47  ;;  %v1165_v27 = vpack.c.bf16 %v997_v26, %v7628_v15  ;;  %v2254_v15 = vsel %vm1813_vm12, %v2253_v50, %v6961_v40  ;;  %v4713_v5 = vor.u32 %v5198_v2, %v4710_v52  ;;  %v1593_v40 = vunpack.c.h.b16 %v7679_v33  ;;  %v9160_v33 = vld [vmem:[#allocation70_spill] sm:$0xff] }
 0x2f2   :  { %3340 = vmatpush.bf16.msrb.mxu1 %v4449_v4  ;;  %v1958_v17 = vperm.slane %v1592_v0, %v6150_v48  ;;  %v7759_v50 = vpack.c.bf16 %v7458_v44, %v7473_v6  ;;  %vm2296_vm1 = vcmask 1043459   ;;  %v7763_v4 = vpack.c.bf16 %v7562_v54, %v7449_v53  ;;  %v5120_v48 = vld [vmem:[%s8993_s1 + $0x274] sm:$0xf]  ;;  %v4398_v44 = vld [vmem:[%s8993_s1 + $0x288] sm:$0xf0] }
 0x2f3   :  { %3370 = vmatpush.bf16.msrb.mxu3 %v4737_v35  ;;  %v1746_v47 = vunpack.c.l.b16 %v1165_v27  ;;  %v1747_v11 = vunpack.c.h.b16 %v1165_v27  ;;  %v5192_v6 = vld [vmem:[%s8993_s1 + $0x4b4] sm:$0xf]  ;;  %v1948_v53 = vsel %vm1821_vm14, %v1947_v25, %v1946_v56  ;;  %v2256_v27 = vsel %vm1817_vm13, %v2255_v62, %v2254_v15  ;;  %v5184_v49 = vld [vmem:[%s8993_s1 + $0x46c] sm:$0xf0]  ;;  %v4686_v56 = vld [vmem:[%s8993_s1 + $0x4c8] sm:$0xf0] }
 0x2f4   :  { %v9159_v54 = vld [vmem:[#allocation71_spill] sm:$0xff]  ;;  %v4401_v41 = vor.u32 %v5120_v48, %v4398_v44  ;;  %vm9161_vm2 = vcmask 261312   ;;  %v1594_v30 = vunpack.c.l.b16 %v7741_v31  ;;  %v1960_v2 = vperm.slane %v1593_v40, %v6158_v59  ;;  %v5114_v59 = vld [vmem:[%s8993_s1 + $0x244] sm:$0xf]  ;;  %v4662_v44 = vld [vmem:[%s8993_s1 + $0x498] sm:$0xf0] }
 0x2f5   :  { %3334 = vmatpush.bf16.msrb.mxu0 %v4089_v37  ;;  %v2257_v35 = vperm.slane %v1746_v47, %v9088_v18  ;;  %v2259_v26 = vperm.slane %v1747_v11, %v9097_v10  ;;  %v7779_v0 = vpack.c.bf16 %v9160_v33, %v9159_v54  ;;  %v1957_v25 = vsel %vm9161_vm2, %v1956_v3, %v1955_v45 }
 0x2f6   :  { %3341 = vmatpush.bf16.msrb.mxu1 %v4425_v12  ;;  %v7782_v46 = vpop.xlane.xlu2 %747  ;;  %v709_v62 = vpop.xlane.xlu1 %708  ;;  %v4689_v37 = vor.u32 %v5192_v6, %v4686_v56  ;;  %v1959_v23 = vsel %vm1781_vm4, %v1958_v17, %v1957_v25  ;;  %v7800_v52 = vpack.c.bf16 %v7290_v36, %v7307_v61  ;;  %v1696_v12 = vunpack.c.l.b16 %v7759_v50  ;;  %v4374_v36 = vld [vmem:[%s8993_s1 + $0x258] sm:$0xf0]  ;;  %v5186_v61 = vld [vmem:[%s8993_s1 + $0x484] sm:$0xf] }
 0x2f7   :  { %3371 = vmatpush.bf16.msrb.mxu3 %v4713_v5  ;;  %v2258_v15 = vsel %vm1821_vm14, %v2257_v35, %v2256_v27  ;;  %v1634_v3 = vunpack.c.l.b16 %v7763_v4  ;;  %v4645_v5 = vor.u32 %v5184_v49, %v4644_v39  ;;  %v1596_v40 = vunpack.c.l.b16 %v7779_v0  ;;  %v4620_v35 = vld [vmem:[%s8993_s1 + $0x428] sm:$0xf] }
 0x2f8   :  { %v2260_v47 = vsel %vm1825_vm15, %v2259_v26, %v2258_v15  ;;  %v706_v11 = vpop.xlane.xlu0 %705  ;;  %v1595_v17 = vunpack.c.h.b16 %v7741_v31  ;;  %v5178_v26 = vld [vmem:[%s8993_s1 + $0x43c] sm:$0xf0]  ;;  %v4377_v48 = vor.u32 %v5114_v59, %v4374_v36  ;;  %v7832_v6 = vsel %vm1825_vm15, %v7717_v43, %v7714_v20  ;;  %v5172_v15 = vld [vmem:[%s8993_s1 + $0x40c] sm:$0xf0] }
 0x2f9   :  { %v2303_v45 = vsel %vm2296_vm1, %v2260_v47, %v7468_v58  ;;  %v7836_v31 = vsel %vm1825_vm15, %v7724_v38, %v1948_v53  ;;  %v1962_v54 = vperm.slane %v1594_v30, %v6165_v1  ;;  %v4665_v33 = vor.u32 %v5186_v61, %v4662_v44  ;;  %v5108_v1 = vld [vmem:[%s8993_s1 + $0x214] sm:$0xf]  ;;  %v4350_v53 = vld [vmem:[%s8993_s1 + $0x228] sm:$0xf0]  ;;  %v4596_v30 = vld [vmem:[%s8993_s1 + $0x3f8] sm:$0xf] }
 0x2fa   :  { %3342 = vmatpush.bf16.msrb.mxu1 %v4401_v41  ;;  %v7818_v58 = vpack.c.b16 %v2303_v45, %v2303_v45  ;;  %v1961_v27 = vsel %vm1785_vm5, %v1960_v2, %v1959_v23  ;;  %v1648_v39 = vunpack.c.l.b16 %v7800_v52  ;;  %v1697_v49 = vunpack.c.h.b16 %v7759_v50  ;;  %v9162_v2 = vld [vmem:[#allocation75_spill] sm:$0xff]  ;;  %v9163_v47 = vld [vmem:[#allocation74_spill] sm:$0xff] }
 0x2fb   :  { %3372 = vmatpush.bf16.msrb.mxu3 %v4689_v37  ;;  %v1635_v41 = vunpack.c.h.b16 %v7763_v4  ;;  %v2160_v20 = vperm.slane %v1696_v12, %v6213_v7  ;;  %v2040_v43 = vperm.slane %v1634_v3, %v9088_v18  ;;  %v4621_v38 = vor.u32 %v5178_v26, %v4620_v35 }
 0x2fc   :  { %3309 = vmatmul.bf16.vlgmr.msra.gmra.mxu2 %v7818_v58  ;;  %v1966_v50 = vperm.slane %v1596_v40, %v6180_v42  ;;  %v1964_v4 = vperm.slane %v1595_v17, %v6176_v13  ;;  %v7854_v56 = vpack.c.bf16 %v709_v62, %v706_v11  ;;  %v4353_v37 = vor.u32 %v5108_v1, %v4350_v53  ;;  %v4326_v40 = vld [vmem:[%s8993_s1 + $0x1f8] sm:$0xf0]  ;;  %v5096_v53 = vld [vmem:[%s8993_s1 + $0x1b4] sm:$0xf] }
 0x2fd   :  { %3405 = vmatpush.bf16.msra.mxu2 %v4645_v5  ;;  %v1963_v23 = vsel %vm1789_vm6, %v1962_v54, %v1961_v27  ;;  %v7865_v42 = vpack.c.bf16 %v9163_v47, %v9162_v2  ;;  %v1649_v13 = vunpack.c.h.b16 %v7800_v52  ;;  %v7870_v62 = vpack.c.bf16 %v7542_v28, %v7553_v32  ;;  %v5102_v32 = vld [vmem:[%s8993_s1 + $0x1e4] sm:$0xf] }
 0x2fe   :  { %3343 = vmatpush.bf16.msrb.mxu1 %v4377_v48  ;;  %v853_v25 = vpop.xlane.xlu2 %852  ;;  %v850_v11 = vpop.xlane.xlu1 %849  ;;  %v2067_v12 = vperm.slane %v1648_v39, %v6213_v7  ;;  %v2162_v3 = vperm.slane %v1697_v49, %v9083_v63  ;;  %v2042_v45 = vperm.slane %v1635_v41, %v9097_v10  ;;  %v1597_v36 = vunpack.c.h.b16 %v7779_v0 }
 0x2ff   :  { %3373 = vmatpush.bf16.msrb.mxu3 %v4665_v33  ;;  %v1141_v5 = vpack.c.bf16 %v853_v25, %v850_v11  ;;  %v2161_v61 = vsel %vm1813_vm12, %v2160_v20, %v7111_v57  ;;  %v2041_v52 = vsel %vm1821_vm14, %v2040_v43, %v7166_v19  ;;  %v4597_v28 = vor.u32 %v5172_v15, %v4596_v30  ;;  %v4572_v57 = vld [vmem:[%s8993_s1 + $0x3c8] sm:$0xf]  ;;  %v5166_v19 = vld [vmem:[%s8993_s1 + $0x3dc] sm:$0xf0]  ;;  %v5160_v30 = vld [vmem:[%s8993_s1 + $0x3ac] sm:$0xf0] }
 0x300   :  { %v7875_v59 = vpop.xlane.xlu0 %750  ;;  %v1650_v17 = vunpack.c.l.b16 %v7854_v56  ;;  %v4329_v26 = vor.u32 %v5102_v32, %v4326_v40  ;;  %v1965_v48 = vsel %vm1793_vm7, %v1964_v4, %v1963_v23  ;;  %v1598_v44 = vunpack.c.l.b16 %v7865_v42 }
 0x301   :  { %3406 = vmatpush.bf16.msra.mxu2 %v4621_v38  ;;  %v1698_v0 = vunpack.c.l.b16 %v1141_v5  ;;  %v1699_v35 = vunpack.c.h.b16 %v1141_v5  ;;  %v2069_v54 = vperm.slane %v1649_v13, %v9083_v63  ;;  %v1712_v33 = vunpack.c.l.b16 %v7870_v62 }
 0x302   :  { %3344 = vmatpush.bf16.msrb.mxu1 %v4353_v37  ;;  %v2043_v27 = vsel %vm1825_vm15, %v2042_v45, %v2041_v52  ;;  %v7902_v39 = vpack.c.bf16 %v7702_v8, %v7719_v16  ;;  %v2068_v20 = vsel %vm1813_vm12, %v2067_v12, %v7017_v29  ;;  %v2163_v43 = vsel %vm1817_vm13, %v2162_v3, %v2161_v61  ;;  %v4302_v8 = vld [vmem:[%s8993_s1 + $0x1c8] sm:$0xf0]  ;;  %v5090_v52 = vld [vmem:[%s8993_s1 + $0x184] sm:$0xf] }
 0x303   :  { %v2164_v49 = vperm.slane %v1698_v0, %v9088_v18  ;;  %v2166_v41 = vperm.slane %v1699_v35, %v9097_v10  ;;  %v1651_v38 = vunpack.c.h.b16 %v7854_v56  ;;  %v4573_v1 = vor.u32 %v5166_v19, %v4572_v57  ;;  %v4548_v56 = vld [vmem:[%s8993_s1 + $0x398] sm:$0xf]  ;;  %v9164_v0 = vld [vmem:[#allocation73_spill] sm:$0xff]  ;;  %v9165_v35 = vld [vmem:[#allocation78_spill] sm:$0xff] }
 0x304   :  { %v1713_v16 = vunpack.c.h.b16 %v7870_v62  ;;  %v2071_v4 = vperm.slane %v1650_v17, %v9088_v18  ;;  %v4305_v15 = vor.u32 %v5096_v53, %v4302_v8  ;;  %v1968_v37 = vperm.slane %v1597_v36, %v6190_v51  ;;  %v4524_v51 = vld [vmem:[%s8993_s1 + $0x368] sm:$0xf]  ;;  %v4500_v53 = vld [vmem:[%s8993_s1 + $0x338] sm:$0xf]  ;;  %v5148_v8 = vld [vmem:[%s8993_s1 + $0x34c] sm:$0xf0] }
 0x305   :  { %3407 = vmatpush.bf16.msra.mxu2 %v4597_v28  ;;  %v2165_v29 = vsel %vm1821_vm14, %v2164_v49, %v2163_v43  ;;  %v2191_v23 = vperm.slane %v1712_v33, %v6213_v7  ;;  %v2304_v2 = vsel %vm2292_vm0, %v2043_v27, %v7832_v6  ;;  %v1967_v62 = vsel %vm1797_vm8, %v1966_v50, %v1965_v48  ;;  %v5154_v50 = vld [vmem:[%s8993_s1 + $0x37c] sm:$0xf0]  ;;  %v4278_v28 = vld [vmem:[%s8993_s1 + $0x198] sm:$0xf0] }
 0x306   :  { %3345 = vmatpush.bf16.msrb.mxu1 %v4329_v26  ;;  %v7919_v25 = vpop.xlane.xlu2 %939  ;;  %v2167_v47 = vsel %vm1825_vm15, %v2166_v41, %v2165_v29  ;;  %v901_v13 = vpop.xlane.xlu1 %900  ;;  %v2070_v11 = vsel %vm1817_vm13, %v2069_v54, %v2068_v20  ;;  %v1760_v12 = vunpack.c.l.b16 %v7902_v39  ;;  %v1599_v5 = vunpack.c.h.b16 %v7865_v42 }
 0x307   :  { %v7936_v3 = vsel %vm2294_vm3, %v2167_v47, %v2304_v2  ;;  %v2073_v6 = vperm.slane %v1651_v38, %v9097_v10  ;;  %v4549_v61 = vor.u32 %v5160_v30, %v4548_v56  ;;  %v1970_v42 = vperm.slane %v1598_v44, %v6202_v60 }
 0x308   :  { %v898_v45 = vpop.xlane.xlu0 %897  ;;  %v2193_v32 = vperm.slane %v1713_v16, %v9083_v63  ;;  %v2072_v40 = vsel %vm1821_vm14, %v2071_v4, %v2070_v11  ;;  %v4281_v17 = vor.u32 %v5090_v52, %v4278_v28  ;;  %v7957_v57 = vpack.c.bf16 %v9165_v35, %v9164_v0  ;;  %v9167_v16 = vld [vmem:[#allocation76_spill] sm:$0xff]  ;;  %v9169_v52 = vld [vmem:[#allocation15_spill] sm:$0xff] }
 0x309   :  { %3408 = vmatpush.bf16.msra.mxu2 %v4573_v1  ;;  %v1149_v36 = vpack.c.bf16 %v901_v13, %v898_v45  ;;  %v2192_v19 = vsel %vm1813_vm12, %v2191_v23, %v7147_v21  ;;  %v1847_v54 = vsel %vm1805_vm10, %v7586_v14, %v7172_v9  ;;  %v1761_v44 = vunpack.c.h.b16 %v7902_v39  ;;  %v4260_v21 = vld [vmem:[%s8993_s1 + $0x158] sm:$0xf]  ;;  %v5088_v1 = vld [vmem:[%s8993_s1 + $0x16c] sm:$0xf0]  ;;  %v4236_v45 = vld [vmem:[%s8993_s1 + $0x128] sm:$0xf] }
 0x30a   :  { %3346 = vmatpush.bf16.msrb.mxu1 %v4305_v15  ;;  %v2284_v33 = vperm.slane %v1760_v12, %v6213_v7  ;;  %v4525_v27 = vor.u32 %v5154_v50, %v4524_v51  ;;  %v2074_v49 = vsel %vm1825_vm15, %v2073_v6, %v2072_v40  ;;  %v2293_v9 = vsel %vm2292_vm0, %v7836_v31, %v7114_v22  ;;  %v9166_v31 = vld [vmem:[#allocation77_spill] sm:$0xff]  ;;  %v5142_v50 = vld [vmem:[%s8993_s1 + $0x31c] sm:$0xf0]  ;;  %v5181_v0 = vld [vmem:[%s8993_s1 + $0x45c] sm:$0xf] }
 0x30b   :  { %v1714_v26 = vunpack.c.l.b16 %v1149_v36  ;;  %v1715_v48 = vunpack.c.h.b16 %v1149_v36  ;;  %v1969_v14 = vsel %vm1801_vm9, %v1968_v37, %v1967_v62  ;;  %v1972_v39 = vperm.slane %v1599_v5, %v6209_v24  ;;  %v9171_v40 = vld [vmem:[#allocation8_spill] sm:$0xff]  ;;  %v4646_v35 = vld [vmem:[%s8993_s1 + $0x470] sm:$0xf0] }
 0x30c   :  { %3361 = vmatmul.bf16.vlgmr.msrb.gmra.mxu2 %v7818_v58  ;;  %v2194_v43 = vsel %vm1817_vm13, %v2193_v32, %v2192_v19  ;;  %v1971_v22 = vsel %vm1805_vm10, %v1970_v42, %v1969_v14  ;;  %v7991_v4 = vpack.c.bf16 %v9167_v16, %v9166_v31  ;;  %v1600_v29 = vunpack.c.l.b16 %v7957_v57  ;;  %v9170_v32 = vld [vmem:[#allocation80_spill] sm:$0xff]  ;;  %v5076_v14 = vld [vmem:[%s8993_s1 + $0x10c] sm:$0xf0] }
 0x30d   :  { %v2195_v41 = vperm.slane %v1714_v26, %v9088_v18  ;;  %v2197_v20 = vperm.slane %v1715_v48, %v9097_v10  ;;  %3409 = vmatpush.bf16.msra.mxu2 %v4549_v61  ;;  %v2286_v15 = vperm.slane %v1761_v44, %v9083_v63  ;;  %v2295_v37 = vsel %vm2294_vm3, %v2074_v49, %v2293_v9  ;;  %v4476_v61 = vld [vmem:[%s8993_s1 + $0x308] sm:$0xf]  ;;  %v4212_v9 = vld [vmem:[%s8993_s1 + $0xf8] sm:$0xf] }
 0x30e   :  { %3347 = vmatpush.bf16.msrb.mxu1 %v4281_v17  ;;  %v1045_v38 = vpop.xlane.xlu2 %1044  ;;  %v1042_v30 = vpop.xlane.xlu1 %1041  ;;  %v2285_v13 = vsel %vm1813_vm12, %v2284_v33, %v7288_v55  ;;  %v4261_v11 = vor.u32 %v5088_v1, %v4260_v21  ;;  %v4501_v12 = vor.u32 %v5148_v8, %v4500_v53  ;;  %v8006_v51 = vpack.c.bf16 %v7875_v59, %v7782_v46  ;;  %v5082_v55 = vld [vmem:[%s8993_s1 + $0x13c] sm:$0xf0]  ;;  %v4836_v33 = vld [vmem:[%s8993_s1 + $0x5d8] sm:$0xf]  ;;  %v5175_v8 = vld [vmem:[%s8993_s1 + $0x42c] sm:$0xf] }
 0x30f   :  { %v2196_v56 = vsel %vm1821_vm14, %v2195_v41, %v2194_v43  ;;  %v1173_v2 = vpack.c.bf16 %v1045_v38, %v1042_v30  ;;  %v1849_v46 = vsel %vm1809_vm11, %v7641_v34, %v1847_v54  ;;  %v9168_v59 = vld [vmem:[#allocation16_spill] sm:$0xff]  ;;  %v1601_v42 = vunpack.c.h.b16 %v7957_v57 }
 0x310   :  { %v2198_v23 = vsel %vm1825_vm15, %v2197_v20, %v2196_v56  ;;  %v943_v47 = vpop.xlane.xlu0 %942  ;;  %v8023_v28 = vpack.c.bf16 %v9169_v52, %v9168_v59  ;;  %v1155_v17 = vpack.c.bf16 %v9171_v40, %v9170_v32  ;;  %v1973_v19 = vsel %vm1809_vm11, %v1972_v39, %v1971_v22  ;;  %v4622_v22 = vld [vmem:[%s8993_s1 + $0x440] sm:$0xf0] }
 0x311   :  { %v2297_v62 = vsel %vm2296_vm1, %v2198_v23, %v2295_v37  ;;  %3410 = vmatpush.bf16.msra.mxu2 %v4525_v27  ;;  %v1762_v6 = vunpack.c.l.b16 %v1173_v2  ;;  %v1763_v36 = vunpack.c.h.b16 %v1173_v2  ;;  %v1974_v34 = vperm.slane %v1600_v29, %v6213_v7  ;;  %v5232_v27 = vld [vmem:[%s8993_s1 + $0x5ec] sm:$0xf0]  ;;  %v4812_v2 = vld [vmem:[%s8993_s1 + $0x5a8] sm:$0xf] }
 0x312   :  { %v8008_v5 = vpack.c.b16 %v2297_v62, %v2297_v62  ;;  %v2287_v57 = vsel %vm1817_vm13, %v2286_v15, %v2285_v13  ;;  %v4237_v54 = vor.u32 %v5082_v55, %v4236_v45  ;;  %v4477_v44 = vor.u32 %v5142_v50, %v4476_v61  ;;  %v9172_v13 = vld [vmem:[#allocation17_spill] sm:$0xff]  ;;  %v5169_v50 = vld [vmem:[%s8993_s1 + $0x3fc] sm:$0xf] }
 0x313   :  { %v2288_v26 = vperm.slane %v1762_v6, %v9088_v18  ;;  %v2290_v48 = vperm.slane %v1763_v36, %v9097_v10  ;;  %v1602_v49 = vunpack.c.l.b16 %v7991_v4  ;;  %v1664_v41 = vunpack.c.l.b16 %v8006_v51  ;;  %v4188_v45 = vld [vmem:[%s8993_s1 + $0xc8] sm:$0xf] }
 0x314   :  { %3283 = vmatmul.bf16.vlgmr.msra.gmra.mxu0 %v8008_v5  ;;  %v4649_v21 = vor.u32 %v5181_v0, %v4646_v35  ;;  %v1976_v39 = vperm.slane %v1601_v42, %v9083_v63  ;;  %v1726_v43 = vunpack.c.l.b16 %v1155_v17  ;;  %v8058_v1 = vpack.c.bf16 %v943_v47, %v7919_v25  ;;  %v5226_v47 = vld [vmem:[%s8993_s1 + $0x5bc] sm:$0xf0]  ;;  %v4788_v0 = vld [vmem:[%s8993_s1 + $0x578] sm:$0xf]  ;;  %v9173_v35 = vld [vmem:[#allocation18_spill] sm:$0xff] }
 0x315   :  { %3379 = vmatpush.bf16.msra.mxu0 %v4261_v11  ;;  %3411 = vmatpush.bf16.msra.mxu2 %v4501_v12  ;;  %v2289_v20 = vsel %vm1821_vm14, %v2288_v26, %v2287_v57  ;;  %v1975_v31 = vsel %vm1813_vm12, %v1974_v34, %v1973_v19  ;;  %v1727_v16 = vunpack.c.h.b16 %v1155_v17  ;;  %v4837_v30 = vor.u32 %v5232_v27, %v4836_v33  ;;  %v4164_v57 = vld [vmem:[%s8993_s1 + $0x98] sm:$0xf] }
 0x316   :  { %v2291_v38 = vsel %vm1825_vm15, %v2290_v48, %v2289_v20  ;;  %v757_v53 = vpop.xlane.xlu1 %756  ;;  %v1665_v25 = vunpack.c.h.b16 %v8006_v51  ;;  %v4213_v23 = vor.u32 %v5076_v14, %v4212_v9  ;;  %v1538_v62 = vunpack.c.l.b16 %v8023_v28  ;;  %v5070_v51 = vld [vmem:[%s8993_s1 + $0xdc] sm:$0xf0]  ;;  %v946_v26 = vpop.xlane.xlu2 %945  ;;  %v4574_v9 = vld [vmem:[%s8993_s1 + $0x3e0] sm:$0xf0] }
 0x317   :  { %v2306_v29 = vsel %vm2296_vm1, %v2291_v38, %v7936_v3  ;;  %v1851_v3 = vsel %vm1813_vm12, %v9172_v13, %v1849_v46  ;;  %v2098_v11 = vperm.slane %v1664_v41, %v6213_v7  ;;  %v4625_v12 = vor.u32 %v5175_v8, %v4622_v22  ;;  %v4598_v46 = vld [vmem:[%s8993_s1 + $0x410] sm:$0xf0] }
 0x318   :  { %v754_v56 = vpop.xlane.xlu0 %753  ;;  %v8070_v15 = vpack.c.b16 %v2306_v29, %v2306_v29  ;;  %v1539_v6 = vunpack.c.h.b16 %v8023_v28  ;;  %v2218_v36 = vperm.slane %v1726_v43, %v6202_v60  ;;  %v1728_v55 = vunpack.c.l.b16 %v8058_v1 }
 0x319   :  { %3380 = vmatpush.bf16.msra.mxu0 %v4237_v54  ;;  %3412 = vmatpush.bf16.msra.mxu2 %v4477_v44  ;;  %v1125_v37 = vpack.c.bf16 %v757_v53, %v754_v56  ;;  %v1603_v59 = vunpack.c.h.b16 %v7991_v4  ;;  %v1978_v52 = vperm.slane %v1602_v49, %v9088_v18  ;;  %v1977_v28 = vsel %vm1817_vm13, %v1976_v39, %v1975_v31  ;;  %v5220_v4 = vld [vmem:[%s8993_s1 + $0x58c] sm:$0xf0]  ;;  %v9174_v44 = vld [vmem:[#allocation5_spill] sm:$0xff]  ;;  %v9175_v49 = vld [vmem:[#allocation79_spill] sm:$0xff] }
 0x31a   :  { %3322 = vmatmul.bf16.vlgmr.msra.gmra.mxu3 %v8070_v15  ;;  %v4813_v60 = vor.u32 %v5226_v47, %v4812_v2  ;;  %v2220_v42 = vperm.slane %v1727_v16, %v6209_v24  ;;  %v2100_v32 = vperm.slane %v1665_v25, %v9083_v63  ;;  %v4189_v17 = vor.u32 %v5070_v51, %v4188_v45  ;;  %v5064_v54 = vld [vmem:[%s8993_s1 + $0xac] sm:$0xf0]  ;;  %v4764_v31 = vld [vmem:[%s8993_s1 + $0x548] sm:$0xf]  ;;  %v5214_v16 = vld [vmem:[%s8993_s1 + $0x55c] sm:$0xf0] }
 0x31b   :  { %v1666_v61 = vunpack.c.l.b16 %v1125_v37  ;;  %3418 = vmatpush.bf16.msra.mxu3 %v4837_v30  ;;  %v1667_v40 = vunpack.c.h.b16 %v1125_v37  ;;  %v2099_v19 = vsel %vm1813_vm12, %v2098_v11, %v9173_v35  ;;  %v1729_v34 = vunpack.c.h.b16 %v8058_v1  ;;  %v4140_v37 = vld [vmem:[%s8993_s1 + $0x68] sm:$0xf] }
 0x31c   :  { %3413 = vmatmul.bf16.vlgmr.msra.gmra.mxu2 %v7818_v58  ;;  %v4601_v48 = vor.u32 %v5169_v50, %v4598_v46  ;;  %v1853_v33 = vsel %vm1817_vm13, %v9174_v44, %v1851_v3  ;;  %v1854_v27 = vperm.slane %v1538_v62, %v9088_v18  ;;  %v2219_v41 = vsel %vm1805_vm10, %v2218_v36, %v9175_v49  ;;  %v4550_v62 = vld [vmem:[%s8993_s1 + $0x3b0] sm:$0xf0]  ;;  %v5208_v50 = vld [vmem:[%s8993_s1 + $0x52c] sm:$0xf0]  ;;  %v4092_v35 = vld [vmem:[%s8993_s1 + $0x8] sm:$0xf] }
 0x31d   :  { %3457 = vmatpush.bf16.msrb.mxu2 %v4649_v21  ;;  %3381 = vmatpush.bf16.msra.mxu0 %v4213_v23  ;;  %v2102_v24 = vperm.slane %v1666_v61, %v9088_v18  ;;  %v2222_v20 = vperm.slane %v1728_v55, %v6213_v7  ;;  %v5163_v21 = vld [vmem:[%s8993_s1 + $0x3cc] sm:$0xf]  ;;  %v1856_v14 = vperm.slane %v1539_v6, %v9097_v10  ;;  %v5058_v23 = vld [vmem:[%s8993_s1 + $0x7c] sm:$0xf0]  ;;  %v4116_v55 = vld [vmem:[%s8993_s1 + $0x38] sm:$0xf] }
 0x31e   :  { %v1980_v39 = vperm.slane %v1603_v59, %v9097_v10  ;;  %v1979_v43 = vsel %vm1821_vm14, %v1978_v52, %v1977_v28  ;;  %v4789_v1 = vor.u32 %v5220_v4, %v4788_v0  ;;  %v2101_v53 = vsel %vm1817_vm13, %v2100_v32, %v2099_v19  ;;  %v4740_v61 = vld [vmem:[%s8993_s1 + $0x518] sm:$0xf]  ;;  %v5052_v59 = vld [vmem:[%s8993_s1 + $0x4c] sm:$0xf0]  ;;  %v5151_v32 = vld [vmem:[%s8993_s1 + $0x36c] sm:$0xf] }
 0x31f   :  { %3419 = vmatpush.bf16.msra.mxu3 %v4813_v60  ;;  %v2104_v7 = vperm.slane %v1667_v40, %v9097_v10  ;;  %v4165_v22 = vor.u32 %v5064_v54, %v4164_v57  ;;  %v2221_v29 = vsel %vm1809_vm11, %v2220_v42, %v2219_v41  ;;  %v2224_v56 = vperm.slane %v1729_v34, %v9083_v63  ;;  %v5157_v63 = vld [vmem:[%s8993_s1 + $0x39c] sm:$0xf]  ;;  %v4452_v52 = vld [vmem:[%s8993_s1 + $0x2d8] sm:$0xf]  ;;  %v5136_v28 = vld [vmem:[%s8993_s1 + $0x2ec] sm:$0xf0] }
 0x320   :  { %v949_v38 = vpop.xlane.xlu0 %948  ;;  %v2103_v30 = vsel %vm1821_vm14, %v2102_v24, %v2101_v53  ;;  %v4577_v25 = vor.u32 %v5163_v21, %v4574_v9  ;;  %v1855_v2 = vsel %vm1821_vm14, %v1854_v27, %v1853_v33  ;;  %v2223_v47 = vsel %vm1813_vm12, %v2222_v20, %v2221_v29  ;;  %v4526_v40 = vld [vmem:[%s8993_s1 + $0x380] sm:$0xf0]  ;;  %v5202_v57 = vld [vmem:[%s8993_s1 + $0x4fc] sm:$0xf0]  ;;  %v4428_v33 = vld [vmem:[%s8993_s1 + $0x2a8] sm:$0xf] }
 0x321   :  { %3458 = vmatpush.bf16.msrb.mxu2 %v4625_v12  ;;  %3382 = vmatpush.bf16.msra.mxu0 %v4189_v17  ;;  %v1157_v8 = vpack.c.bf16 %v949_v38, %v946_v26  ;;  %v1981_v11 = vsel %vm1825_vm15, %v1980_v39, %v1979_v43  ;;  %v4765_v12 = vor.u32 %v5214_v16, %v4764_v31  ;;  %v5046_v26 = vld [vmem:[%s8993_s1 + $0x1c] sm:$0xf0]  ;;  %v5085_v49 = vld [vmem:[%s8993_s1 + $0x15c] sm:$0xf]  ;;  %v4262_v41 = vld [vmem:[%s8993_s1 + $0x170] sm:$0xf0] }
 0x322   :  { %v2105_v45 = vsel %vm1825_vm15, %v2104_v7, %v2103_v30  ;;  %v4141_v36 = vor.u32 %v5058_v23, %v4140_v37  ;;  %v1857_v46 = vsel %vm1825_vm15, %v1856_v14, %v1855_v2  ;;  %v4741_v4 = vor.u32 %v5208_v50, %v4740_v61  ;;  %v5130_v27 = vld [vmem:[%s8993_s1 + $0x2bc] sm:$0xf0]  ;;  %v5145_v20 = vld [vmem:[%s8993_s1 + $0x33c] sm:$0xf]  ;;  %v4502_v21 = vld [vmem:[%s8993_s1 + $0x350] sm:$0xf0] }
 0x323   :  { %v1730_v13 = vunpack.c.l.b16 %v1157_v8  ;;  %v1731_v3 = vunpack.c.h.b16 %v1157_v8  ;;  %3420 = vmatpush.bf16.msra.mxu3 %v4789_v1  ;;  %v2298_v60 = vsel %vm2292_vm0, %v1981_v11, %v1857_v46  ;;  %v4117_v34 = vor.u32 %v5052_v59, %v4116_v55  ;;  %v4692_v43 = vld [vmem:[%s8993_s1 + $0x4b8] sm:$0xf]  ;;  %v5196_v38 = vld [vmem:[%s8993_s1 + $0x4cc] sm:$0xf0]  ;;  %v4238_v31 = vld [vmem:[%s8993_s1 + $0x140] sm:$0xf0] }
 0x324   :  { %3335 = vmatmul.bf16.vlgmr.msrb.gmra.mxu0 %v8008_v5  ;;  %v2299_v17 = vsel %vm2294_vm3, %v2105_v45, %v2298_v60  ;;  %v4453_v24 = vor.u32 %v5136_v28, %v4452_v52  ;;  %v4529_v44 = vor.u32 %v5151_v32, %v4526_v40  ;;  %v4093_v14 = vor.u32 %v5046_v26, %v4092_v35  ;;  %v4404_v7 = vld [vmem:[%s8993_s1 + $0x278] sm:$0xf]  ;;  %v5124_v8 = vld [vmem:[%s8993_s1 + $0x28c] sm:$0xf0]  ;;  %v5139_v16 = vld [vmem:[%s8993_s1 + $0x30c] sm:$0xf] }
 0x325   :  { %3459 = vmatpush.bf16.msrb.mxu2 %v4601_v48  ;;  %v2226_v51 = vperm.slane %v1730_v13, %v9088_v18  ;;  %v2228_v6 = vperm.slane %v1731_v3, %v9097_v10  ;;  %3383 = vmatpush.bf16.msra.mxu0 %v4165_v22  ;;  %v2225_v18 = vsel %vm1817_vm13, %v2224_v56, %v2223_v47  ;;  %v4716_v48 = vld [vmem:[%s8993_s1 + $0x4e8] sm:$0xf]  ;;  %v5079_v22 = vld [vmem:[%s8993_s1 + $0x12c] sm:$0xf]  ;;  %v4478_v29 = vld [vmem:[%s8993_s1 + $0x320] sm:$0xf0] }
 0x326   :  { %v4553_v10 = vor.u32 %v5157_v63, %v4550_v62  ;;  %v4717_v9 = vor.u32 %v5202_v57, %v4716_v48  ;;  %v4429_v39 = vor.u32 %v5130_v27, %v4428_v33  ;;  %v4265_v1 = vor.u32 %v5085_v49, %v4262_v41  ;;  %v4652_v30 = vld [vmem:[%s8993_s1 + $0x460] sm:$0xf]  ;;  %v4668_v23 = vld [vmem:[%s8993_s1 + $0x488] sm:$0xf]  ;;  %v5073_v62 = vld [vmem:[%s8993_s1 + $0xfc] sm:$0xf] }
 0x327   :  { %v2227_v42 = vsel %vm1821_vm14, %v2226_v51, %v2225_v18  ;;  %3421 = vmatpush.bf16.msra.mxu3 %v4765_v12  ;;  %v4505_v53 = vor.u32 %v5145_v20, %v4502_v21  ;;  %v4693_v56 = vor.u32 %v5196_v38, %v4692_v43  ;;  %v4405_v37 = vor.u32 %v5124_v8, %v4404_v7  ;;  %v5190_v2 = vld [vmem:[%s8993_s1 + $0x49c] sm:$0xf0]  ;;  %v4380_v3 = vld [vmem:[%s8993_s1 + $0x248] sm:$0xf]  ;;  %v4214_v12 = vld [vmem:[%s8993_s1 + $0x110] sm:$0xf0] }
 0x328   :  { %v2229_v0 = vsel %vm1825_vm15, %v2228_v6, %v2227_v42  ;;  %v4241_v47 = vor.u32 %v5079_v22, %v4238_v31  ;;  %v4481_v13 = vor.u32 %v5139_v16, %v4478_v29  ;;  %v5118_v63 = vld [vmem:[%s8993_s1 + $0x25c] sm:$0xf0]  ;;  %v5229_v45 = vld [vmem:[%s8993_s1 + $0x5dc] sm:$0xf]  ;;  %v4838_v51 = vld [vmem:[%s8993_s1 + $0x5f0] sm:$0xf0]  ;;  %v4669_v6 = vor.u32 %v5190_v2, %v4668_v23 }
 0x329   :  { %3460 = vmatpush.bf16.msrb.mxu2 %v4577_v25  ;;  %v2300_v19 = vsel %vm2296_vm1, %v2229_v0, %v2299_v17  ;;  %3384 = vmatpush.bf16.msra.mxu0 %v4141_v36  ;;  %v5185_v25 = vld [vmem:[%s8993_s1 + $0x474] sm:$0xf0]  ;;  %v4628_v36 = vld [vmem:[%s8993_s1 + $0x430] sm:$0xf]  ;;  %v5179_v55 = vld [vmem:[%s8993_s1 + $0x444] sm:$0xf0]  ;;  %v4381_v61 = vor.u32 %v5118_v63, %v4380_v3  ;;  %v4217_v50 = vor.u32 %v5073_v62, %v4214_v12 }
 0x32a   :  { %v8208_v54 = vpack.c.b16 %v2300_v19, %v2300_v19  ;;  %3374 = vmatmul.bf16.vlgmr.msrb.gmra.mxu3 %v8070_v15  ;;  %v4653_v11 = vor.u32 %v5185_v25, %v4652_v30  ;;  %v4841_v46 = vor.u32 %v5229_v45, %v4838_v51  ;;  %v4356_v18 = vld [vmem:[%s8993_s1 + $0x218] sm:$0xf]  ;;  %v5067_v59 = vld [vmem:[%s8993_s1 + $0xcc] sm:$0xf]  ;;  %v4629_v52 = vor.u32 %v5179_v55, %v4628_v36  ;;  %v4190_v28 = vld [vmem:[%s8993_s1 + $0xe0] sm:$0xf0] }
 0x32b   :  { %3422 = vmatpush.bf16.msra.mxu3 %v4741_v4  ;;  %v5223_v60 = vld [vmem:[%s8993_s1 + $0x5ac] sm:$0xf]  ;;  %v4814_v42 = vld [vmem:[%s8993_s1 + $0x5c0] sm:$0xf0]  ;;  %v4604_v32 = vld [vmem:[%s8993_s1 + $0x400] sm:$0xf]  ;;  %v4193_v0 = vor.u32 %v5067_v59, %v4190_v28 }
 0x32c   :  { %3296 = vmatmul.bf16.vlgmr.msra.gmra.mxu1 %v8208_v54  ;;  %v5173_v40 = vld [vmem:[%s8993_s1 + $0x414] sm:$0xf0]  ;;  %v4817_v4 = vor.u32 %v5223_v60, %v4814_v42  ;;  %v4332_v35 = vld [vmem:[%s8993_s1 + $0x1e8] sm:$0xf]  ;;  %v5106_v19 = vld [vmem:[%s8993_s1 + $0x1fc] sm:$0xf0] }
 0x32d   :  { %3461 = vmatpush.bf16.msrb.mxu2 %v4553_v10  ;;  %3385 = vmatpush.bf16.msra.mxu0 %v4117_v34  ;;  %v5112_v10 = vld [vmem:[%s8993_s1 + $0x22c] sm:$0xf0]  ;;  %v5061_v34 = vld [vmem:[%s8993_s1 + $0x9c] sm:$0xf]  ;;  %v4166_v26 = vld [vmem:[%s8993_s1 + $0xb0] sm:$0xf0]  ;;  %v4333_v27 = vor.u32 %v5106_v19, %v4332_v35 }
 0x32e   :  { %3392 = vmatpush.bf16.msra.mxu1 %v4453_v24  ;;  %v4357_v17 = vor.u32 %v5112_v10, %v4356_v18  ;;  %v4605_v24 = vor.u32 %v5173_v40, %v4604_v32  ;;  %v5217_v48 = vld [vmem:[%s8993_s1 + $0x57c] sm:$0xf]  ;;  %v4790_v57 = vld [vmem:[%s8993_s1 + $0x590] sm:$0xf0]  ;;  %v5167_v33 = vld [vmem:[%s8993_s1 + $0x3e4] sm:$0xf0]  ;;  %v4169_v49 = vor.u32 %v5061_v34, %v4166_v26 }
 0x32f   :  { %3423 = vmatpush.bf16.msra.mxu3 %v4717_v9  ;;  %v4793_v41 = vor.u32 %v5217_v48, %v4790_v57  ;;  %v4308_v20 = vld [vmem:[%s8993_s1 + $0x1b8] sm:$0xf]  ;;  %v5100_v21 = vld [vmem:[%s8993_s1 + $0x1cc] sm:$0xf0]  ;;  %v5055_v9 = vld [vmem:[%s8993_s1 + $0x6c] sm:$0xf] }
 0x330   :  { %v5211_v43 = vld [vmem:[%s8993_s1 + $0x54c] sm:$0xf]  ;;  %v4766_v38 = vld [vmem:[%s8993_s1 + $0x560] sm:$0xf0]  ;;  %v4309_v7 = vor.u32 %v5100_v21, %v4308_v20  ;;  %v4284_v8 = vld [vmem:[%s8993_s1 + $0x188] sm:$0xf] }
 0x331   :  { %3462 = vmatpush.bf16.msrb.mxu2 %v4529_v44  ;;  %3386 = vmatpush.bf16.msra.mxu0 %v4093_v14  ;;  %v4580_v44 = vld [vmem:[%s8993_s1 + $0x3d0] sm:$0xf]  ;;  %v4769_v31 = vor.u32 %v5211_v43, %v4766_v38  ;;  %v5094_v16 = vld [vmem:[%s8993_s1 + $0x19c] sm:$0xf0]  ;;  %v5049_v29 = vld [vmem:[%s8993_s1 + $0x3c] sm:$0xf] }
 0x332   :  { %3393 = vmatpush.bf16.msra.mxu1 %v4429_v39  ;;  %v4581_v14 = vor.u32 %v5167_v33, %v4580_v44  ;;  %v4142_v39 = vld [vmem:[%s8993_s1 + $0x80] sm:$0xf0]  ;;  %v5133_v25 = vld [vmem:[%s8993_s1 + $0x2dc] sm:$0xf]  ;;  %v4742_v2 = vld [vmem:[%s8993_s1 + $0x530] sm:$0xf0]  ;;  %v4285_v3 = vor.u32 %v5094_v16, %v4284_v8 }
 0x333   :  { %3424 = vmatpush.bf16.msra.mxu3 %v4693_v56  ;;  %v4145_v22 = vor.u32 %v5055_v9, %v4142_v39  ;;  %v4118_v56 = vld [vmem:[%s8993_s1 + $0x50] sm:$0xf0]  ;;  %v5205_v23 = vld [vmem:[%s8993_s1 + $0x51c] sm:$0xf]  ;;  %v4094_v12 = vld [vmem:[%s8993_s1 + $0x20] sm:$0xf0] }
 0x334   :  { %3387 = vmatmul.bf16.vlgmr.msra.gmra.mxu0 %v8008_v5  ;;  %v4121_v63 = vor.u32 %v5049_v29, %v4118_v56  ;;  %v4745_v45 = vor.u32 %v5205_v23, %v4742_v2  ;;  %v4430_v36 = vld [vmem:[%s8993_s1 + $0x2c0] sm:$0xf0]  ;;  %v5199_v55 = vld [vmem:[%s8993_s1 + $0x4ec] sm:$0xf]  ;;  %v4508_v18 = vld [vmem:[%s8993_s1 + $0x340] sm:$0xf] }
 0x335   :  { %3431 = vmatpush.bf16.msrb.mxu0 %v4265_v1  ;;  %3463 = vmatpush.bf16.msrb.mxu2 %v4505_v53  ;;  %v4556_v1 = vld [vmem:[%s8993_s1 + $0x3a0] sm:$0xf]  ;;  %v5161_v53 = vld [vmem:[%s8993_s1 + $0x3b4] sm:$0xf0]  ;;  %v5121_v42 = vld [vmem:[%s8993_s1 + $0x27c] sm:$0xf] }
 0x336   :  { %3394 = vmatpush.bf16.msra.mxu1 %v4405_v37  ;;  %v4557_v30 = vor.u32 %v5161_v53, %v4556_v1  ;;  %v4454_v37 = vld [vmem:[%s8993_s1 + $0x2f0] sm:$0xf0]  ;;  %v5149_v10 = vld [vmem:[%s8993_s1 + $0x354] sm:$0xf0]  ;;  %v5193_v40 = vld [vmem:[%s8993_s1 + $0x4bc] sm:$0xf] }
 0x337   :  { %3425 = vmatpush.bf16.msra.mxu3 %v4669_v6  ;;  %v4457_v62 = vor.u32 %v5133_v25, %v4454_v37  ;;  %v5127_v6 = vld [vmem:[%s8993_s1 + $0x2ac] sm:$0xf]  ;;  %v4406_v32 = vld [vmem:[%s8993_s1 + $0x290] sm:$0xf0]  ;;  %v5083_v35 = vld [vmem:[%s8993_s1 + $0x144] sm:$0xf0] }
 0x338   :  { %v4484_v19 = vld [vmem:[%s8993_s1 + $0x310] sm:$0xf]  ;;  %v5143_v34 = vld [vmem:[%s8993_s1 + $0x324] sm:$0xf0]  ;;  %v5182_v26 = vld [vmem:[%s8993_s1 + $0x464] sm:$0xf] }
 0x339   :  { %3432 = vmatpush.bf16.msrb.mxu0 %v4241_v47  ;;  %3464 = vmatpush.bf16.msrb.mxu2 %v4481_v13  ;;  %v4532_v47 = vld [vmem:[%s8993_s1 + $0x370] sm:$0xf]  ;;  %v5155_v13 = vld [vmem:[%s8993_s1 + $0x384] sm:$0xf0]  ;;  %v4654_v48 = vld [vmem:[%s8993_s1 + $0x478] sm:$0xf0] }
 0x33a   :  { %3395 = vmatpush.bf16.msra.mxu1 %v4381_v61  ;;  %3426 = vmatmul.bf16.vlgmr.msra.gmra.mxu3 %v8070_v15  ;;  %v4533_v51 = vor.u32 %v5155_v13, %v4532_v47  ;;  %v4718_v61 = vld [vmem:[%s8993_s1 + $0x500] sm:$0xf0]  ;;  %v5115_v33 = vld [vmem:[%s8993_s1 + $0x24c] sm:$0xf]  ;;  %v4220_v21 = vld [vmem:[%s8993_s1 + $0x100] sm:$0xf]  ;;  %v4657_v9 = vor.u32 %v5182_v26, %v4654_v48 }
 0x33b   :  { %3470 = vmatpush.bf16.msrb.mxu3 %v4841_v46  ;;  %v5089_v46 = vld [vmem:[%s8993_s1 + $0x174] sm:$0xf0]  ;;  %v4721_v28 = vor.u32 %v5199_v55, %v4718_v61  ;;  %v4670_v20 = vld [vmem:[%s8993_s1 + $0x4a0] sm:$0xf0]  ;;  %v4844_v39 = vld [vmem:[%s8993_s1 + $0x5e0] sm:$0xf] }
 0x33c   :  { %3465 = vmatmul.bf16.vlgmr.msrb.gmra.mxu2 %v7818_v58  ;;  %3348 = vmatmul.bf16.vlgmr.msrb.gmra.mxu1 %v8208_v54  ;;  %v5233_v43 = vld [vmem:[%s8993_s1 + $0x5f4] sm:$0xf0]  ;;  %v5176_v1 = vld [vmem:[%s8993_s1 + $0x434] sm:$0xf]  ;;  %v4630_v53 = vld [vmem:[%s8993_s1 + $0x448] sm:$0xf0] }
 0x33d   :  { %3509 = vmatpush.bf16.msra.mxu2 %v4653_v11  ;;  %3433 = vmatpush.bf16.msrb.mxu0 %v4217_v50  ;;  %v5043_v11 = vld [vmem:[%s8993_s1 + $0xc] sm:$0xf]  ;;  %v4268_v50 = vld [vmem:[%s8993_s1 + $0x160] sm:$0xf]  ;;  %v5109_v8 = vld [vmem:[%s8993_s1 + $0x21c] sm:$0xf]  ;;  %v4845_v16 = vor.u32 %v5233_v43, %v4844_v39  ;;  %v4633_v56 = vor.u32 %v5176_v1, %v4630_v53 }
 0x33e   :  { %3396 = vmatpush.bf16.msra.mxu1 %v4357_v17  ;;  %v4097_v59 = vor.u32 %v5043_v11, %v4094_v12  ;;  %v4269_v60 = vor.u32 %v5089_v46, %v4268_v50  ;;  %v4509_v17 = vor.u32 %v5149_v10, %v4508_v18  ;;  %v4196_v29 = vld [vmem:[%s8993_s1 + $0xd0] sm:$0xf]  ;;  %v5227_v37 = vld [vmem:[%s8993_s1 + $0x5c4] sm:$0xf0]  ;;  %v5170_v2 = vld [vmem:[%s8993_s1 + $0x404] sm:$0xf] }
 0x33f   :  { %3471 = vmatpush.bf16.msrb.mxu3 %v4817_v4  ;;  %v4244_v4 = vld [vmem:[%s8993_s1 + $0x130] sm:$0xf]  ;;  %v4606_v47 = vld [vmem:[%s8993_s1 + $0x418] sm:$0xf0]  ;;  %v5103_v13 = vld [vmem:[%s8993_s1 + $0x1ec] sm:$0xf] }
 0x340   :  { %v4245_v44 = vor.u32 %v5083_v35, %v4244_v4  ;;  %v4820_v25 = vld [vmem:[%s8993_s1 + $0x5b0] sm:$0xf]  ;;  %v4172_v11 = vld [vmem:[%s8993_s1 + $0xa0] sm:$0xf]  ;;  %v4609_v12 = vor.u32 %v5170_v2, %v4606_v47  ;;  %v5164_v55 = vld [vmem:[%s8993_s1 + $0x3d4] sm:$0xf] }
 0x341   :  { %3510 = vmatpush.bf16.msra.mxu2 %v4629_v52  ;;  %3434 = vmatpush.bf16.msrb.mxu0 %v4193_v0  ;;  %v4433_v52 = vor.u32 %v5127_v6, %v4430_v36  ;;  %v4694_v0 = vld [vmem:[%s8993_s1 + $0x4d0] sm:$0xf0]  ;;  %v5221_v6 = vld [vmem:[%s8993_s1 + $0x594] sm:$0xf0]  ;;  %v4582_v61 = vld [vmem:[%s8993_s1 + $0x3e8] sm:$0xf0] }
 0x342   :  { %3397 = vmatpush.bf16.msra.mxu1 %v4333_v27  ;;  %v4697_v57 = vor.u32 %v5193_v40, %v4694_v0  ;;  %v4382_v27 = vld [vmem:[%s8993_s1 + $0x260] sm:$0xf0]  ;;  %v5097_v50 = vld [vmem:[%s8993_s1 + $0x1bc] sm:$0xf]  ;;  %v4310_v46 = vld [vmem:[%s8993_s1 + $0x1d0] sm:$0xf0] }
 0x343   :  { %3472 = vmatpush.bf16.msrb.mxu3 %v4793_v41  ;;  %v5187_v41 = vld [vmem:[%s8993_s1 + $0x48c] sm:$0xf]  ;;  %v4385_v38 = vor.u32 %v5115_v33, %v4382_v27  ;;  %v5158_v40 = vld [vmem:[%s8993_s1 + $0x3a4] sm:$0xf]  ;;  %v5137_v26 = vld [vmem:[%s8993_s1 + $0x2f4] sm:$0xf0] }
 0x344   :  { %v5091_v0 = vld [vmem:[%s8993_s1 + $0x18c] sm:$0xf]  ;;  %v4286_v4 = vld [vmem:[%s8993_s1 + $0x1a0] sm:$0xf0]  ;;  %v5209_v33 = vld [vmem:[%s8993_s1 + $0x534] sm:$0xf0] }
 0x345   :  { %3511 = vmatpush.bf16.msra.mxu2 %v4605_v24  ;;  %3435 = vmatpush.bf16.msrb.mxu0 %v4169_v49  ;;  %v4409_v24 = vor.u32 %v5121_v42, %v4406_v32  ;;  %v4485_v49 = vor.u32 %v5143_v34, %v4484_v19  ;;  %v5215_v42 = vld [vmem:[%s8993_s1 + $0x564] sm:$0xf0]  ;;  %v4313_v32 = vor.u32 %v5097_v50, %v4310_v46  ;;  %v4124_v34 = vld [vmem:[%s8993_s1 + $0x40] sm:$0xf]  ;;  %v4436_v43 = vld [vmem:[%s8993_s1 + $0x2b0] sm:$0xf] }
 0x346   :  { %3398 = vmatpush.bf16.msra.mxu1 %v4309_v7  ;;  %v4673_v7 = vor.u32 %v5187_v41, %v4670_v20  ;;  %v4289_v27 = vor.u32 %v5091_v0, %v4286_v4  ;;  %v4534_v41 = vld [vmem:[%s8993_s1 + $0x388] sm:$0xf0]  ;;  %v5047_v39 = vld [vmem:[%s8993_s1 + $0x24] sm:$0xf0]  ;;  %v4724_v53 = vld [vmem:[%s8993_s1 + $0x4f0] sm:$0xf] }
 0x347   :  { %3473 = vmatpush.bf16.msrb.mxu3 %v4769_v31  ;;  %v4700_v47 = vld [vmem:[%s8993_s1 + $0x4c0] sm:$0xf]  ;;  %v5191_v50 = vld [vmem:[%s8993_s1 + $0x4a4] sm:$0xf0]  ;;  %v5074_v46 = vld [vmem:[%s8993_s1 + $0x104] sm:$0xf] }
 0x348   :  { %v4198_v0 = vld [vmem:[%s8993_s1 + $0xe8] sm:$0xf0]  ;;  %v5224_v4 = vld [vmem:[%s8993_s1 + $0x5b4] sm:$0xf] }
 0x349   :  { %3512 = vmatpush.bf16.msra.mxu2 %v4581_v14  ;;  %3436 = vmatpush.bf16.msrb.mxu0 %v4145_v22  ;;  %v5077_v14 = vld [vmem:[%s8993_s1 + $0x114] sm:$0xf0]  ;;  %v4358_v22 = vld [vmem:[%s8993_s1 + $0x230] sm:$0xf0] }
 0x34a   :  { %3399 = vmatpush.bf16.msra.mxu1 %v4285_v3  ;;  %v4221_v31 = vor.u32 %v5077_v14, %v4220_v21  ;;  %v4361_v23 = vor.u32 %v5109_v8, %v4358_v22  ;;  %v4334_v3 = vld [vmem:[%s8993_s1 + $0x200] sm:$0xf0]  ;;  %v4100_v21 = vld [vmem:[%s8993_s1 + $0x10] sm:$0xf]  ;;  %v4270_v22 = vld [vmem:[%s8993_s1 + $0x178] sm:$0xf0] }
 0x34b   :  { %3474 = vmatpush.bf16.msrb.mxu3 %v4745_v45  ;;  %v5065_v45 = vld [vmem:[%s8993_s1 + $0xb4] sm:$0xf0]  ;;  %v4337_v36 = vor.u32 %v5103_v13, %v4334_v3  ;;  %v5086_v8 = vld [vmem:[%s8993_s1 + $0x164] sm:$0xf]  ;;  %v5080_v3 = vld [vmem:[%s8993_s1 + $0x134] sm:$0xf] }
 0x34c   :  { %v4173_v18 = vor.u32 %v5065_v45, %v4172_v11  ;;  %v5197_v13 = vld [vmem:[%s8993_s1 + $0x4d4] sm:$0xf0]  ;;  %v4486_v11 = vld [vmem:[%s8993_s1 + $0x328] sm:$0xf0] }
 0x34d   :  { %3513 = vmatpush.bf16.msra.mxu2 %v4557_v30  ;;  %3437 = vmatpush.bf16.msrb.mxu0 %v4121_v63  ;;  %v5071_v30 = vld [vmem:[%s8993_s1 + $0xe4] sm:$0xf0]  ;;  %v4701_v45 = vor.u32 %v5197_v13, %v4700_v47  ;;  %v5044_v13 = vld [vmem:[%s8993_s1 + $0x14] sm:$0xf] }
 0x34e   :  { %3444 = vmatpush.bf16.msrb.mxu1 %v4457_v62  ;;  %v4197_v63 = vor.u32 %v5071_v30, %v4196_v29  ;;  %v4821_v62 = vor.u32 %v5227_v37, %v4820_v25  ;;  %v4412_v25 = vld [vmem:[%s8993_s1 + $0x280] sm:$0xf]  ;;  %v5125_v37 = vld [vmem:[%s8993_s1 + $0x294] sm:$0xf0] }
 0x34f   :  { %3400 = vmatmul.bf16.vlgmr.msra.gmra.mxu1 %v8208_v54  ;;  %3475 = vmatpush.bf16.msrb.mxu3 %v4721_v28  ;;  %v5059_v28 = vld [vmem:[%s8993_s1 + $0x84] sm:$0xf0] }
 0x351   :  { %3514 = vmatpush.bf16.msra.mxu2 %v4533_v51  ;;  %3438 = vmatpush.bf16.msrb.mxu0 %v4097_v59  ;;  %v4796_v51 = vld [vmem:[%s8993_s1 + $0x580] sm:$0xf]  ;;  %v4148_v59 = vld [vmem:[%s8993_s1 + $0x70] sm:$0xf] }
 0x352   :  { %3445 = vmatpush.bf16.msrb.mxu1 %v4433_v52  ;;  %v4797_v10 = vor.u32 %v5221_v6, %v4796_v51  ;;  %v4585_v52 = vor.u32 %v5164_v55, %v4582_v61  ;;  %v4149_v35 = vor.u32 %v5059_v28, %v4148_v59  ;;  %v4388_v51 = vld [vmem:[%s8993_s1 + $0x250] sm:$0xf]  ;;  %v5119_v6 = vld [vmem:[%s8993_s1 + $0x264] sm:$0xf0]  ;;  %v4846_v59 = vld [vmem:[%s8993_s1 + $0x5f8] sm:$0xf0] }
 0x353   :  { %3476 = vmatpush.bf16.msrb.mxu3 %v4697_v57  ;;  %v5053_v57 = vld [vmem:[%s8993_s1 + $0x54] sm:$0xf0]  ;;  %v4676_v61 = vld [vmem:[%s8993_s1 + $0x490] sm:$0xf] }
 0x354   :  { %3439 = vmatmul.bf16.vlgmr.msrb.gmra.mxu0 %v8008_v5  ;;  %v4677_v28 = vor.u32 %v5191_v50, %v4676_v61  ;;  %v5194_v61 = vld [vmem:[%s8993_s1 + $0x4c4] sm:$0xf]  ;;  %v4702_v50 = vld [vmem:[%s8993_s1 + $0x4d8] sm:$0xf0] }
 0x355   :  { %3483 = vmatpush.bf16.msra.mxu0 %v4269_v60  ;;  %3515 = vmatpush.bf16.msra.mxu2 %v4509_v17  ;;  %v4772_v60 = vld [vmem:[%s8993_s1 + $0x550] sm:$0xf]  ;;  %v4558_v17 = vld [vmem:[%s8993_s1 + $0x3b8] sm:$0xf0] }
 0x356   :  { %3446 = vmatpush.bf16.msrb.mxu1 %v4409_v24  ;;  %v4773_v19 = vor.u32 %v5215_v42, %v4772_v60  ;;  %v4460_v24 = vld [vmem:[%s8993_s1 + $0x2e0] sm:$0xf]  ;;  %v4561_v48 = vor.u32 %v5158_v40, %v4558_v17  ;;  %v5113_v42 = vld [vmem:[%s8993_s1 + $0x234] sm:$0xf0]  ;;  %v5068_v17 = vld [vmem:[%s8993_s1 + $0xd4] sm:$0xf] }
 0x357   :  { %3477 = vmatpush.bf16.msrb.mxu3 %v4673_v7  ;;  %v4461_v20 = vor.u32 %v5137_v26, %v4460_v24  ;;  %v5203_v7 = vld [vmem:[%s8993_s1 + $0x504] sm:$0xf0]  ;;  %v4364_v60 = vld [vmem:[%s8993_s1 + $0x220] sm:$0xf]  ;;  %v4201_v26 = vor.u32 %v5068_v17, %v4198_v0  ;;  %v5110_v0 = vld [vmem:[%s8993_s1 + $0x224] sm:$0xf] }
 0x358   :  { %v4725_v30 = vor.u32 %v5203_v7, %v4724_v53  ;;  %v5107_v24 = vld [vmem:[%s8993_s1 + $0x204] sm:$0xf0] }
 0x359   :  { %3484 = vmatpush.bf16.msra.mxu0 %v4245_v44  ;;  %3516 = vmatpush.bf16.msra.mxu2 %v4485_v49  ;;  %v4748_v44 = vld [vmem:[%s8993_s1 + $0x520] sm:$0xf]  ;;  %v5152_v49 = vld [vmem:[%s8993_s1 + $0x374] sm:$0xf]  ;;  %v5095_v53 = vld [vmem:[%s8993_s1 + $0x1a4] sm:$0xf0] }
 0x35a   :  { %3447 = vmatpush.bf16.msrb.mxu1 %v4385_v38  ;;  %3478 = vmatmul.bf16.vlgmr.msrb.gmra.mxu3 %v8070_v15  ;;  %v4749_v14 = vor.u32 %v5209_v33, %v4748_v44  ;;  %v5131_v38 = vld [vmem:[%s8993_s1 + $0x2c4] sm:$0xf0]  ;;  %v4537_v1 = vor.u32 %v5152_v49, %v4534_v41  ;;  %v5218_v44 = vld [vmem:[%s8993_s1 + $0x584] sm:$0xf]  ;;  %v4798_v33 = vld [vmem:[%s8993_s1 + $0x598] sm:$0xf0] }
 0x35b   :  { %3522 = vmatpush.bf16.msra.mxu3 %v4845_v16  ;;  %v4510_v16 = vld [vmem:[%s8993_s1 + $0x358] sm:$0xf0]  ;;  %v4437_v29 = vor.u32 %v5131_v38, %v4436_v43  ;;  %v4316_v49 = vld [vmem:[%s8993_s1 + $0x1c0] sm:$0xf]  ;;  %v5101_v41 = vld [vmem:[%s8993_s1 + $0x1d4] sm:$0xf0] }
 0x35c   :  { %3517 = vmatmul.bf16.vlgmr.msra.gmra.mxu2 %v7818_v58  ;;  %v4774_v43 = vld [vmem:[%s8993_s1 + $0x568] sm:$0xf0]  ;;  %v4317_v38 = vor.u32 %v5101_v41, %v4316_v49 }
 0x35d   :  { %3561 = vmatpush.bf16.msrb.mxu2 %v4657_v9  ;;  %3485 = vmatpush.bf16.msra.mxu0 %v4221_v31  ;;  %v4125_v9 = vor.u32 %v5053_v57, %v4124_v34  ;;  %v5146_v31 = vld [vmem:[%s8993_s1 + $0x344] sm:$0xf]  ;;  %v4340_v34 = vld [vmem:[%s8993_s1 + $0x1f0] sm:$0xf] }
 0x35e   :  { %3448 = vmatpush.bf16.msrb.mxu1 %v4361_v23  ;;  %v4273_v23 = vor.u32 %v5086_v8, %v4270_v22  ;;  %v4513_v2 = vor.u32 %v5146_v31, %v4510_v16  ;;  %v5062_v57 = vld [vmem:[%s8993_s1 + $0xa4] sm:$0xf]  ;;  %v4462_v16 = vld [vmem:[%s8993_s1 + $0x2f8] sm:$0xf0] }
 0x35f   :  { %3523 = vmatpush.bf16.msra.mxu3 %v4821_v62  ;;  %v5140_v62 = vld [vmem:[%s8993_s1 + $0x314] sm:$0xf]  ;;  %v5050_v22 = vld [vmem:[%s8993_s1 + $0x44] sm:$0xf] }
 0x360   :  { %v4489_v55 = vor.u32 %v5140_v62, %v4486_v11  ;;  %v5134_v31 = vld [vmem:[%s8993_s1 + $0x2e4] sm:$0xf]  ;;  %v4102_v62 = vld [vmem:[%s8993_s1 + $0x28] sm:$0xf0]  ;;  %v5200_v11 = vld [vmem:[%s8993_s1 + $0x4f4] sm:$0xf] }
 0x361   :  { %3562 = vmatpush.bf16.msrb.mxu2 %v4633_v56  ;;  %3486 = vmatpush.bf16.msra.mxu0 %v4197_v63  ;;  %v4101_v56 = vor.u32 %v5047_v39, %v4100_v21  ;;  %v4246_v63 = vld [vmem:[%s8993_s1 + $0x148] sm:$0xf0]  ;;  %v4801_v21 = vor.u32 %v5218_v44, %v4798_v33  ;;  %v5212_v39 = vld [vmem:[%s8993_s1 + $0x554] sm:$0xf]  ;;  %v5098_v44 = vld [vmem:[%s8993_s1 + $0x1c4] sm:$0xf] }
 0x362   :  { %3449 = vmatpush.bf16.msrb.mxu1 %v4337_v36  ;;  %v4249_v36 = vor.u32 %v5080_v3, %v4246_v63  ;;  %v4777_v8 = vor.u32 %v5212_v39, %v4774_v43  ;;  %v5128_v3 = vld [vmem:[%s8993_s1 + $0x2b4] sm:$0xf]  ;;  %v4438_v63 = vld [vmem:[%s8993_s1 + $0x2c8] sm:$0xf0]  ;;  %v4318_v33 = vld [vmem:[%s8993_s1 + $0x1d8] sm:$0xf0] }
 0x363   :  { %3524 = vmatpush.bf16.msra.mxu3 %v4797_v10  ;;  %v5230_v10 = vld [vmem:[%s8993_s1 + $0x5e4] sm:$0xf]  ;;  %v4321_v49 = vor.u32 %v5098_v44, %v4318_v33  ;;  %v5249_v43 = vld [vmem:[%s8995_s3 + $0x78] sm:$0xff]  ;;  %v5260_v33 = vld [vmem:[%s8995_s3 + $0xd0] sm:$0xff] }
 0x364   :  { %v4849_v40 = vor.u32 %v5230_v10, %v4846_v59  ;;  %v4705_v59 = vor.u32 %v5194_v61, %v4702_v50  ;;  %v5250_v50 = vld [vmem:[%s8995_s3 + $0x80] sm:$0xff] }
 0x365   :  { %3563 = vmatpush.bf16.msrb.mxu2 %v4609_v12  ;;  %3487 = vmatpush.bf16.msra.mxu0 %v4173_v18  ;;  %v4413_v12 = vor.u32 %v5125_v37, %v4412_v25  ;;  %v4222_v18 = vld [vmem:[%s8993_s1 + $0x118] sm:$0xf0] }
 0x366   :  { %3450 = vmatpush.bf16.msrb.mxu1 %v4313_v32  ;;  %v4225_v32 = vor.u32 %v5074_v46, %v4222_v18  ;;  %v5241_v46 = vld [vmem:[%s8995_s3 + $0x38] sm:$0xff] }
 0x367   :  { %3525 = vmatpush.bf16.msra.mxu3 %v4773_v19  ;;  %v4365_v19 = vor.u32 %v5113_v42, %v4364_v60  ;;  %v5188_v60 = vld [vmem:[%s8993_s1 + $0x494] sm:$0xf]  ;;  %v4678_v42 = vld [vmem:[%s8993_s1 + $0x4a8] sm:$0xf0] }
 0x368   :  { %v4681_v17 = vor.u32 %v5188_v60, %v4678_v42 }
 0x369   :  { %3564 = vmatpush.bf16.msrb.mxu2 %v4585_v52  ;;  %3488 = vmatpush.bf16.msra.mxu0 %v4149_v35  ;;  %v4389_v52 = vor.u32 %v5119_v6, %v4388_v51  ;;  %v4822_v35 = vld [vmem:[%s8993_s1 + $0x5c8] sm:$0xf0]  ;;  %v4105_v51 = vor.u32 %v5044_v13, %v4102_v62 }
 0x36a   :  { %3451 = vmatpush.bf16.msrb.mxu1 %v4289_v27  ;;  %v4341_v27 = vor.u32 %v5107_v24, %v4340_v34  ;;  %v5104_v24 = vld [vmem:[%s8993_s1 + $0x1f4] sm:$0xf] }
 0x36b   :  { %3526 = vmatpush.bf16.msra.mxu3 %v4749_v14  ;;  %v4150_v14 = vld [vmem:[%s8993_s1 + $0x88] sm:$0xf0] }
 0x36d   :  { %3565 = vmatpush.bf16.msrb.mxu2 %v4561_v48  ;;  %3489 = vmatpush.bf16.msra.mxu0 %v4125_v9  ;;  %v4825_v48 = vor.u32 %v5224_v4, %v4822_v35  ;;  %v5056_v9 = vld [vmem:[%s8993_s1 + $0x74] sm:$0xf]  ;;  %v4366_v4 = vld [vmem:[%s8993_s1 + $0x238] sm:$0xf0]  ;;  %v5239_v35 = vld [vmem:[%s8995_s3 + $0x28] sm:$0xff] }
 0x36e   :  { %3496 = vmatpush.bf16.msra.mxu1 %v4461_v20  ;;  %v4153_v7 = vor.u32 %v5056_v9, %v4150_v14  ;;  %v5256_v9 = vld [vmem:[%s8995_s3 + $0xb0] sm:$0xff] }
 0x36f   :  { %3452 = vmatmul.bf16.vlgmr.msrb.gmra.mxu1 %v8208_v54  ;;  %3527 = vmatpush.bf16.msra.mxu3 %v4725_v30  ;;  %v4750_v30 = vld [vmem:[%s8993_s1 + $0x538] sm:$0xf0]  ;;  %v5236_v14 = vld [vmem:[%s8995_s3 + $0x10] sm:$0xff] }
 0x371   :  { %3566 = vmatpush.bf16.msrb.mxu2 %v4537_v1  ;;  %3490 = vmatpush.bf16.msra.mxu0 %v4101_v56  ;;  %v4292_v1 = vld [vmem:[%s8993_s1 + $0x190] sm:$0xf]  ;;  %v5206_v56 = vld [vmem:[%s8993_s1 + $0x524] sm:$0xf] }
 0x372   :  { %3497 = vmatpush.bf16.msra.mxu1 %v4437_v29  ;;  %v4126_v29 = vld [vmem:[%s8993_s1 + $0x58] sm:$0xf0]  ;;  %v4293_v37 = vor.u32 %v5095_v53, %v4292_v1  ;;  %v4753_v47 = vor.u32 %v5206_v56, %v4750_v30  ;;  %v5235_v53 = vld [vmem:[%s8995_s3 + $0x8] sm:$0xff] }
 0x373   :  { %3528 = vmatpush.bf16.msra.mxu3 %v4701_v45  ;;  %v4441_v45 = vor.u32 %v5128_v3, %v4438_v63  ;;  %v5253_v30 = vld [vmem:[%s8995_s3 + $0x98] sm:$0xff]  ;;  %v5252_v63 = vld [vmem:[%s8995_s3 + $0x90] sm:$0xff] }
 0x374   :  { %3491 = vmatmul.bf16.vlgmr.msra.gmra.mxu0 %v8008_v5 }
 0x375   :  { %3535 = vmatpush.bf16.msrb.mxu0 %v4273_v23  ;;  %3567 = vmatpush.bf16.msrb.mxu2 %v4513_v2  ;;  %v4465_v23 = vor.u32 %v5134_v31, %v4462_v16  ;;  %v4129_v2 = vor.u32 %v5050_v22, %v4126_v29  ;;  %v5248_v31 = vld [vmem:[%s8995_s3 + $0x70] sm:$0xff]  ;;  %v5254_v16 = vld [vmem:[%s8995_s3 + $0xa0] sm:$0xff] }
 0x376   :  { %3498 = vmatpush.bf16.msra.mxu1 %v4413_v12  ;;  %v4726_v12 = vld [vmem:[%s8993_s1 + $0x508] sm:$0xf0]  ;;  %v5234_v29 = vld [vmem:[%s8995_s3] sm:$0xff] }
 0x377   :  { %3529 = vmatpush.bf16.msra.mxu3 %v4677_v28  ;;  %v4729_v6 = vor.u32 %v5200_v11, %v4726_v12  ;;  %v4390_v28 = vld [vmem:[%s8993_s1 + $0x268] sm:$0xf0]  ;;  %v5245_v12 = vld [vmem:[%s8995_s3 + $0x58] sm:$0xff] }
 0x379   :  { %3536 = vmatpush.bf16.msrb.mxu0 %v4249_v36  ;;  %3568 = vmatpush.bf16.msrb.mxu2 %v4489_v55  ;;  %v5122_v36 = vld [vmem:[%s8993_s1 + $0x284] sm:$0xf]  ;;  %v4414_v55 = vld [vmem:[%s8993_s1 + $0x298] sm:$0xf0] }
 0x37a   :  { %3499 = vmatpush.bf16.msra.mxu1 %v4389_v52  ;;  %3530 = vmatmul.bf16.vlgmr.msra.gmra.mxu3 %v8070_v15  ;;  %v4417_v10 = vor.u32 %v5122_v36, %v4414_v55  ;;  %v5116_v52 = vld [vmem:[%s8993_s1 + $0x254] sm:$0xf] }
 0x37b   :  { %3574 = vmatpush.bf16.msrb.mxu3 %v4849_v40  ;;  %v4393_v40 = vor.u32 %v5116_v52, %v4390_v28  ;;  %v5264_v52 = vld [vmem:[%s8995_s3 + $0xf0] sm:$0xff] }
 0x37c   :  { %3569 = vmatmul.bf16.vlgmr.msrb.gmra.mxu2 %v7818_v58  ;;  %v4174_v58 = vld [vmem:[%s8993_s1 + $0xb8] sm:$0xf0] }
 0x37d   :  { %3537 = vmatpush.bf16.msrb.mxu0 %v4225_v32  ;;  %v4177_v20 = vor.u32 %v5062_v57, %v4174_v58  ;;  %v5240_v32 = vld [vmem:[%s8995_s3 + $0x30] sm:$0xff]  ;;  %v5257_v58 = vld [vmem:[%s8995_s3 + $0xb8] sm:$0xff] }
 0x37e   :  { %3500 = vmatpush.bf16.msra.mxu1 %v4365_v19  ;;  %4013 = vmatpush.bf16.msra.mxu2 %v5257_v58 }
 0x37f   :  { %3575 = vmatpush.bf16.msrb.mxu3 %v4825_v48  ;;  %v8752_v25 = vpop.f32.mrf.mxu2  ;;  %v5238_v48 = vld [vmem:[%s8995_s3 + $0x20] sm:$0xff] }
 0x381   :  { %3538 = vmatpush.bf16.msrb.mxu0 %v4201_v26  ;;  %v4342_v26 = vld [vmem:[%s8993_s1 + $0x208] sm:$0xf0] }
 0x382   :  { %3501 = vmatpush.bf16.msra.mxu1 %v4341_v27  ;;  %v4345_v57 = vor.u32 %v5104_v24, %v4342_v26  ;;  %v5237_v27 = vld [vmem:[%s8995_s3 + $0x18] sm:$0xff]  ;;  %4014 = vmatpush.bf16.msra.mxu2 %v5256_v9  ;;  %v5258_v9 = vld [vmem:[%s8995_s3 + $0xc0] sm:$0xff] }
 0x383   :  { %3576 = vmatpush.bf16.msrb.mxu3 %v4801_v21  ;;  %v4294_v21 = vld [vmem:[%s8993_s1 + $0x1a8] sm:$0xf0] }
 0x385   :  { %3539 = vmatpush.bf16.msrb.mxu0 %v4177_v20  ;;  %v5092_v20 = vld [vmem:[%s8993_s1 + $0x194] sm:$0xf] }
 0x386   :  { %3502 = vmatpush.bf16.msra.mxu1 %v4317_v38  ;;  %v4297_v39 = vor.u32 %v5092_v20, %v4294_v21  ;;  %v5255_v38 = vld [vmem:[%s8995_s3 + $0xa8] sm:$0xff] }
 0x387   :  { %3577 = vmatpush.bf16.msrb.mxu3 %v4777_v8  ;;  %v3312_v18 = vpop.f32.mrf.mxu2  ;;  %4015 = vmatpush.bf16.msra.mxu2 %v5255_v38  ;;  %v8863_v8 = vld [vmem:[%s8994_s2] sm:$0x3f] }
 0x388   :  { %v1368_v56 = vperm.slane %v8863_v8, 0  ;;  %v1370_v44 = vperm.slane %v8863_v8, 2 }
 0x389   :  { %3540 = vmatpush.bf16.msrb.mxu0 %v4153_v7 }
 0x38a   :  { %3503 = vmatpush.bf16.msra.mxu1 %v4293_v37  ;;  %v5247_v37 = vld [vmem:[%s8995_s3 + $0x68] sm:$0xff] }
 0x38b   :  { %3578 = vmatpush.bf16.msrb.mxu3 %v4753_v47  ;;  %4016 = vmatpush.bf16.msra.mxu2 %v5254_v16 }
 0x38d   :  { %3541 = vmatpush.bf16.msrb.mxu0 %v4129_v2  ;;  %3504 = vmatmul.bf16.vlgmr.msra.gmra.mxu1 %v8208_v54 }
 0x38e   :  { %3548 = vmatpush.bf16.msrb.mxu1 %v4465_v23 }
 0x38f   :  { %3579 = vmatpush.bf16.msrb.mxu3 %v4729_v6  ;;  %v8813_v19 = vpop.f32.mrf.mxu2  ;;  %4017 = vmatpush.bf16.msra.mxu2 %v5253_v30  ;;  %v5269_v30 = vld [vmem:[%s8995_s3 + $0x118] sm:$0xff] }
 0x391   :  { %3542 = vmatpush.bf16.msrb.mxu0 %v4105_v51  ;;  %v3284_v34 = vpop.f32.mrf.mxu0 }
 0x392   :  { %3549 = vmatpush.bf16.msrb.mxu1 %v4441_v45  ;;  %v3285_v47 = vadd.f32 %v3284_v34, %v1368_v56  ;;  %v5251_v45 = vld [vmem:[%s8995_s3 + $0x88] sm:$0xff] }
 0x393   :  { %3580 = vmatpush.bf16.msrb.mxu3 %v4705_v59  ;;  %4018 = vmatpush.bf16.msra.mxu2 %v5252_v63  ;;  %v5243_v59 = vld [vmem:[%s8995_s3 + $0x48] sm:$0xff] }
 0x394   :  { %3543 = vmatmul.bf16.vlgmr.msrb.gmra.mxu0 %v8008_v5  ;;  %v4369_v5 = vor.u32 %v5110_v0, %v4366_v4 }
 0x395   :  { %3987 = vmatpush.bf16.msra.mxu0 %v5241_v46  ;;  %v5265_v46 = vld [vmem:[%s8995_s3 + $0xf8] sm:$0xff] }
 0x396   :  { %3550 = vmatpush.bf16.msrb.mxu1 %v4417_v10  ;;  %v1369_v10 = vperm.slane %v8863_v8, 1 }
 0x397   :  { %3581 = vmatpush.bf16.msrb.mxu3 %v4681_v17  ;;  %4019 = vmatpush.bf16.msra.mxu2 %v5251_v45  ;;  %v5263_v17 = vld [vmem:[%s8995_s3 + $0xe8] sm:$0xff]  ;;  %v5281_v45 = vld [vmem:[%s8995_s3 + $0x178] sm:$0xff] }
 0x399   :  { %3988 = vmatpush.bf16.msra.mxu0 %v5240_v32  ;;  %v3286_v41 = vpop.f32.mrf.mxu0 }
 0x39a   :  { %3551 = vmatpush.bf16.msrb.mxu1 %v4393_v40  ;;  %3582 = vmatmul.bf16.vlgmr.msrb.gmra.mxu3 %v8070_v15  ;;  %v3364_v15 = vpop.f32.mrf.mxu2  ;;  %v5242_v40 = vld [vmem:[%s8995_s3 + $0x40] sm:$0xff]  ;;  %v5259_v41 = vld [vmem:[%s8995_s3 + $0xc8] sm:$0xff] }
 0x39b   :  { %4020 = vmatpush.bf16.msra.mxu2 %v5250_v50  ;;  %4026 = vmatpush.bf16.msra.mxu3 %v5265_v46 }
 0x39d   :  { %3989 = vmatpush.bf16.msra.mxu0 %v5239_v35  ;;  %v3323_v1 = vpop.f32.mrf.mxu3 }
 0x39e   :  { %3552 = vmatpush.bf16.msrb.mxu1 %v4369_v5  ;;  %v5262_v5 = vld [vmem:[%s8995_s3 + $0xe0] sm:$0xff] }
 0x39f   :  { %4027 = vmatpush.bf16.msra.mxu3 %v5264_v52  ;;  %v1372_v52 = vperm.slane %v8863_v8, 4 }
 0x3a1   :  { %3990 = vmatpush.bf16.msra.mxu0 %v5238_v48  ;;  %v3336_v22 = vpop.f32.mrf.mxu0 }
 0x3a2   :  { %3553 = vmatpush.bf16.msrb.mxu1 %v4345_v57  ;;  %v8858_v7 = vpop.f32.mrf.mxu2  ;;  %v3337_v60 = vadd.f32 %v3336_v22, %v1369_v10  ;;  %v5261_v57 = vld [vmem:[%s8995_s3 + $0xd8] sm:$0xff]  ;;  %v5272_v22 = vld [vmem:[%s8995_s3 + $0x130] sm:$0xff] }
 0x3a3   :  { %4028 = vmatpush.bf16.msra.mxu3 %v5263_v17  ;;  %v5277_v10 = vld [vmem:[%s8995_s3 + $0x158] sm:$0xff]  ;;  %v5275_v17 = vld [vmem:[%s8995_s3 + $0x148] sm:$0xff] }
 0x3a5   :  { %3991 = vmatpush.bf16.msra.mxu0 %v5237_v27  ;;  %v3325_v23 = vpop.f32.mrf.mxu3 }
 0x3a6   :  { %3554 = vmatpush.bf16.msrb.mxu1 %v4321_v49 }
 0x3a7   :  { %4029 = vmatpush.bf16.msra.mxu3 %v5262_v5 }
 0x3a9   :  { %3992 = vmatpush.bf16.msra.mxu0 %v5236_v14  ;;  %v3297_v13 = vpop.f32.mrf.mxu1  ;;  %v3338_v3 = vpop.f32.mrf.mxu0 }
 0x3aa   :  { %3555 = vmatpush.bf16.msrb.mxu1 %v4297_v39  ;;  %v3416_v2 = vpop.f32.mrf.mxu2  ;;  %v3298_v62 = vadd.f32 %v3297_v13, %v3285_v47 }
 0x3ab   :  { %4030 = vmatpush.bf16.msra.mxu3 %v5261_v57  ;;  %v5268_v2 = vld [vmem:[%s8995_s3 + $0x110] sm:$0xff] }
 0x3ac   :  { %v3311_v11 = vadd.f32 %v8752_v25, %v3298_v62  ;;  %v5244_v25 = vld [vmem:[%s8995_s3 + $0x50] sm:$0xff] }
 0x3ad   :  { %3993 = vmatpush.bf16.msra.mxu0 %v5235_v53  ;;  %3556 = vmatmul.bf16.vlgmr.msrb.gmra.mxu1 %v8208_v54  ;;  %v5246_v54 = vld [vmem:[%s8995_s3 + $0x60] sm:$0xff]  ;;  %v3375_v6 = vpop.f32.mrf.mxu3 }
 0x3ae   :  { %4000 = vmatpush.bf16.msra.mxu1 %v5249_v43  ;;  %v3324_v51 = vadd.f32 %v3323_v1, %v3311_v11  ;;  %v5273_v43 = vld [vmem:[%s8995_s3 + $0x138] sm:$0xff]  ;;  %v5266_v11 = vld [vmem:[%s8995_s3 + $0x100] sm:$0xff] }
 0x3af   :  { %4031 = vmatpush.bf16.msra.mxu3 %v5260_v33 }
 0x3b0   :  { %v3587_v36 = vmax.f32 %v3324_v51, 0.0 }
 0x3b1   :  { %3994 = vmatpush.bf16.msra.mxu0 %v5234_v29  ;;  %v3299_v55 = vpop.f32.mrf.mxu1  ;;  %v3388_v61 = vpop.f32.mrf.mxu0  ;;  %v5270_v29 = vld [vmem:[%s8995_s3 + $0x120] sm:$0xff] }
 0x3b2   :  { %4001 = vmatpush.bf16.msra.mxu1 %v5248_v31  ;;  %v3593_v18 = vpack.c.bf16 %v3587_v36, %v3587_v36  ;;  %v3389_v15 = vadd.f32 %v3388_v61, %v1370_v44  ;;  %v5271_v31 = vld [vmem:[%s8995_s3 + $0x128] sm:$0xff]  ;;  %v5280_v61 = vld [vmem:[%s8995_s3 + $0x170] sm:$0xff]  ;;  %v1373_v44 = vperm.slane %v8863_v8, 5 }
 0x3b3   :  { %4032 = vmatpush.bf16.msra.mxu3 %v5259_v41 }
 0x3b4   :  { %3995 = vmatmul.bf16.vlgmr.msra.gmra.mxu0 %v3593_v18  ;;  %v5278_v18 = vld [vmem:[%s8995_s3 + $0x160] sm:$0xff] }
 0x3b5   :  { %v3377_v28 = vpop.f32.mrf.mxu3  ;;  %4039 = vmatpush.bf16.msrb.mxu0 %v5273_v43  ;;  %v5283_v43 = vld [vmem:[%s8996_s4] ss:$0 sm:$0xff] }
 0x3b6   :  { %4002 = vmatpush.bf16.msra.mxu1 %v5247_v37  ;;  %v1371_v37 = vperm.slane %v8863_v8, 3 }
 0x3b7   :  { %4033 = vmatpush.bf16.msra.mxu3 %v5258_v9 }
 0x3b9   :  { %v3349_v42 = vpop.f32.mrf.mxu1  ;;  %v3390_v32 = vpop.f32.mrf.mxu0  ;;  %4040 = vmatpush.bf16.msrb.mxu0 %v5272_v22 }
 0x3ba   :  { %4003 = vmatpush.bf16.msra.mxu1 %v5246_v54  ;;  %v3350_v0 = vadd.f32 %v3349_v42, %v3337_v60  ;;  %v5267_v54 = vld [vmem:[%s8995_s3 + $0x108] sm:$0xff]  ;;  %v5276_v60 = vld [vmem:[%s8995_s3 + $0x150] sm:$0xff] }
 0x3bc   :  { %v3363_v4 = vadd.f32 %v8813_v19, %v3350_v0 }
 0x3bd   :  { %v3427_v24 = vpop.f32.mrf.mxu3  ;;  %4041 = vmatpush.bf16.msrb.mxu0 %v5271_v31 }
 0x3be   :  { %4004 = vmatpush.bf16.msra.mxu1 %v5245_v12  ;;  %v3376_v34 = vadd.f32 %v3375_v6, %v3363_v4 }
 0x3bf   :  { %v3466_v35 = vpop.f32.mrf.mxu2 }
 0x3c0   :  { %v3588_v26 = vmax.f32 %v3376_v34, 0.0 }
 0x3c1   :  { %v3351_v48 = vpop.f32.mrf.mxu1  ;;  %4042 = vmatpush.bf16.msrb.mxu0 %v5270_v29 }
 0x3c2   :  { %4005 = vmatpush.bf16.msra.mxu1 %v5244_v25  ;;  %v3594_v58 = vpack.c.bf16 %v3588_v26, %v3588_v26  ;;  %v5279_v25 = vld [vmem:[%s8995_s3 + $0x168] sm:$0xff] }
 0x3c5   :  { %v3429_v27 = vpop.f32.mrf.mxu3  ;;  %4043 = vmatpush.bf16.msrb.mxu0 %v5269_v30 }
 0x3c6   :  { %4006 = vmatpush.bf16.msra.mxu1 %v5243_v59 }
 0x3c7   :  { %v3468_v19 = vpop.f32.mrf.mxu2 }
 0x3c9   :  { %4044 = vmatpush.bf16.msrb.mxu0 %v5268_v2 }
 0x3ca   :  { %4007 = vmatpush.bf16.msra.mxu1 %v5242_v40 }
 0x3cc   :  { %v3401_v49 = vpop.f32.mrf.mxu1 }
 0x3cd   :  { %4008 = vmatmul.bf16.vlgmr.msra.gmra.mxu1 %v3594_v58  ;;  %v3402_v20 = vadd.f32 %v3401_v49, %v3389_v15  ;;  %4045 = vmatpush.bf16.msrb.mxu0 %v5267_v54 }
 0x3ce   :  { %4052 = vmatpush.bf16.msrb.mxu1 %v5281_v45 }
 0x3cf   :  { %v3415_v21 = vadd.f32 %v8858_v7, %v3402_v20 }
 0x3d1   :  { %v3428_v14 = vadd.f32 %v3427_v24, %v3415_v21  ;;  %v3440_v39 = vpop.f32.mrf.mxu0  ;;  %4046 = vmatpush.bf16.msrb.mxu0 %v5266_v11 }
 0x3d2   :  { %v3441_v47 = vadd.f32 %v3440_v39, %v1371_v37  ;;  %4053 = vmatpush.bf16.msrb.mxu1 %v5280_v61 }
 0x3d3   :  { %v3589_v38 = vmax.f32 %v3428_v14, 0.0 }
 0x3d4   :  { %v3403_v1 = vpop.f32.mrf.mxu1 }
 0x3d5   :  { %v3595_v53 = vpack.c.bf16 %v3589_v38, %v3589_v38 }
 0x3d6   :  { %4054 = vmatpush.bf16.msrb.mxu1 %v5279_v25 }
 0x3d7   :  { %4021 = vmatmul.bf16.vlgmr.msra.gmra.mxu2 %v3595_v53 }
 0x3d9   :  { %v3442_v7 = vpop.f32.mrf.mxu0 }
 0x3da   :  { %4055 = vmatpush.bf16.msrb.mxu1 %v5278_v18 }
 0x3dd   :  { %v3479_v56 = vpop.f32.mrf.mxu3 }
 0x3de   :  { %4056 = vmatpush.bf16.msrb.mxu1 %v5277_v10 }
 0x3df   :  { %v3518_v16 = vpop.f32.mrf.mxu2 }
 0x3e2   :  { %4057 = vmatpush.bf16.msrb.mxu1 %v5276_v60 }
 0x3e5   :  { %v3481_v13 = vpop.f32.mrf.mxu3 }
 0x3e6   :  { %4058 = vmatpush.bf16.msrb.mxu1 %v5275_v17 }
 0x3e7   :  { %v3520_v23 = vpop.f32.mrf.mxu2 }
 0x3ec   :  { %v3453_v3 = vpop.f32.mrf.mxu1 }
 0x3ed   :  { %v3454_v63 = vadd.f32 %v3453_v3, %v3441_v47 }
 0x3ef   :  { %v3467_v62 = vadd.f32 %v3466_v35, %v3454_v63  ;;  %v5274_v35 = vld [vmem:[%s8995_s3 + $0x140] sm:$0xff] }
 0x3f0   :  { %4059 = vmatpush.bf16.msrb.mxu1 %v5274_v35 }
 0x3f1   :  { %v3480_v12 = vadd.f32 %v3479_v56, %v3467_v62  ;;  %v3492_v51 = vpop.f32.mrf.mxu0 }
 0x3f2   :  { %v3493_v42 = vadd.f32 %v3492_v51, %v1372_v52 }
 0x3f3   :  { %v3590_v6 = vmax.f32 %v3480_v12, 0.0 }
 0x3f4   :  { %v3455_v36 = vpop.f32.mrf.mxu1 }
 0x3f5   :  { %v3596_v55 = vpack.c.bf16 %v3590_v6, %v3590_v6 }
 0x3f7   :  { %4034 = vmatmul.bf16.vlgmr.msra.gmra.mxu3 %v3596_v55 }
 0x3f9   :  { %v3494_v50 = vpop.f32.mrf.mxu0 }
 0x3fd   :  { %v3531_v59 = vpop.f32.mrf.mxu3 }
 0x3ff   :  { %v3570_v46 = vpop.f32.mrf.mxu2 }
 0x405   :  { %v3533_v32 = vpop.f32.mrf.mxu3 }
 0x407   :  { %v3572_v28 = vpop.f32.mrf.mxu2 }
 0x40a   :  { %v3505_v40 = vpop.f32.mrf.mxu1 }
 0x40b   :  { %v3506_v0 = vadd.f32 %v3505_v40, %v3493_v42 }
 0x40d   :  { %v3519_v4 = vadd.f32 %v3518_v16, %v3506_v0 }
 0x40f   :  { %v3532_v5 = vadd.f32 %v3531_v59, %v3519_v4 }
 0x411   :  { %v3544_v34 = vpop.f32.mrf.mxu0  ;;  %v3591_v24 = vmax.f32 %v3532_v5, 0.0 }
 0x412   :  { %v3507_v26 = vpop.f32.mrf.mxu1  ;;  %v3545_v19 = vadd.f32 %v3544_v34, %v1373_v44 }
 0x413   :  { %v3597_v48 = vpack.c.bf16 %v3591_v24, %v3591_v24 }
 0x415   :  { %4047 = vmatmul.bf16.vlgmr.msrb.gmra.mxu0 %v3597_v48 }
 0x419   :  { %v3546_v57 = vpop.f32.mrf.mxu0 }
 0x41d   :  { %v3583_v58 = vpop.f32.mrf.mxu3 }
 0x425   :  { %v3585_v33 = vpop.f32.mrf.mxu3 }
 0x42a   :  { %v3557_v27 = vpop.f32.mrf.mxu1 }
 0x42b   :  { %v3558_v15 = vadd.f32 %v3557_v27, %v3545_v19 }
 0x42d   :  { %v3571_v49 = vadd.f32 %v3570_v46, %v3558_v15 }
 0x42f   :  { %v3584_v41 = vadd.f32 %v3583_v58, %v3571_v49 }
 0x431   :  { %v3592_v20 = vmax.f32 %v3584_v41, 0.0  ;;  %v3996_v14 = vpop.f32.mrf.mxu0 }
 0x432   :  { %v3559_v21 = vpop.f32.mrf.mxu1  ;;  %v3997_v38 = vadd.f32 %v5283_v43, %v3996_v14 }
 0x433   :  { %v3598_v9 = vpack.c.bf16 %v3592_v20, %v3592_v20 }
 0x435   :  { %4060 = vmatmul.bf16.vlgmr.msrb.gmra.mxu1 %v3598_v9 }
 0x439   :  { %v3998_v39 = vpop.f32.mrf.mxu0 }
 0x44a   :  { %v4009_v1 = vpop.f32.mrf.mxu1 }
 0x44b   :  { %v4010_v53 = vadd.f32 %v4009_v1, %v3997_v38 }
 0x452   :  { %v4011_v8 = vpop.f32.mrf.mxu1 }
 0x45a   :  { %v4022_v22 = vpop.f32.mrf.mxu2 }
 0x45b   :  { %v4023_v7 = vadd.f32 %v4022_v22, %v4010_v53 }
 0x462   :  { %v4024_v31 = vpop.f32.mrf.mxu2 }
 0x47a   :  { %v4035_v16 = vpop.f32.mrf.mxu3 }
 0x47b   :  { %v4036_v37 = vadd.f32 %v4035_v16, %v4023_v7 }
 0x482   :  { %v4037_v29 = vpop.f32.mrf.mxu3 }
 0x492   :  { %v4048_v56 = vpop.f32.mrf.mxu0 }
 0x493   :  { %v4049_v23 = vadd.f32 %v4048_v56, %v4036_v37 }
 0x49a   :  { %v4050_v30 = vpop.f32.mrf.mxu0 }
 0x4b2   :  { %v4061_v2 = vpop.f32.mrf.mxu1 }
 0x4b3   :  { %v4062_v47 = vadd.f32 %v4061_v2, %v4049_v23 }
 0x4b5   :  { %4065 = vst [vmem:[#allocation2] sm:$0xf] %v4062_v47 }
 0x4b6   :  { %4076 = dma.vmem_to_hbm [thread:$0]  %s4072_s9, 64, %s4074_s12, [#allocation3]  }
 0x4ba   :  { %v4063_v13 = vpop.f32.mrf.mxu1 }
 0x4bb   :  { %5308 = dma.done.wait [#allocation3], 64  }
 0x4bc   :  { %5309 = vsyncadd [#allocation3], 4294967232 }
 0x4bd   :  { %4081 = vsyncpa [#allocation3], 1 }

</bundles_post_ra>
